<compile_context>
chip_gen: v7x
topology: tpu7x:2x2x1
jax: 0.10.0
libtpu: 0.0.40
codegen_flags: <defaults>
</compile_context>

<pallas_src>
import functools
import math

import jax
import jax.numpy as jnp
from jax import lax
from jax.experimental import pallas as pl
from jax.experimental.pallas import tpu as pltpu


def _round_up(x, m):
    return ((x + m - 1) // m) * m


def _gru_kernel(num_layers, hidden_size, t_chunk,
                tile_max_ref,       # (num_b_tiles,) int32  (scalar prefetch, SMEM)
                x_ref,              # (Tc, Bt, E)  layer-0 input chunk
                len_ref,            # (Bt, 1) int32 per-row sequence lengths
                h0_ref,             # (L, Bt, H)  initial hidden state
                *rest):
    """rest = [wihT_0, whhT_0, b_gi_0, b_hn_0, ...,
               out_ref (Tc,Bt,H), hfin_ref (L,Bt,H),
               h_carry (L,Bt,H) scratch, gi_ref (Tc*Bt,3H) scratch]"""
    n_w = 4 * num_layers
    w_refs = rest[:n_w]
    out_ref = rest[n_w]
    hfin_ref = rest[n_w + 1]
    h_carry = rest[n_w + 2]
    gi_ref = rest[n_w + 3]

    H = hidden_size
    Tc = t_chunk
    Bt = x_ref.shape[1]

    b_idx = pl.program_id(0)
    t_idx = pl.program_id(1)
    chunk_start = t_idx * Tc

    # New batch tile: seed the hidden-state carry from h0.
    @pl.when(t_idx == 0)
    def _init():
        h_carry[...] = h0_ref[...]

    lens = len_ref[...]                              # (Bt, 1) int32

    # Skip chunks that lie entirely past every sequence in this batch tile.
    active = chunk_start < tile_max_ref[b_idx]

    @pl.when(active)
    def _compute():
        for l in range(num_layers):
            wih_t = w_refs[4 * l][...]               # (in_l, 3H) matmul dtype
            whh_t = w_refs[4 * l + 1][...]           # (H,    3H) matmul dtype
            b_gi = w_refs[4 * l + 2][...]            # (1, 3H) f32 (bih + bhh_{r,z})
            b_hn = w_refs[4 * l + 3][...]            # (1, H)  f32 (bhh_n)

            # ---- hoisted input projection: one big MXU matmul per layer/chunk
            if l == 0:
                x_all = x_ref[...].reshape(Tc * Bt, x_ref.shape[2])
            else:
                x_all = out_ref[...].reshape(Tc * Bt, H)   # previous layer's out
            gi_ref[...] = jnp.dot(x_all.astype(wih_t.dtype), wih_t,
                                  preferred_element_type=jnp.float32) + b_gi

            # Hoist the (1,H) -> (Bt,H) broadcast out of the time loop.
            b_hn_full = jnp.broadcast_to(b_hn, (Bt, H))

            def step(t, h):
                start = t * Bt
                if not isinstance(t, int):
                    start = pl.multiple_of(start, Bt)
                gi = gi_ref[pl.ds(start, Bt), :]             # (Bt, 3H)
                gh = jnp.dot(h.astype(whh_t.dtype), whh_t,
                             preferred_element_type=jnp.float32)  # (Bt, 3H)
                # NOTE: gate slices are zero-cost views when H % 128 == 0.
                r = jax.nn.sigmoid(gi[:, 0:H] + gh[:, 0:H])
                z = jax.nn.sigmoid(gi[:, H:2 * H] + gh[:, H:2 * H])
                n = jnp.tanh(gi[:, 2 * H:] + r * (gh[:, 2 * H:] + b_hn_full))
                h_new = (1.0 - z) * n + z * h
                # Packed-sequence semantics: freeze h past each sequence end.
                m = (lens > (chunk_start + t)).astype(jnp.float32)   # (Bt, 1)
                h_next = m * h_new + (1.0 - m) * h
                if l == num_layers - 1:
                    # pad_packed_sequence zero-pads invalid positions.
                    out_ref[t] = (h_next * m).astype(out_ref.dtype)
                else:
                    out_ref[t] = h_next.astype(out_ref.dtype)
                return h_next

            h_l = h_carry[l]
            if Tc <= 8:
                for t in range(Tc):          # full unroll for short chunks
                    h_l = step(t, h_l)
            else:
                h_l = lax.fori_loop(0, Tc, step, h_l, unroll=4)
            h_carry[l] = h_l

    @pl.when(jnp.logical_not(active))
    def _skip():
        out_ref[...] = jnp.zeros_like(out_ref)

    @pl.when(t_idx == pl.num_programs(1) - 1)
    def _finalize():
        hfin_ref[...] = h_carry[...]


def _prep_layer_params(layer_params, matmul_dtype):
    """(wih_T (in,3H), whh_T (H,3H), bih (1,3H), bhh (1,3H)) -> kernel layout.
    Fuses bih+bhh for r,z into the input-projection bias; keeps bhh_n separate
    (it sits inside the r*(...) term)."""
    prepped = []
    for (wih_t, whh_t, bih, bhh) in layer_params:
        H = whh_t.shape[0]
        b_gi = jnp.concatenate(
            [bih[:, :2 * H] + bhh[:, :2 * H], bih[:, 2 * H:]], axis=1
        ).astype(jnp.float32)
        b_hn = bhh[:, 2 * H:].astype(jnp.float32)
        prepped.append((wih_t.astype(matmul_dtype), whh_t.astype(matmul_dtype),
                        b_gi, b_hn))
    return prepped


def gru_pallas(x_tbe, lengths, h0, layer_params, *,
               matmul_dtype=jnp.bfloat16, b_tile=128, t_chunk=None):
    """x_tbe: (T,B,E) f32; lengths: (B,) int; h0: (L,B,H) f32.
    Returns (out (T,B,H) f32, zero-padded past each length; h_final (L,B,H))."""
    T, B, E = x_tbe.shape
    L, _, H = h0.shape

    # Batch tiling: pad B to a multiple of the tile (>= 8 for sublane alignment).
    b_tile = min(b_tile, _round_up(B, 8))
    B_pad = _round_up(B, b_tile)
    # Time chunking bounds VMEM independently of T (needed for v7x's 64 MiB).
    if t_chunk is None:
        t_chunk = min(16, _round_up(T, 8))
    T_pad = _round_up(T, t_chunk)

    x_p = jnp.zeros((T_pad, B_pad, E), x_tbe.dtype).at[:T, :B].set(x_tbe)
    len_p = jnp.zeros((B_pad,), jnp.int32).at[:B].set(lengths.astype(jnp.int32))
    h0_p = jnp.zeros((L, B_pad, H), jnp.float32).at[:, :B].set(h0)

    num_b = B_pad // b_tile
    num_t = T_pad // t_chunk

    # Per-batch-tile max length (scalar-prefetched): lets the kernel skip
    # whole dead time chunks.
    tile_max = jnp.max(len_p.reshape(num_b, b_tile), axis=1).astype(jnp.int32)
    lens_2d = len_p[:, None]                           # (B_pad, 1)

    prepped = _prep_layer_params(layer_params, matmul_dtype)
    flat_w = [w for p in prepped for w in p]
    w_specs = [pl.BlockSpec(w.shape, lambda b, t, tm: (0, 0)) for w in flat_w]

    grid_spec = pltpu.PrefetchScalarGridSpec(
        num_scalar_prefetch=1,
        grid=(num_b, num_t),
        in_specs=[
            pl.BlockSpec((t_chunk, b_tile, E), lambda b, t, tm: (t, b, 0)),
            pl.BlockSpec((b_tile, 1), lambda b, t, tm: (b, 0)),
            pl.BlockSpec((L, b_tile, H), lambda b, t, tm: (0, b, 0)),
            *w_specs,
        ],
        out_specs=(
            pl.BlockSpec((t_chunk, b_tile, H), lambda b, t, tm: (t, b, 0)),
            pl.BlockSpec((L, b_tile, H), lambda b, t, tm: (0, b, 0)),
        ),
        scratch_shapes=[
            pltpu.VMEM((L, b_tile, H), jnp.float32),              # hidden carry
            pltpu.VMEM((t_chunk * b_tile, 3 * H), jnp.float32),   # precomputed gi
        ],
    )

    kernel = functools.partial(_gru_kernel, L, H, t_chunk)
    out_p, hfin_p = pl.pallas_call(
        kernel,
        out_shape=(jax.ShapeDtypeStruct((T_pad, B_pad, H), jnp.float32),
                   jax.ShapeDtypeStruct((L, B_pad, H), jnp.float32)),
        grid_spec=grid_spec,
        compiler_params=pltpu.CompilerParams(
            dimension_semantics=("parallel", "arbitrary")),
    )(tile_max, x_p, lens_2d, h0_p, *flat_w)

    return out_p[:T, :B], hfin_p[:, :B]


def gru4rec_forward(item_ids, lengths, h0, emb_table, layer_params, *,
                    matmul_dtype=jnp.bfloat16, b_tile=128, t_chunk=None):
    """Mirrors GRU4REC.forward: returns (logit (B,T,H), hidden[-1] (B,H), max_len)."""
    # Glue outside the kernel: embedding gather + batch_first -> time-major.
    emb = emb_table[item_ids]                        # (B, T, E)
    x_tbe = jnp.transpose(emb, (1, 0, 2))            # (T, B, E)
    out_tbh, h_fin = gru_pallas(x_tbe, lengths, h0, layer_params,
                                matmul_dtype=matmul_dtype,
                                b_tile=b_tile, t_chunk=t_chunk)
    logit = jnp.transpose(out_tbh, (1, 0, 2))        # (B, T, H)
    # TODO(synk): h2o / final_activation are defined on the module but not used
    # by forward()'s returned values, so they are not applied here.
    return logit, h_fin[-1], jnp.max(lengths)


def gru_reference(item_ids, lengths, h0, emb_table, layer_params):
    """Pure-JAX f32 reference implementing PyTorch GRU + packed-seq semantics."""
    emb = emb_table[item_ids]                        # (B, T, E)
    B, T, _ = emb.shape
    L, _, H = h0.shape
    mask = (jnp.arange(T)[None, :] < lengths[:, None]).astype(jnp.float32)

    layer_in = emb
    h_last = []
    for l in range(L):
        wih_t, whh_t, bih, bhh = layer_params[l]
        h = h0[l]
        outs = []
        for t in range(T):
            x_t = layer_in[:, t, :]
            gi = x_t @ wih_t + bih
            gh = h @ whh_t + bhh
            r = jax.nn.sigmoid(gi[:, :H] + gh[:, :H])
            z = jax.nn.sigmoid(gi[:, H:2 * H] + gh[:, H:2 * H])
            n = jnp.tanh(gi[:, 2 * H:] + r * gh[:, 2 * H:])
            h_new = (1.0 - z) * n + z * h
            m = mask[:, t:t + 1]
            h = m * h_new + (1.0 - m) * h
            outs.append(h)
        layer_in = jnp.stack(outs, axis=1)
        h_last.append(h)
    out = layer_in * mask[:, :, None]
    return out, h_last[-1]


if __name__ == "__main__":
    # Small, deterministic configuration (mirrors args of GRU4REC.__init__).
    item_size = 50       # args.item_size
    embedding_dim = 32   # args.embedding_dim
    hidden_size = 32     # args.gru_hidden_size
    num_layers = 2       # args.num_layers
    batch_size = 4       # args.batch_size
    seq_len = 8

    key = jax.random.PRNGKey(0)
    k_emb, k_ids, *k_w = jax.random.split(key, 2 + 4 * num_layers)

    # Deterministic "pretrained" embedding table (stand-in for sasrec_emb_path).
    emb_table = 0.1 * jax.random.normal(k_emb, (item_size, embedding_dim),
                                        dtype=jnp.float32)

    # GRU parameters, PyTorch layout: weight_ih (3H, in), weight_hh (3H, H),
    # biases (3H,), gate order [r, z, n]; stored pre-transposed for x @ W^T.
    bound = 1.0 / math.sqrt(hidden_size)
    layer_params = []
    for l in range(num_layers):
        in_l = embedding_dim if l == 0 else hidden_size
        kw0, kw1, kb0, kb1 = k_w[4 * l: 4 * l + 4]
        wih = jax.random.uniform(kw0, (3 * hidden_size, in_l), jnp.float32,
                                 -bound, bound)
        whh = jax.random.uniform(kw1, (3 * hidden_size, hidden_size), jnp.float32,
                                 -bound, bound)
        bih = jax.random.uniform(kb0, (3 * hidden_size,), jnp.float32, -bound, bound)
        bhh = jax.random.uniform(kb1, (3 * hidden_size,), jnp.float32, -bound, bound)
        layer_params.append((wih.T, whh.T, bih[None, :], bhh[None, :]))

    # Session-parallel mini-batch: (B, T) item indices + per-row lengths.
    item_ids = jax.random.randint(k_ids, (batch_size, seq_len), 1, item_size)
    lengths = jnp.array([8, 5, 3, 1], dtype=jnp.int32)
    h0 = jnp.zeros((num_layers, batch_size, hidden_size), jnp.float32)  # init_hidden

    # Pure-JAX reference of the PyTorch semantics.
    ref_out, ref_h = gru_reference(item_ids, lengths, h0, emb_table, layer_params)

    # 1) f32 matmul path: strict numeric check of the kernel structure.
    logit32, h32, max_len = gru4rec_forward(item_ids, lengths, h0, emb_table,
                                            layer_params,
                                            matmul_dtype=jnp.float32)
    jax.block_until_ready((logit32, h32, max_len))
    assert logit32.shape == (batch_size, seq_len, hidden_size)
    assert h32.shape == (batch_size, hidden_size)
    assert jnp.allclose(logit32, ref_out, atol=1e-4, rtol=1e-4)
    assert jnp.allclose(h32, ref_h, atol=1e-4, rtol=1e-4)
    assert int(max_len) == int(jnp.max(lengths))

    # 2) Default path: bf16 matmul operands (MXU-native on v6e/v7x), f32
    #    accumulation and f32 hidden-state carry -> loose tolerance.
    logit_bf, h_bf, _ = gru4rec_forward(item_ids, lengths, h0, emb_table,
                                        layer_params)
    jax.block_until_ready((logit_bf, h_bf))
    assert jnp.allclose(logit_bf, ref_out, atol=2e-2, rtol=2e-2)
    assert jnp.allclose(h_bf, ref_h, atol=2e-2, rtol=2e-2)

    print("KERNEL_OK")
</pallas_src>

<mosaic_0001>
module attributes {stable_mosaic.version = 11 : i64} {
  func.func @_gru_kernel(%arg0: i32, %arg1: i32, %arg2: memref<1xi32, #tpu.memory_space<smem>>, %arg3: memref<8x8x32xf32, #tpu.memory_space<vmem>>, %arg4: memref<8x1xi32, #tpu.memory_space<vmem>>, %arg5: memref<2x8x32xf32, #tpu.memory_space<vmem>>, %arg6: memref<32x96xf32, #tpu.memory_space<vmem>>, %arg7: memref<32x96xf32, #tpu.memory_space<vmem>>, %arg8: memref<1x96xf32, #tpu.memory_space<vmem>>, %arg9: memref<1x32xf32, #tpu.memory_space<vmem>>, %arg10: memref<32x96xf32, #tpu.memory_space<vmem>>, %arg11: memref<32x96xf32, #tpu.memory_space<vmem>>, %arg12: memref<1x96xf32, #tpu.memory_space<vmem>>, %arg13: memref<1x32xf32, #tpu.memory_space<vmem>>, %arg14: memref<8x8x32xf32, #tpu.memory_space<vmem>>, %arg15: memref<2x8x32xf32, #tpu.memory_space<vmem>>, %arg16: memref<2x8x32xf32, #tpu.memory_space<vmem>>, %arg17: memref<64x96xf32, #tpu.memory_space<vmem>>) attributes {dimension_semantics = [#tpu.dimension_semantics<parallel>, #tpu.dimension_semantics<arbitrary>], iteration_bounds = array<i64: 1, 1>, scalar_prefetch = 1 : i64, scratch_operands = 2 : i64, tpu.core_type = #tpu.core_type<tc>, window_params = [{transform_indices = @transform_0, window_bounds = array<i64: 8, 8, 32>}, {transform_indices = @transform_1, window_bounds = array<i64: 8, 1>}, {transform_indices = @transform_2, window_bounds = array<i64: 2, 8, 32>}, {pipeline_mode = #tpu.pipeline_mode<synchronous>, transform_indices = @transform_3, window_bounds = array<i64: 32, 96>}, {pipeline_mode = #tpu.pipeline_mode<synchronous>, transform_indices = @transform_4, window_bounds = array<i64: 32, 96>}, {pipeline_mode = #tpu.pipeline_mode<synchronous>, transform_indices = @transform_5, window_bounds = array<i64: 1, 96>}, {pipeline_mode = #tpu.pipeline_mode<synchronous>, transform_indices = @transform_6, window_bounds = array<i64: 1, 32>}, {pipeline_mode = #tpu.pipeline_mode<synchronous>, transform_indices = @transform_7, window_bounds = array<i64: 32, 96>}, {pipeline_mode = #tpu.pipeline_mode<synchronous>, transform_indices = @transform_8, window_bounds = array<i64: 32, 96>}, {pipeline_mode = #tpu.pipeline_mode<synchronous>, transform_indices = @transform_9, window_bounds = array<i64: 1, 96>}, {pipeline_mode = #tpu.pipeline_mode<synchronous>, transform_indices = @transform_10, window_bounds = array<i64: 1, 32>}, {transform_indices = @transform_11, window_bounds = array<i64: 8, 8, 32>}, {transform_indices = @transform_12, window_bounds = array<i64: 2, 8, 32>}]} {
    %c8_i32 = arith.constant 8 : i32
    %0 = arith.muli %arg1, %c8_i32 : i32
    %c0_i32 = arith.constant 0 : i32
    %1 = arith.cmpi eq, %arg1, %c0_i32 : i32
    %2 = arith.extui %1 : i1 to i32
    %c0_i32_0 = arith.constant 0 : i32
    %3 = arith.cmpi ne, %2, %c0_i32_0 : i32
    scf.if %3 {
      %c0_6 = arith.constant 0 : index
      %c0_7 = arith.constant 0 : index
      %c0_8 = arith.constant 0 : index
      %16 = vector.load %arg5[%c0_6, %c0_7, %c0_8] : memref<2x8x32xf32, #tpu.memory_space<vmem>>, vector<2x8x32xf32>
      %c0_9 = arith.constant 0 : index
      %c0_10 = arith.constant 0 : index
      %c0_11 = arith.constant 0 : index
      %17 = vector.load %arg16[%c0_9, %c0_10, %c0_11] : memref<2x8x32xf32, #tpu.memory_space<vmem>>, vector<2x8x32xf32>
      tpu.vector_store %arg16[%c0_9, %c0_10, %c0_11], %16 {strides = array<i32>} : memref<2x8x32xf32, #tpu.memory_space<vmem>>, vector<2x8x32xf32>,
    } else {
    }
    %c0 = arith.constant 0 : index
    %c0_1 = arith.constant 0 : index
    %4 = vector.load %arg4[%c0, %c0_1] : memref<8x1xi32, #tpu.memory_space<vmem>>, vector<8x1xi32>
    %5 = arith.index_cast %arg0 : i32 to index
    %6 = memref.load %arg2[%5] : memref<1xi32, #tpu.memory_space<smem>>
    %7 = arith.cmpi slt, %0, %6 : i32
    %8 = arith.extui %7 : i1 to i32
    %c0_i32_2 = arith.constant 0 : i32
    %9 = arith.cmpi ne, %8, %c0_i32_2 : i32
    scf.if %9 {
      %c0_6 = arith.constant 0 : index
      %c0_7 = arith.constant 0 : index
      %16 = vector.load %arg6[%c0_6, %c0_7] : memref<32x96xf32, #tpu.memory_space<vmem>>, vector<32x96xf32>
      %c0_8 = arith.constant 0 : index
      %c0_9 = arith.constant 0 : index
      %17 = vector.load %arg7[%c0_8, %c0_9] : memref<32x96xf32, #tpu.memory_space<vmem>>, vector<32x96xf32>
      %c0_10 = arith.constant 0 : index
      %c0_11 = arith.constant 0 : index
      %18 = vector.load %arg8[%c0_10, %c0_11] : memref<1x96xf32, #tpu.memory_space<vmem>>, vector<1x96xf32>
      %c0_12 = arith.constant 0 : index
      %c0_13 = arith.constant 0 : index
      %19 = vector.load %arg9[%c0_12, %c0_13] : memref<1x32xf32, #tpu.memory_space<vmem>>, vector<1x32xf32>
      %c0_14 = arith.constant 0 : index
      %c0_15 = arith.constant 0 : index
      %c0_16 = arith.constant 0 : index
      %20 = vector.load %arg3[%c0_14, %c0_15, %c0_16] : memref<8x8x32xf32, #tpu.memory_space<vmem>>, vector<8x8x32xf32>
      %21 = vector.shape_cast %20 : vector<8x8x32xf32> to vector<64x32xf32>
      %cst = arith.constant dense<0.000000e+00> : vector<64x96xf32>
      %22 = tpu.matmul %21, %16, %cst {dimension_numbers = #tpu.dot_dimension_numbers<[1], [0], [0], [1], [0, 0, 1, 1], [], []>} : vector<64x32xf32>, vector<32x96xf32>, vector<64x96xf32> -> vector<64x96xf32>
      %23 = vector.broadcast %18 : vector<1x96xf32> to vector<64x96xf32>
      %24 = arith.addf %22, %23 : vector<64x96xf32>
      %c0_17 = arith.constant 0 : index
      %c0_18 = arith.constant 0 : index
      %25 = vector.load %arg17[%c0_17, %c0_18] : memref<64x96xf32, #tpu.memory_space<vmem>>, vector<64x96xf32>
      tpu.vector_store %arg17[%c0_17, %c0_18], %24 {strides = array<i32>} : memref<64x96xf32, #tpu.memory_space<vmem>>, vector<64x96xf32>,
      %26 = vector.shape_cast %19 : vector<1x32xf32> to vector<1x32xf32>
      %27 = vector.broadcast %26 : vector<1x32xf32> to vector<8x32xf32>
      %c0_19 = arith.constant 0 : index
      %c0_20 = arith.constant 0 : index
      %c0_21 = arith.constant 0 : index
      %28 = vector.load %arg16[%c0_19, %c0_20, %c0_21] : memref<2x8x32xf32, #tpu.memory_space<vmem>>, vector<1x8x32xf32>
      %29 = vector.shape_cast %28 : vector<1x8x32xf32> to vector<8x32xf32>
      %c0_22 = arith.constant 0 : index
      %c0_23 = arith.constant 0 : index
      %30 = vector.load %arg17[%c0_22, %c0_23] : memref<64x96xf32, #tpu.memory_space<vmem>>, vector<8x96xf32>
      %cst_24 = arith.constant dense<0.000000e+00> : vector<8x96xf32>
      %31 = tpu.matmul %29, %17, %cst_24 {dimension_numbers = #tpu.dot_dimension_numbers<[1], [0], [0], [1], [0, 0, 1, 1], [], []>} : vector<8x32xf32>, vector<32x96xf32>, vector<8x96xf32> -> vector<8x96xf32>
      %32 = vector.extract_strided_slice %30 {offsets = [0, 0], sizes = [8, 32], strides = [1, 1]} : vector<8x96xf32> to vector<8x32xf32>
      %33 = vector.extract_strided_slice %31 {offsets = [0, 0], sizes = [8, 32], strides = [1, 1]} : vector<8x96xf32> to vector<8x32xf32>
      %34 = arith.addf %32, %33 : vector<8x32xf32>
      %35 = arith.negf %34 : vector<8x32xf32>
      %36 = math.exp %35 : vector<8x32xf32>
      %cst_25 = arith.constant 1.000000e+00 : f32
      %37 = vector.broadcast %cst_25 : f32 to vector<8x32xf32>
      %38 = arith.addf %37, %36 : vector<8x32xf32>
      %39 = arith.divf %37, %38 : vector<8x32xf32>
      %40 = vector.extract_strided_slice %30 {offsets = [0, 32], sizes = [8, 32], strides = [1, 1]} : vector<8x96xf32> to vector<8x32xf32>
      %41 = vector.extract_strided_slice %31 {offsets = [0, 32], sizes = [8, 32], strides = [1, 1]} : vector<8x96xf32> to vector<8x32xf32>
      %42 = arith.addf %40, %41 : vector<8x32xf32>
      %43 = arith.negf %42 : vector<8x32xf32>
      %44 = math.exp %43 : vector<8x32xf32>
      %cst_26 = arith.constant 1.000000e+00 : f32
      %45 = vector.broadcast %cst_26 : f32 to vector<8x32xf32>
      %46 = arith.addf %45, %44 : vector<8x32xf32>
      %47 = arith.divf %45, %46 : vector<8x32xf32>
      %48 = vector.extract_strided_slice %30 {offsets = [0, 64], sizes = [8, 32], strides = [1, 1]} : vector<8x96xf32> to vector<8x32xf32>
      %49 = vector.extract_strided_slice %31 {offsets = [0, 64], sizes = [8, 32], strides = [1, 1]} : vector<8x96xf32> to vector<8x32xf32>
      %50 = arith.addf %49, %27 : vector<8x32xf32>
      %51 = arith.mulf %39, %50 : vector<8x32xf32>
      %52 = arith.addf %48, %51 : vector<8x32xf32>
      %53 = math.tanh %52 : vector<8x32xf32>
      %cst_27 = arith.constant 1.000000e+00 : f32
      %54 = vector.broadcast %cst_27 : f32 to vector<8x32xf32>
      %55 = arith.subf %54, %47 : vector<8x32xf32>
      %56 = arith.mulf %55, %53 : vector<8x32xf32>
      %57 = arith.mulf %47, %29 : vector<8x32xf32>
      %58 = arith.addf %56, %57 : vector<8x32xf32>
      %c0_i32_28 = arith.constant 0 : i32
      %59 = arith.addi %0, %c0_i32_28 : i32
      %60 = vector.broadcast %59 : i32 to vector<8x1xi32>
      %61 = arith.cmpi sgt, %4, %60 : vector<8x1xi32>
      %62 = arith.extui %61 : vector<8x1xi1> to vector<8x1xi32>
      %63 = arith.sitofp %62 : vector<8x1xi32> to vector<8x1xf32>
      %64 = vector.broadcast %63 : vector<8x1xf32> to vector<8x32xf32>
      %65 = arith.mulf %64, %58 : vector<8x32xf32>
      %cst_29 = arith.constant 1.000000e+00 : f32
      %66 = vector.broadcast %cst_29 : f32 to vector<8x1xf32>
      %67 = arith.subf %66, %63 : vector<8x1xf32>
      %68 = vector.broadcast %67 : vector<8x1xf32> to vector<8x32xf32>
      %69 = arith.mulf %68, %29 : vector<8x32xf32>
      %70 = arith.addf %65, %69 : vector<8x32xf32>
      %c0_30 = arith.constant 0 : index
      %c0_31 = arith.constant 0 : index
      %c0_32 = arith.constant 0 : index
      %71 = vector.load %arg14[%c0_30, %c0_31, %c0_32] : memref<8x8x32xf32, #tpu.memory_space<vmem>>, vector<1x8x32xf32>
      %72 = vector.shape_cast %71 : vector<1x8x32xf32> to vector<8x32xf32>
      %73 = vector.shape_cast %70 : vector<8x32xf32> to vector<1x8x32xf32>
      tpu.vector_store %arg14[%c0_30, %c0_31, %c0_32], %73 {strides = array<i32>} : memref<8x8x32xf32, #tpu.memory_space<vmem>>, vector<1x8x32xf32>,
      %c8 = arith.constant 8 : index
      %c0_33 = arith.constant 0 : index
      %74 = vector.load %arg17[%c8, %c0_33] : memref<64x96xf32, #tpu.memory_space<vmem>>, vector<8x96xf32>
      %cst_34 = arith.constant dense<0.000000e+00> : vector<8x96xf32>
      %75 = tpu.matmul %70, %17, %cst_34 {dimension_numbers = #tpu.dot_dimension_numbers<[1], [0], [0], [1], [0, 0, 1, 1], [], []>} : vector<8x32xf32>, vector<32x96xf32>, vector<8x96xf32> -> vector<8x96xf32>
      %76 = vector.extract_strided_slice %74 {offsets = [0, 0], sizes = [8, 32], strides = [1, 1]} : vector<8x96xf32> to vector<8x32xf32>
      %77 = vector.extract_strided_slice %75 {offsets = [0, 0], sizes = [8, 32], strides = [1, 1]} : vector<8x96xf32> to vector<8x32xf32>
      %78 = arith.addf %76, %77 : vector<8x32xf32>
      %79 = arith.negf %78 : vector<8x32xf32>
      %80 = math.exp %79 : vector<8x32xf32>
      %cst_35 = arith.constant 1.000000e+00 : f32
      %81 = vector.broadcast %cst_35 : f32 to vector<8x32xf32>
      %82 = arith.addf %81, %80 : vector<8x32xf32>
      %83 = arith.divf %81, %82 : vector<8x32xf32>
      %84 = vector.extract_strided_slice %74 {offsets = [0, 32], sizes = [8, 32], strides = [1, 1]} : vector<8x96xf32> to vector<8x32xf32>
      %85 = vector.extract_strided_slice %75 {offsets = [0, 32], sizes = [8, 32], strides = [1, 1]} : vector<8x96xf32> to vector<8x32xf32>
      %86 = arith.addf %84, %85 : vector<8x32xf32>
      %87 = arith.negf %86 : vector<8x32xf32>
      %88 = math.exp %87 : vector<8x32xf32>
      %cst_36 = arith.constant 1.000000e+00 : f32
      %89 = vector.broadcast %cst_36 : f32 to vector<8x32xf32>
      %90 = arith.addf %89, %88 : vector<8x32xf32>
      %91 = arith.divf %89, %90 : vector<8x32xf32>
      %92 = vector.extract_strided_slice %74 {offsets = [0, 64], sizes = [8, 32], strides = [1, 1]} : vector<8x96xf32> to vector<8x32xf32>
      %93 = vector.extract_strided_slice %75 {offsets = [0, 64], sizes = [8, 32], strides = [1, 1]} : vector<8x96xf32> to vector<8x32xf32>
      %94 = arith.addf %93, %27 : vector<8x32xf32>
      %95 = arith.mulf %83, %94 : vector<8x32xf32>
      %96 = arith.addf %92, %95 : vector<8x32xf32>
      %97 = math.tanh %96 : vector<8x32xf32>
      %cst_37 = arith.constant 1.000000e+00 : f32
      %98 = vector.broadcast %cst_37 : f32 to vector<8x32xf32>
      %99 = arith.subf %98, %91 : vector<8x32xf32>
      %100 = arith.mulf %99, %97 : vector<8x32xf32>
      %101 = arith.mulf %91, %70 : vector<8x32xf32>
      %102 = arith.addf %100, %101 : vector<8x32xf32>
      %c1_i32 = arith.constant 1 : i32
      %103 = arith.addi %0, %c1_i32 : i32
      %104 = vector.broadcast %103 : i32 to vector<8x1xi32>
      %105 = arith.cmpi sgt, %4, %104 : vector<8x1xi32>
      %106 = arith.extui %105 : vector<8x1xi1> to vector<8x1xi32>
      %107 = arith.sitofp %106 : vector<8x1xi32> to vector<8x1xf32>
      %108 = vector.broadcast %107 : vector<8x1xf32> to vector<8x32xf32>
      %109 = arith.mulf %108, %102 : vector<8x32xf32>
      %cst_38 = arith.constant 1.000000e+00 : f32
      %110 = vector.broadcast %cst_38 : f32 to vector<8x1xf32>
      %111 = arith.subf %110, %107 : vector<8x1xf32>
      %112 = vector.broadcast %111 : vector<8x1xf32> to vector<8x32xf32>
      %113 = arith.mulf %112, %70 : vector<8x32xf32>
      %114 = arith.addf %109, %113 : vector<8x32xf32>
      %c1 = arith.constant 1 : index
      %c0_39 = arith.constant 0 : index
      %c0_40 = arith.constant 0 : index
      %115 = vector.load %arg14[%c1, %c0_39, %c0_40] : memref<8x8x32xf32, #tpu.memory_space<vmem>>, vector<1x8x32xf32>
      %116 = vector.shape_cast %115 : vector<1x8x32xf32> to vector<8x32xf32>
      %117 = vector.shape_cast %114 : vector<8x32xf32> to vector<1x8x32xf32>
      tpu.vector_store %arg14[%c1, %c0_39, %c0_40], %117 {strides = array<i32>} : memref<8x8x32xf32, #tpu.memory_space<vmem>>, vector<1x8x32xf32>,
      %c16 = arith.constant 16 : index
      %c0_41 = arith.constant 0 : index
      %118 = vector.load %arg17[%c16, %c0_41] : memref<64x96xf32, #tpu.memory_space<vmem>>, vector<8x96xf32>
      %cst_42 = arith.constant dense<0.000000e+00> : vector<8x96xf32>
      %119 = tpu.matmul %114, %17, %cst_42 {dimension_numbers = #tpu.dot_dimension_numbers<[1], [0], [0], [1], [0, 0, 1, 1], [], []>} : vector<8x32xf32>, vector<32x96xf32>, vector<8x96xf32> -> vector<8x96xf32>
      %120 = vector.extract_strided_slice %118 {offsets = [0, 0], sizes = [8, 32], strides = [1, 1]} : vector<8x96xf32> to vector<8x32xf32>
      %121 = vector.extract_strided_slice %119 {offsets = [0, 0], sizes = [8, 32], strides = [1, 1]} : vector<8x96xf32> to vector<8x32xf32>
      %122 = arith.addf %120, %121 : vector<8x32xf32>
      %123 = arith.negf %122 : vector<8x32xf32>
      %124 = math.exp %123 : vector<8x32xf32>
      %cst_43 = arith.constant 1.000000e+00 : f32
      %125 = vector.broadcast %cst_43 : f32 to vector<8x32xf32>
      %126 = arith.addf %125, %124 : vector<8x32xf32>
      %127 = arith.divf %125, %126 : vector<8x32xf32>
      %128 = vector.extract_strided_slice %118 {offsets = [0, 32], sizes = [8, 32], strides = [1, 1]} : vector<8x96xf32> to vector<8x32xf32>
      %129 = vector.extract_strided_slice %119 {offsets = [0, 32], sizes = [8, 32], strides = [1, 1]} : vector<8x96xf32> to vector<8x32xf32>
      %130 = arith.addf %128, %129 : vector<8x32xf32>
      %131 = arith.negf %130 : vector<8x32xf32>
      %132 = math.exp %131 : vector<8x32xf32>
      %cst_44 = arith.constant 1.000000e+00 : f32
      %133 = vector.broadcast %cst_44 : f32 to vector<8x32xf32>
      %134 = arith.addf %133, %132 : vector<8x32xf32>
      %135 = arith.divf %133, %134 : vector<8x32xf32>
      %136 = vector.extract_strided_slice %118 {offsets = [0, 64], sizes = [8, 32], strides = [1, 1]} : vector<8x96xf32> to vector<8x32xf32>
      %137 = vector.extract_strided_slice %119 {offsets = [0, 64], sizes = [8, 32], strides = [1, 1]} : vector<8x96xf32> to vector<8x32xf32>
      %138 = arith.addf %137, %27 : vector<8x32xf32>
      %139 = arith.mulf %127, %138 : vector<8x32xf32>
      %140 = arith.addf %136, %139 : vector<8x32xf32>
      %141 = math.tanh %140 : vector<8x32xf32>
      %cst_45 = arith.constant 1.000000e+00 : f32
      %142 = vector.broadcast %cst_45 : f32 to vector<8x32xf32>
      %143 = arith.subf %142, %135 : vector<8x32xf32>
      %144 = arith.mulf %143, %141 : vector<8x32xf32>
      %145 = arith.mulf %135, %114 : vector<8x32xf32>
      %146 = arith.addf %144, %145 : vector<8x32xf32>
      %c2_i32 = arith.constant 2 : i32
      %147 = arith.addi %0, %c2_i32 : i32
      %148 = vector.broadcast %147 : i32 to vector<8x1xi32>
      %149 = arith.cmpi sgt, %4, %148 : vector<8x1xi32>
      %150 = arith.extui %149 : vector<8x1xi1> to vector<8x1xi32>
      %151 = arith.sitofp %150 : vector<8x1xi32> to vector<8x1xf32>
      %152 = vector.broadcast %151 : vector<8x1xf32> to vector<8x32xf32>
      %153 = arith.mulf %152, %146 : vector<8x32xf32>
      %cst_46 = arith.constant 1.000000e+00 : f32
      %154 = vector.broadcast %cst_46 : f32 to vector<8x1xf32>
      %155 = arith.subf %154, %151 : vector<8x1xf32>
      %156 = vector.broadcast %155 : vector<8x1xf32> to vector<8x32xf32>
      %157 = arith.mulf %156, %114 : vector<8x32xf32>
      %158 = arith.addf %153, %157 : vector<8x32xf32>
      %c2 = arith.constant 2 : index
      %c0_47 = arith.constant 0 : index
      %c0_48 = arith.constant 0 : index
      %159 = vector.load %arg14[%c2, %c0_47, %c0_48] : memref<8x8x32xf32, #tpu.memory_space<vmem>>, vector<1x8x32xf32>
      %160 = vector.shape_cast %159 : vector<1x8x32xf32> to vector<8x32xf32>
      %161 = vector.shape_cast %158 : vector<8x32xf32> to vector<1x8x32xf32>
      tpu.vector_store %arg14[%c2, %c0_47, %c0_48], %161 {strides = array<i32>} : memref<8x8x32xf32, #tpu.memory_space<vmem>>, vector<1x8x32xf32>,
      %c24 = arith.constant 24 : index
      %c0_49 = arith.constant 0 : index
      %162 = vector.load %arg17[%c24, %c0_49] : memref<64x96xf32, #tpu.memory_space<vmem>>, vector<8x96xf32>
      %cst_50 = arith.constant dense<0.000000e+00> : vector<8x96xf32>
      %163 = tpu.matmul %158, %17, %cst_50 {dimension_numbers = #tpu.dot_dimension_numbers<[1], [0], [0], [1], [0, 0, 1, 1], [], []>} : vector<8x32xf32>, vector<32x96xf32>, vector<8x96xf32> -> vector<8x96xf32>
      %164 = vector.extract_strided_slice %162 {offsets = [0, 0], sizes = [8, 32], strides = [1, 1]} : vector<8x96xf32> to vector<8x32xf32>
      %165 = vector.extract_strided_slice %163 {offsets = [0, 0], sizes = [8, 32], strides = [1, 1]} : vector<8x96xf32> to vector<8x32xf32>
      %166 = arith.addf %164, %165 : vector<8x32xf32>
      %167 = arith.negf %166 : vector<8x32xf32>
      %168 = math.exp %167 : vector<8x32xf32>
      %cst_51 = arith.constant 1.000000e+00 : f32
      %169 = vector.broadcast %cst_51 : f32 to vector<8x32xf32>
      %170 = arith.addf %169, %168 : vector<8x32xf32>
      %171 = arith.divf %169, %170 : vector<8x32xf32>
      %172 = vector.extract_strided_slice %162 {offsets = [0, 32], sizes = [8, 32], strides = [1, 1]} : vector<8x96xf32> to vector<8x32xf32>
      %173 = vector.extract_strided_slice %163 {offsets = [0, 32], sizes = [8, 32], strides = [1, 1]} : vector<8x96xf32> to vector<8x32xf32>
      %174 = arith.addf %172, %173 : vector<8x32xf32>
      %175 = arith.negf %174 : vector<8x32xf32>
      %176 = math.exp %175 : vector<8x32xf32>
      %cst_52 = arith.constant 1.000000e+00 : f32
      %177 = vector.broadcast %cst_52 : f32 to vector<8x32xf32>
      %178 = arith.addf %177, %176 : vector<8x32xf32>
      %179 = arith.divf %177, %178 : vector<8x32xf32>
      %180 = vector.extract_strided_slice %162 {offsets = [0, 64], sizes = [8, 32], strides = [1, 1]} : vector<8x96xf32> to vector<8x32xf32>
      %181 = vector.extract_strided_slice %163 {offsets = [0, 64], sizes = [8, 32], strides = [1, 1]} : vector<8x96xf32> to vector<8x32xf32>
      %182 = arith.addf %181, %27 : vector<8x32xf32>
      %183 = arith.mulf %171, %182 : vector<8x32xf32>
      %184 = arith.addf %180, %183 : vector<8x32xf32>
      %185 = math.tanh %184 : vector<8x32xf32>
      %cst_53 = arith.constant 1.000000e+00 : f32
      %186 = vector.broadcast %cst_53 : f32 to vector<8x32xf32>
      %187 = arith.subf %186, %179 : vector<8x32xf32>
      %188 = arith.mulf %187, %185 : vector<8x32xf32>
      %189 = arith.mulf %179, %158 : vector<8x32xf32>
      %190 = arith.addf %188, %189 : vector<8x32xf32>
      %c3_i32 = arith.constant 3 : i32
      %191 = arith.addi %0, %c3_i32 : i32
      %192 = vector.broadcast %191 : i32 to vector<8x1xi32>
      %193 = arith.cmpi sgt, %4, %192 : vector<8x1xi32>
      %194 = arith.extui %193 : vector<8x1xi1> to vector<8x1xi32>
      %195 = arith.sitofp %194 : vector<8x1xi32> to vector<8x1xf32>
      %196 = vector.broadcast %195 : vector<8x1xf32> to vector<8x32xf32>
      %197 = arith.mulf %196, %190 : vector<8x32xf32>
      %cst_54 = arith.constant 1.000000e+00 : f32
      %198 = vector.broadcast %cst_54 : f32 to vector<8x1xf32>
      %199 = arith.subf %198, %195 : vector<8x1xf32>
      %200 = vector.broadcast %199 : vector<8x1xf32> to vector<8x32xf32>
      %201 = arith.mulf %200, %158 : vector<8x32xf32>
      %202 = arith.addf %197, %201 : vector<8x32xf32>
      %c3 = arith.constant 3 : index
      %c0_55 = arith.constant 0 : index
      %c0_56 = arith.constant 0 : index
      %203 = vector.load %arg14[%c3, %c0_55, %c0_56] : memref<8x8x32xf32, #tpu.memory_space<vmem>>, vector<1x8x32xf32>
      %204 = vector.shape_cast %203 : vector<1x8x32xf32> to vector<8x32xf32>
      %205 = vector.shape_cast %202 : vector<8x32xf32> to vector<1x8x32xf32>
      tpu.vector_store %arg14[%c3, %c0_55, %c0_56], %205 {strides = array<i32>} : memref<8x8x32xf32, #tpu.memory_space<vmem>>, vector<1x8x32xf32>,
      %c32 = arith.constant 32 : index
      %c0_57 = arith.constant 0 : index
      %206 = vector.load %arg17[%c32, %c0_57] : memref<64x96xf32, #tpu.memory_space<vmem>>, vector<8x96xf32>
      %cst_58 = arith.constant dense<0.000000e+00> : vector<8x96xf32>
      %207 = tpu.matmul %202, %17, %cst_58 {dimension_numbers = #tpu.dot_dimension_numbers<[1], [0], [0], [1], [0, 0, 1, 1], [], []>} : vector<8x32xf32>, vector<32x96xf32>, vector<8x96xf32> -> vector<8x96xf32>
      %208 = vector.extract_strided_slice %206 {offsets = [0, 0], sizes = [8, 32], strides = [1, 1]} : vector<8x96xf32> to vector<8x32xf32>
      %209 = vector.extract_strided_slice %207 {offsets = [0, 0], sizes = [8, 32], strides = [1, 1]} : vector<8x96xf32> to vector<8x32xf32>
      %210 = arith.addf %208, %209 : vector<8x32xf32>
      %211 = arith.negf %210 : vector<8x32xf32>
      %212 = math.exp %211 : vector<8x32xf32>
      %cst_59 = arith.constant 1.000000e+00 : f32
      %213 = vector.broadcast %cst_59 : f32 to vector<8x32xf32>
      %214 = arith.addf %213, %212 : vector<8x32xf32>
      %215 = arith.divf %213, %214 : vector<8x32xf32>
      %216 = vector.extract_strided_slice %206 {offsets = [0, 32], sizes = [8, 32], strides = [1, 1]} : vector<8x96xf32> to vector<8x32xf32>
      %217 = vector.extract_strided_slice %207 {offsets = [0, 32], sizes = [8, 32], strides = [1, 1]} : vector<8x96xf32> to vector<8x32xf32>
      %218 = arith.addf %216, %217 : vector<8x32xf32>
      %219 = arith.negf %218 : vector<8x32xf32>
      %220 = math.exp %219 : vector<8x32xf32>
      %cst_60 = arith.constant 1.000000e+00 : f32
      %221 = vector.broadcast %cst_60 : f32 to vector<8x32xf32>
      %222 = arith.addf %221, %220 : vector<8x32xf32>
      %223 = arith.divf %221, %222 : vector<8x32xf32>
      %224 = vector.extract_strided_slice %206 {offsets = [0, 64], sizes = [8, 32], strides = [1, 1]} : vector<8x96xf32> to vector<8x32xf32>
      %225 = vector.extract_strided_slice %207 {offsets = [0, 64], sizes = [8, 32], strides = [1, 1]} : vector<8x96xf32> to vector<8x32xf32>
      %226 = arith.addf %225, %27 : vector<8x32xf32>
      %227 = arith.mulf %215, %226 : vector<8x32xf32>
      %228 = arith.addf %224, %227 : vector<8x32xf32>
      %229 = math.tanh %228 : vector<8x32xf32>
      %cst_61 = arith.constant 1.000000e+00 : f32
      %230 = vector.broadcast %cst_61 : f32 to vector<8x32xf32>
      %231 = arith.subf %230, %223 : vector<8x32xf32>
      %232 = arith.mulf %231, %229 : vector<8x32xf32>
      %233 = arith.mulf %223, %202 : vector<8x32xf32>
      %234 = arith.addf %232, %233 : vector<8x32xf32>
      %c4_i32 = arith.constant 4 : i32
      %235 = arith.addi %0, %c4_i32 : i32
      %236 = vector.broadcast %235 : i32 to vector<8x1xi32>
      %237 = arith.cmpi sgt, %4, %236 : vector<8x1xi32>
      %238 = arith.extui %237 : vector<8x1xi1> to vector<8x1xi32>
      %239 = arith.sitofp %238 : vector<8x1xi32> to vector<8x1xf32>
      %240 = vector.broadcast %239 : vector<8x1xf32> to vector<8x32xf32>
      %241 = arith.mulf %240, %234 : vector<8x32xf32>
      %cst_62 = arith.constant 1.000000e+00 : f32
      %242 = vector.broadcast %cst_62 : f32 to vector<8x1xf32>
      %243 = arith.subf %242, %239 : vector<8x1xf32>
      %244 = vector.broadcast %243 : vector<8x1xf32> to vector<8x32xf32>
      %245 = arith.mulf %244, %202 : vector<8x32xf32>
      %246 = arith.addf %241, %245 : vector<8x32xf32>
      %c4 = arith.constant 4 : index
      %c0_63 = arith.constant 0 : index
      %c0_64 = arith.constant 0 : index
      %247 = vector.load %arg14[%c4, %c0_63, %c0_64] : memref<8x8x32xf32, #tpu.memory_space<vmem>>, vector<1x8x32xf32>
      %248 = vector.shape_cast %247 : vector<1x8x32xf32> to vector<8x32xf32>
      %249 = vector.shape_cast %246 : vector<8x32xf32> to vector<1x8x32xf32>
      tpu.vector_store %arg14[%c4, %c0_63, %c0_64], %249 {strides = array<i32>} : memref<8x8x32xf32, #tpu.memory_space<vmem>>, vector<1x8x32xf32>,
      %c40 = arith.constant 40 : index
      %c0_65 = arith.constant 0 : index
      %250 = vector.load %arg17[%c40, %c0_65] : memref<64x96xf32, #tpu.memory_space<vmem>>, vector<8x96xf32>
      %cst_66 = arith.constant dense<0.000000e+00> : vector<8x96xf32>
      %251 = tpu.matmul %246, %17, %cst_66 {dimension_numbers = #tpu.dot_dimension_numbers<[1], [0], [0], [1], [0, 0, 1, 1], [], []>} : vector<8x32xf32>, vector<32x96xf32>, vector<8x96xf32> -> vector<8x96xf32>
      %252 = vector.extract_strided_slice %250 {offsets = [0, 0], sizes = [8, 32], strides = [1, 1]} : vector<8x96xf32> to vector<8x32xf32>
      %253 = vector.extract_strided_slice %251 {offsets = [0, 0], sizes = [8, 32], strides = [1, 1]} : vector<8x96xf32> to vector<8x32xf32>
      %254 = arith.addf %252, %253 : vector<8x32xf32>
      %255 = arith.negf %254 : vector<8x32xf32>
      %256 = math.exp %255 : vector<8x32xf32>
      %cst_67 = arith.constant 1.000000e+00 : f32
      %257 = vector.broadcast %cst_67 : f32 to vector<8x32xf32>
      %258 = arith.addf %257, %256 : vector<8x32xf32>
      %259 = arith.divf %257, %258 : vector<8x32xf32>
      %260 = vector.extract_strided_slice %250 {offsets = [0, 32], sizes = [8, 32], strides = [1, 1]} : vector<8x96xf32> to vector<8x32xf32>
      %261 = vector.extract_strided_slice %251 {offsets = [0, 32], sizes = [8, 32], strides = [1, 1]} : vector<8x96xf32> to vector<8x32xf32>
      %262 = arith.addf %260, %261 : vector<8x32xf32>
      %263 = arith.negf %262 : vector<8x32xf32>
      %264 = math.exp %263 : vector<8x32xf32>
      %cst_68 = arith.constant 1.000000e+00 : f32
      %265 = vector.broadcast %cst_68 : f32 to vector<8x32xf32>
      %266 = arith.addf %265, %264 : vector<8x32xf32>
      %267 = arith.divf %265, %266 : vector<8x32xf32>
      %268 = vector.extract_strided_slice %250 {offsets = [0, 64], sizes = [8, 32], strides = [1, 1]} : vector<8x96xf32> to vector<8x32xf32>
      %269 = vector.extract_strided_slice %251 {offsets = [0, 64], sizes = [8, 32], strides = [1, 1]} : vector<8x96xf32> to vector<8x32xf32>
      %270 = arith.addf %269, %27 : vector<8x32xf32>
      %271 = arith.mulf %259, %270 : vector<8x32xf32>
      %272 = arith.addf %268, %271 : vector<8x32xf32>
      %273 = math.tanh %272 : vector<8x32xf32>
      %cst_69 = arith.constant 1.000000e+00 : f32
      %274 = vector.broadcast %cst_69 : f32 to vector<8x32xf32>
      %275 = arith.subf %274, %267 : vector<8x32xf32>
      %276 = arith.mulf %275, %273 : vector<8x32xf32>
      %277 = arith.mulf %267, %246 : vector<8x32xf32>
      %278 = arith.addf %276, %277 : vector<8x32xf32>
      %c5_i32 = arith.constant 5 : i32
      %279 = arith.addi %0, %c5_i32 : i32
      %280 = vector.broadcast %279 : i32 to vector<8x1xi32>
      %281 = arith.cmpi sgt, %4, %280 : vector<8x1xi32>
      %282 = arith.extui %281 : vector<8x1xi1> to vector<8x1xi32>
      %283 = arith.sitofp %282 : vector<8x1xi32> to vector<8x1xf32>
      %284 = vector.broadcast %283 : vector<8x1xf32> to vector<8x32xf32>
      %285 = arith.mulf %284, %278 : vector<8x32xf32>
      %cst_70 = arith.constant 1.000000e+00 : f32
      %286 = vector.broadcast %cst_70 : f32 to vector<8x1xf32>
      %287 = arith.subf %286, %283 : vector<8x1xf32>
      %288 = vector.broadcast %287 : vector<8x1xf32> to vector<8x32xf32>
      %289 = arith.mulf %288, %246 : vector<8x32xf32>
      %290 = arith.addf %285, %289 : vector<8x32xf32>
      %c5 = arith.constant 5 : index
      %c0_71 = arith.constant 0 : index
      %c0_72 = arith.constant 0 : index
      %291 = vector.load %arg14[%c5, %c0_71, %c0_72] : memref<8x8x32xf32, #tpu.memory_space<vmem>>, vector<1x8x32xf32>
      %292 = vector.shape_cast %291 : vector<1x8x32xf32> to vector<8x32xf32>
      %293 = vector.shape_cast %290 : vector<8x32xf32> to vector<1x8x32xf32>
      tpu.vector_store %arg14[%c5, %c0_71, %c0_72], %293 {strides = array<i32>} : memref<8x8x32xf32, #tpu.memory_space<vmem>>, vector<1x8x32xf32>,
      %c48 = arith.constant 48 : index
      %c0_73 = arith.constant 0 : index
      %294 = vector.load %arg17[%c48, %c0_73] : memref<64x96xf32, #tpu.memory_space<vmem>>, vector<8x96xf32>
      %cst_74 = arith.constant dense<0.000000e+00> : vector<8x96xf32>
      %295 = tpu.matmul %290, %17, %cst_74 {dimension_numbers = #tpu.dot_dimension_numbers<[1], [0], [0], [1], [0, 0, 1, 1], [], []>} : vector<8x32xf32>, vector<32x96xf32>, vector<8x96xf32> -> vector<8x96xf32>
      %296 = vector.extract_strided_slice %294 {offsets = [0, 0], sizes = [8, 32], strides = [1, 1]} : vector<8x96xf32> to vector<8x32xf32>
      %297 = vector.extract_strided_slice %295 {offsets = [0, 0], sizes = [8, 32], strides = [1, 1]} : vector<8x96xf32> to vector<8x32xf32>
      %298 = arith.addf %296, %297 : vector<8x32xf32>
      %299 = arith.negf %298 : vector<8x32xf32>
      %300 = math.exp %299 : vector<8x32xf32>
      %cst_75 = arith.constant 1.000000e+00 : f32
      %301 = vector.broadcast %cst_75 : f32 to vector<8x32xf32>
      %302 = arith.addf %301, %300 : vector<8x32xf32>
      %303 = arith.divf %301, %302 : vector<8x32xf32>
      %304 = vector.extract_strided_slice %294 {offsets = [0, 32], sizes = [8, 32], strides = [1, 1]} : vector<8x96xf32> to vector<8x32xf32>
      %305 = vector.extract_strided_slice %295 {offsets = [0, 32], sizes = [8, 32], strides = [1, 1]} : vector<8x96xf32> to vector<8x32xf32>
      %306 = arith.addf %304, %305 : vector<8x32xf32>
      %307 = arith.negf %306 : vector<8x32xf32>
      %308 = math.exp %307 : vector<8x32xf32>
      %cst_76 = arith.constant 1.000000e+00 : f32
      %309 = vector.broadcast %cst_76 : f32 to vector<8x32xf32>
      %310 = arith.addf %309, %308 : vector<8x32xf32>
      %311 = arith.divf %309, %310 : vector<8x32xf32>
      %312 = vector.extract_strided_slice %294 {offsets = [0, 64], sizes = [8, 32], strides = [1, 1]} : vector<8x96xf32> to vector<8x32xf32>
      %313 = vector.extract_strided_slice %295 {offsets = [0, 64], sizes = [8, 32], strides = [1, 1]} : vector<8x96xf32> to vector<8x32xf32>
      %314 = arith.addf %313, %27 : vector<8x32xf32>
      %315 = arith.mulf %303, %314 : vector<8x32xf32>
      %316 = arith.addf %312, %315 : vector<8x32xf32>
      %317 = math.tanh %316 : vector<8x32xf32>
      %cst_77 = arith.constant 1.000000e+00 : f32
      %318 = vector.broadcast %cst_77 : f32 to vector<8x32xf32>
      %319 = arith.subf %318, %311 : vector<8x32xf32>
      %320 = arith.mulf %319, %317 : vector<8x32xf32>
      %321 = arith.mulf %311, %290 : vector<8x32xf32>
      %322 = arith.addf %320, %321 : vector<8x32xf32>
      %c6_i32 = arith.constant 6 : i32
      %323 = arith.addi %0, %c6_i32 : i32
      %324 = vector.broadcast %323 : i32 to vector<8x1xi32>
      %325 = arith.cmpi sgt, %4, %324 : vector<8x1xi32>
      %326 = arith.extui %325 : vector<8x1xi1> to vector<8x1xi32>
      %327 = arith.sitofp %326 : vector<8x1xi32> to vector<8x1xf32>
      %328 = vector.broadcast %327 : vector<8x1xf32> to vector<8x32xf32>
      %329 = arith.mulf %328, %322 : vector<8x32xf32>
      %cst_78 = arith.constant 1.000000e+00 : f32
      %330 = vector.broadcast %cst_78 : f32 to vector<8x1xf32>
      %331 = arith.subf %330, %327 : vector<8x1xf32>
      %332 = vector.broadcast %331 : vector<8x1xf32> to vector<8x32xf32>
      %333 = arith.mulf %332, %290 : vector<8x32xf32>
      %334 = arith.addf %329, %333 : vector<8x32xf32>
      %c6 = arith.constant 6 : index
      %c0_79 = arith.constant 0 : index
      %c0_80 = arith.constant 0 : index
      %335 = vector.load %arg14[%c6, %c0_79, %c0_80] : memref<8x8x32xf32, #tpu.memory_space<vmem>>, vector<1x8x32xf32>
      %336 = vector.shape_cast %335 : vector<1x8x32xf32> to vector<8x32xf32>
      %337 = vector.shape_cast %334 : vector<8x32xf32> to vector<1x8x32xf32>
      tpu.vector_store %arg14[%c6, %c0_79, %c0_80], %337 {strides = array<i32>} : memref<8x8x32xf32, #tpu.memory_space<vmem>>, vector<1x8x32xf32>,
      %c56 = arith.constant 56 : index
      %c0_81 = arith.constant 0 : index
      %338 = vector.load %arg17[%c56, %c0_81] : memref<64x96xf32, #tpu.memory_space<vmem>>, vector<8x96xf32>
      %cst_82 = arith.constant dense<0.000000e+00> : vector<8x96xf32>
      %339 = tpu.matmul %334, %17, %cst_82 {dimension_numbers = #tpu.dot_dimension_numbers<[1], [0], [0], [1], [0, 0, 1, 1], [], []>} : vector<8x32xf32>, vector<32x96xf32>, vector<8x96xf32> -> vector<8x96xf32>
      %340 = vector.extract_strided_slice %338 {offsets = [0, 0], sizes = [8, 32], strides = [1, 1]} : vector<8x96xf32> to vector<8x32xf32>
      %341 = vector.extract_strided_slice %339 {offsets = [0, 0], sizes = [8, 32], strides = [1, 1]} : vector<8x96xf32> to vector<8x32xf32>
      %342 = arith.addf %340, %341 : vector<8x32xf32>
      %343 = arith.negf %342 : vector<8x32xf32>
      %344 = math.exp %343 : vector<8x32xf32>
      %cst_83 = arith.constant 1.000000e+00 : f32
      %345 = vector.broadcast %cst_83 : f32 to vector<8x32xf32>
      %346 = arith.addf %345, %344 : vector<8x32xf32>
      %347 = arith.divf %345, %346 : vector<8x32xf32>
      %348 = vector.extract_strided_slice %338 {offsets = [0, 32], sizes = [8, 32], strides = [1, 1]} : vector<8x96xf32> to vector<8x32xf32>
      %349 = vector.extract_strided_slice %339 {offsets = [0, 32], sizes = [8, 32], strides = [1, 1]} : vector<8x96xf32> to vector<8x32xf32>
      %350 = arith.addf %348, %349 : vector<8x32xf32>
      %351 = arith.negf %350 : vector<8x32xf32>
      %352 = math.exp %351 : vector<8x32xf32>
      %cst_84 = arith.constant 1.000000e+00 : f32
      %353 = vector.broadcast %cst_84 : f32 to vector<8x32xf32>
      %354 = arith.addf %353, %352 : vector<8x32xf32>
      %355 = arith.divf %353, %354 : vector<8x32xf32>
      %356 = vector.extract_strided_slice %338 {offsets = [0, 64], sizes = [8, 32], strides = [1, 1]} : vector<8x96xf32> to vector<8x32xf32>
      %357 = vector.extract_strided_slice %339 {offsets = [0, 64], sizes = [8, 32], strides = [1, 1]} : vector<8x96xf32> to vector<8x32xf32>
      %358 = arith.addf %357, %27 : vector<8x32xf32>
      %359 = arith.mulf %347, %358 : vector<8x32xf32>
      %360 = arith.addf %356, %359 : vector<8x32xf32>
      %361 = math.tanh %360 : vector<8x32xf32>
      %cst_85 = arith.constant 1.000000e+00 : f32
      %362 = vector.broadcast %cst_85 : f32 to vector<8x32xf32>
      %363 = arith.subf %362, %355 : vector<8x32xf32>
      %364 = arith.mulf %363, %361 : vector<8x32xf32>
      %365 = arith.mulf %355, %334 : vector<8x32xf32>
      %366 = arith.addf %364, %365 : vector<8x32xf32>
      %c7_i32 = arith.constant 7 : i32
      %367 = arith.addi %0, %c7_i32 : i32
      %368 = vector.broadcast %367 : i32 to vector<8x1xi32>
      %369 = arith.cmpi sgt, %4, %368 : vector<8x1xi32>
      %370 = arith.extui %369 : vector<8x1xi1> to vector<8x1xi32>
      %371 = arith.sitofp %370 : vector<8x1xi32> to vector<8x1xf32>
      %372 = vector.broadcast %371 : vector<8x1xf32> to vector<8x32xf32>
      %373 = arith.mulf %372, %366 : vector<8x32xf32>
      %cst_86 = arith.constant 1.000000e+00 : f32
      %374 = vector.broadcast %cst_86 : f32 to vector<8x1xf32>
      %375 = arith.subf %374, %371 : vector<8x1xf32>
      %376 = vector.broadcast %375 : vector<8x1xf32> to vector<8x32xf32>
      %377 = arith.mulf %376, %334 : vector<8x32xf32>
      %378 = arith.addf %373, %377 : vector<8x32xf32>
      %c7 = arith.constant 7 : index
      %c0_87 = arith.constant 0 : index
      %c0_88 = arith.constant 0 : index
      %379 = vector.load %arg14[%c7, %c0_87, %c0_88] : memref<8x8x32xf32, #tpu.memory_space<vmem>>, vector<1x8x32xf32>
      %380 = vector.shape_cast %379 : vector<1x8x32xf32> to vector<8x32xf32>
      %381 = vector.shape_cast %378 : vector<8x32xf32> to vector<1x8x32xf32>
      tpu.vector_store %arg14[%c7, %c0_87, %c0_88], %381 {strides = array<i32>} : memref<8x8x32xf32, #tpu.memory_space<vmem>>, vector<1x8x32xf32>,
      %c0_89 = arith.constant 0 : index
      %c0_90 = arith.constant 0 : index
      %c0_91 = arith.constant 0 : index
      %382 = vector.load %arg16[%c0_89, %c0_90, %c0_91] : memref<2x8x32xf32, #tpu.memory_space<vmem>>, vector<1x8x32xf32>
      %383 = vector.shape_cast %382 : vector<1x8x32xf32> to vector<8x32xf32>
      %384 = vector.shape_cast %378 : vector<8x32xf32> to vector<1x8x32xf32>
      tpu.vector_store %arg16[%c0_89, %c0_90, %c0_91], %384 {strides = array<i32>} : memref<2x8x32xf32, #tpu.memory_space<vmem>>, vector<1x8x32xf32>,
      %c0_92 = arith.constant 0 : index
      %c0_93 = arith.constant 0 : index
      %385 = vector.load %arg10[%c0_92, %c0_93] : memref<32x96xf32, #tpu.memory_space<vmem>>, vector<32x96xf32>
      %c0_94 = arith.constant 0 : index
      %c0_95 = arith.constant 0 : index
      %386 = vector.load %arg11[%c0_94, %c0_95] : memref<32x96xf32, #tpu.memory_space<vmem>>, vector<32x96xf32>
      %c0_96 = arith.constant 0 : index
      %c0_97 = arith.constant 0 : index
      %387 = vector.load %arg12[%c0_96, %c0_97] : memref<1x96xf32, #tpu.memory_space<vmem>>, vector<1x96xf32>
      %c0_98 = arith.constant 0 : index
      %c0_99 = arith.constant 0 : index
      %388 = vector.load %arg13[%c0_98, %c0_99] : memref<1x32xf32, #tpu.memory_space<vmem>>, vector<1x32xf32>
      %c0_100 = arith.constant 0 : index
      %c0_101 = arith.constant 0 : index
      %c0_102 = arith.constant 0 : index
      %389 = vector.load %arg14[%c0_100, %c0_101, %c0_102] : memref<8x8x32xf32, #tpu.memory_space<vmem>>, vector<8x8x32xf32>
      %390 = vector.shape_cast %389 : vector<8x8x32xf32> to vector<64x32xf32>
      %cst_103 = arith.constant dense<0.000000e+00> : vector<64x96xf32>
      %391 = tpu.matmul %390, %385, %cst_103 {dimension_numbers = #tpu.dot_dimension_numbers<[1], [0], [0], [1], [0, 0, 1, 1], [], []>} : vector<64x32xf32>, vector<32x96xf32>, vector<64x96xf32> -> vector<64x96xf32>
      %392 = vector.broadcast %387 : vector<1x96xf32> to vector<64x96xf32>
      %393 = arith.addf %391, %392 : vector<64x96xf32>
      %c0_104 = arith.constant 0 : index
      %c0_105 = arith.constant 0 : index
      %394 = vector.load %arg17[%c0_104, %c0_105] : memref<64x96xf32, #tpu.memory_space<vmem>>, vector<64x96xf32>
      tpu.vector_store %arg17[%c0_104, %c0_105], %393 {strides = array<i32>} : memref<64x96xf32, #tpu.memory_space<vmem>>, vector<64x96xf32>,
      %395 = vector.shape_cast %388 : vector<1x32xf32> to vector<1x32xf32>
      %396 = vector.broadcast %395 : vector<1x32xf32> to vector<8x32xf32>
      %c1_106 = arith.constant 1 : index
      %c0_107 = arith.constant 0 : index
      %c0_108 = arith.constant 0 : index
      %397 = vector.load %arg16[%c1_106, %c0_107, %c0_108] : memref<2x8x32xf32, #tpu.memory_space<vmem>>, vector<1x8x32xf32>
      %398 = vector.shape_cast %397 : vector<1x8x32xf32> to vector<8x32xf32>
      %c0_109 = arith.constant 0 : index
      %c0_110 = arith.constant 0 : index
      %399 = vector.load %arg17[%c0_109, %c0_110] : memref<64x96xf32, #tpu.memory_space<vmem>>, vector<8x96xf32>
      %cst_111 = arith.constant dense<0.000000e+00> : vector<8x96xf32>
      %400 = tpu.matmul %398, %386, %cst_111 {dimension_numbers = #tpu.dot_dimension_numbers<[1], [0], [0], [1], [0, 0, 1, 1], [], []>} : vector<8x32xf32>, vector<32x96xf32>, vector<8x96xf32> -> vector<8x96xf32>
      %401 = vector.extract_strided_slice %399 {offsets = [0, 0], sizes = [8, 32], strides = [1, 1]} : vector<8x96xf32> to vector<8x32xf32>
      %402 = vector.extract_strided_slice %400 {offsets = [0, 0], sizes = [8, 32], strides = [1, 1]} : vector<8x96xf32> to vector<8x32xf32>
      %403 = arith.addf %401, %402 : vector<8x32xf32>
      %404 = arith.negf %403 : vector<8x32xf32>
      %405 = math.exp %404 : vector<8x32xf32>
      %cst_112 = arith.constant 1.000000e+00 : f32
      %406 = vector.broadcast %cst_112 : f32 to vector<8x32xf32>
      %407 = arith.addf %406, %405 : vector<8x32xf32>
      %408 = arith.divf %406, %407 : vector<8x32xf32>
      %409 = vector.extract_strided_slice %399 {offsets = [0, 32], sizes = [8, 32], strides = [1, 1]} : vector<8x96xf32> to vector<8x32xf32>
      %410 = vector.extract_strided_slice %400 {offsets = [0, 32], sizes = [8, 32], strides = [1, 1]} : vector<8x96xf32> to vector<8x32xf32>
      %411 = arith.addf %409, %410 : vector<8x32xf32>
      %412 = arith.negf %411 : vector<8x32xf32>
      %413 = math.exp %412 : vector<8x32xf32>
      %cst_113 = arith.constant 1.000000e+00 : f32
      %414 = vector.broadcast %cst_113 : f32 to vector<8x32xf32>
      %415 = arith.addf %414, %413 : vector<8x32xf32>
      %416 = arith.divf %414, %415 : vector<8x32xf32>
      %417 = vector.extract_strided_slice %399 {offsets = [0, 64], sizes = [8, 32], strides = [1, 1]} : vector<8x96xf32> to vector<8x32xf32>
      %418 = vector.extract_strided_slice %400 {offsets = [0, 64], sizes = [8, 32], strides = [1, 1]} : vector<8x96xf32> to vector<8x32xf32>
      %419 = arith.addf %418, %396 : vector<8x32xf32>
      %420 = arith.mulf %408, %419 : vector<8x32xf32>
      %421 = arith.addf %417, %420 : vector<8x32xf32>
      %422 = math.tanh %421 : vector<8x32xf32>
      %cst_114 = arith.constant 1.000000e+00 : f32
      %423 = vector.broadcast %cst_114 : f32 to vector<8x32xf32>
      %424 = arith.subf %423, %416 : vector<8x32xf32>
      %425 = arith.mulf %424, %422 : vector<8x32xf32>
      %426 = arith.mulf %416, %398 : vector<8x32xf32>
      %427 = arith.addf %425, %426 : vector<8x32xf32>
      %c0_i32_115 = arith.constant 0 : i32
      %428 = arith.addi %0, %c0_i32_115 : i32
      %429 = vector.broadcast %428 : i32 to vector<8x1xi32>
      %430 = arith.cmpi sgt, %4, %429 : vector<8x1xi32>
      %431 = arith.extui %430 : vector<8x1xi1> to vector<8x1xi32>
      %432 = arith.sitofp %431 : vector<8x1xi32> to vector<8x1xf32>
      %433 = vector.broadcast %432 : vector<8x1xf32> to vector<8x32xf32>
      %434 = arith.mulf %433, %427 : vector<8x32xf32>
      %cst_116 = arith.constant 1.000000e+00 : f32
      %435 = vector.broadcast %cst_116 : f32 to vector<8x1xf32>
      %436 = arith.subf %435, %432 : vector<8x1xf32>
      %437 = vector.broadcast %436 : vector<8x1xf32> to vector<8x32xf32>
      %438 = arith.mulf %437, %398 : vector<8x32xf32>
      %439 = arith.addf %434, %438 : vector<8x32xf32>
      %440 = vector.broadcast %432 : vector<8x1xf32> to vector<8x32xf32>
      %441 = arith.mulf %439, %440 : vector<8x32xf32>
      %c0_117 = arith.constant 0 : index
      %c0_118 = arith.constant 0 : index
      %c0_119 = arith.constant 0 : index
      %442 = vector.load %arg14[%c0_117, %c0_118, %c0_119] : memref<8x8x32xf32, #tpu.memory_space<vmem>>, vector<1x8x32xf32>
      %443 = vector.shape_cast %442 : vector<1x8x32xf32> to vector<8x32xf32>
      %444 = vector.shape_cast %441 : vector<8x32xf32> to vector<1x8x32xf32>
      tpu.vector_store %arg14[%c0_117, %c0_118, %c0_119], %444 {strides = array<i32>} : memref<8x8x32xf32, #tpu.memory_space<vmem>>, vector<1x8x32xf32>,
      %c8_120 = arith.constant 8 : index
      %c0_121 = arith.constant 0 : index
      %445 = vector.load %arg17[%c8_120, %c0_121] : memref<64x96xf32, #tpu.memory_space<vmem>>, vector<8x96xf32>
      %cst_122 = arith.constant dense<0.000000e+00> : vector<8x96xf32>
      %446 = tpu.matmul %439, %386, %cst_122 {dimension_numbers = #tpu.dot_dimension_numbers<[1], [0], [0], [1], [0, 0, 1, 1], [], []>} : vector<8x32xf32>, vector<32x96xf32>, vector<8x96xf32> -> vector<8x96xf32>
      %447 = vector.extract_strided_slice %445 {offsets = [0, 0], sizes = [8, 32], strides = [1, 1]} : vector<8x96xf32> to vector<8x32xf32>
      %448 = vector.extract_strided_slice %446 {offsets = [0, 0], sizes = [8, 32], strides = [1, 1]} : vector<8x96xf32> to vector<8x32xf32>
      %449 = arith.addf %447, %448 : vector<8x32xf32>
      %450 = arith.negf %449 : vector<8x32xf32>
      %451 = math.exp %450 : vector<8x32xf32>
      %cst_123 = arith.constant 1.000000e+00 : f32
      %452 = vector.broadcast %cst_123 : f32 to vector<8x32xf32>
      %453 = arith.addf %452, %451 : vector<8x32xf32>
      %454 = arith.divf %452, %453 : vector<8x32xf32>
      %455 = vector.extract_strided_slice %445 {offsets = [0, 32], sizes = [8, 32], strides = [1, 1]} : vector<8x96xf32> to vector<8x32xf32>
      %456 = vector.extract_strided_slice %446 {offsets = [0, 32], sizes = [8, 32], strides = [1, 1]} : vector<8x96xf32> to vector<8x32xf32>
      %457 = arith.addf %455, %456 : vector<8x32xf32>
      %458 = arith.negf %457 : vector<8x32xf32>
      %459 = math.exp %458 : vector<8x32xf32>
      %cst_124 = arith.constant 1.000000e+00 : f32
      %460 = vector.broadcast %cst_124 : f32 to vector<8x32xf32>
      %461 = arith.addf %460, %459 : vector<8x32xf32>
      %462 = arith.divf %460, %461 : vector<8x32xf32>
      %463 = vector.extract_strided_slice %445 {offsets = [0, 64], sizes = [8, 32], strides = [1, 1]} : vector<8x96xf32> to vector<8x32xf32>
      %464 = vector.extract_strided_slice %446 {offsets = [0, 64], sizes = [8, 32], strides = [1, 1]} : vector<8x96xf32> to vector<8x32xf32>
      %465 = arith.addf %464, %396 : vector<8x32xf32>
      %466 = arith.mulf %454, %465 : vector<8x32xf32>
      %467 = arith.addf %463, %466 : vector<8x32xf32>
      %468 = math.tanh %467 : vector<8x32xf32>
      %cst_125 = arith.constant 1.000000e+00 : f32
      %469 = vector.broadcast %cst_125 : f32 to vector<8x32xf32>
      %470 = arith.subf %469, %462 : vector<8x32xf32>
      %471 = arith.mulf %470, %468 : vector<8x32xf32>
      %472 = arith.mulf %462, %439 : vector<8x32xf32>
      %473 = arith.addf %471, %472 : vector<8x32xf32>
      %c1_i32_126 = arith.constant 1 : i32
      %474 = arith.addi %0, %c1_i32_126 : i32
      %475 = vector.broadcast %474 : i32 to vector<8x1xi32>
      %476 = arith.cmpi sgt, %4, %475 : vector<8x1xi32>
      %477 = arith.extui %476 : vector<8x1xi1> to vector<8x1xi32>
      %478 = arith.sitofp %477 : vector<8x1xi32> to vector<8x1xf32>
      %479 = vector.broadcast %478 : vector<8x1xf32> to vector<8x32xf32>
      %480 = arith.mulf %479, %473 : vector<8x32xf32>
      %cst_127 = arith.constant 1.000000e+00 : f32
      %481 = vector.broadcast %cst_127 : f32 to vector<8x1xf32>
      %482 = arith.subf %481, %478 : vector<8x1xf32>
      %483 = vector.broadcast %482 : vector<8x1xf32> to vector<8x32xf32>
      %484 = arith.mulf %483, %439 : vector<8x32xf32>
      %485 = arith.addf %480, %484 : vector<8x32xf32>
      %486 = vector.broadcast %478 : vector<8x1xf32> to vector<8x32xf32>
      %487 = arith.mulf %485, %486 : vector<8x32xf32>
      %c1_128 = arith.constant 1 : index
      %c0_129 = arith.constant 0 : index
      %c0_130 = arith.constant 0 : index
      %488 = vector.load %arg14[%c1_128, %c0_129, %c0_130] : memref<8x8x32xf32, #tpu.memory_space<vmem>>, vector<1x8x32xf32>
      %489 = vector.shape_cast %488 : vector<1x8x32xf32> to vector<8x32xf32>
      %490 = vector.shape_cast %487 : vector<8x32xf32> to vector<1x8x32xf32>
      tpu.vector_store %arg14[%c1_128, %c0_129, %c0_130], %490 {strides = array<i32>} : memref<8x8x32xf32, #tpu.memory_space<vmem>>, vector<1x8x32xf32>,
      %c16_131 = arith.constant 16 : index
      %c0_132 = arith.constant 0 : index
      %491 = vector.load %arg17[%c16_131, %c0_132] : memref<64x96xf32, #tpu.memory_space<vmem>>, vector<8x96xf32>
      %cst_133 = arith.constant dense<0.000000e+00> : vector<8x96xf32>
      %492 = tpu.matmul %485, %386, %cst_133 {dimension_numbers = #tpu.dot_dimension_numbers<[1], [0], [0], [1], [0, 0, 1, 1], [], []>} : vector<8x32xf32>, vector<32x96xf32>, vector<8x96xf32> -> vector<8x96xf32>
      %493 = vector.extract_strided_slice %491 {offsets = [0, 0], sizes = [8, 32], strides = [1, 1]} : vector<8x96xf32> to vector<8x32xf32>
      %494 = vector.extract_strided_slice %492 {offsets = [0, 0], sizes = [8, 32], strides = [1, 1]} : vector<8x96xf32> to vector<8x32xf32>
      %495 = arith.addf %493, %494 : vector<8x32xf32>
      %496 = arith.negf %495 : vector<8x32xf32>
      %497 = math.exp %496 : vector<8x32xf32>
      %cst_134 = arith.constant 1.000000e+00 : f32
      %498 = vector.broadcast %cst_134 : f32 to vector<8x32xf32>
      %499 = arith.addf %498, %497 : vector<8x32xf32>
      %500 = arith.divf %498, %499 : vector<8x32xf32>
      %501 = vector.extract_strided_slice %491 {offsets = [0, 32], sizes = [8, 32], strides = [1, 1]} : vector<8x96xf32> to vector<8x32xf32>
      %502 = vector.extract_strided_slice %492 {offsets = [0, 32], sizes = [8, 32], strides = [1, 1]} : vector<8x96xf32> to vector<8x32xf32>
      %503 = arith.addf %501, %502 : vector<8x32xf32>
      %504 = arith.negf %503 : vector<8x32xf32>
      %505 = math.exp %504 : vector<8x32xf32>
      %cst_135 = arith.constant 1.000000e+00 : f32
      %506 = vector.broadcast %cst_135 : f32 to vector<8x32xf32>
      %507 = arith.addf %506, %505 : vector<8x32xf32>
      %508 = arith.divf %506, %507 : vector<8x32xf32>
      %509 = vector.extract_strided_slice %491 {offsets = [0, 64], sizes = [8, 32], strides = [1, 1]} : vector<8x96xf32> to vector<8x32xf32>
      %510 = vector.extract_strided_slice %492 {offsets = [0, 64], sizes = [8, 32], strides = [1, 1]} : vector<8x96xf32> to vector<8x32xf32>
      %511 = arith.addf %510, %396 : vector<8x32xf32>
      %512 = arith.mulf %500, %511 : vector<8x32xf32>
      %513 = arith.addf %509, %512 : vector<8x32xf32>
      %514 = math.tanh %513 : vector<8x32xf32>
      %cst_136 = arith.constant 1.000000e+00 : f32
      %515 = vector.broadcast %cst_136 : f32 to vector<8x32xf32>
      %516 = arith.subf %515, %508 : vector<8x32xf32>
      %517 = arith.mulf %516, %514 : vector<8x32xf32>
      %518 = arith.mulf %508, %485 : vector<8x32xf32>
      %519 = arith.addf %517, %518 : vector<8x32xf32>
      %c2_i32_137 = arith.constant 2 : i32
      %520 = arith.addi %0, %c2_i32_137 : i32
      %521 = vector.broadcast %520 : i32 to vector<8x1xi32>
      %522 = arith.cmpi sgt, %4, %521 : vector<8x1xi32>
      %523 = arith.extui %522 : vector<8x1xi1> to vector<8x1xi32>
      %524 = arith.sitofp %523 : vector<8x1xi32> to vector<8x1xf32>
      %525 = vector.broadcast %524 : vector<8x1xf32> to vector<8x32xf32>
      %526 = arith.mulf %525, %519 : vector<8x32xf32>
      %cst_138 = arith.constant 1.000000e+00 : f32
      %527 = vector.broadcast %cst_138 : f32 to vector<8x1xf32>
      %528 = arith.subf %527, %524 : vector<8x1xf32>
      %529 = vector.broadcast %528 : vector<8x1xf32> to vector<8x32xf32>
      %530 = arith.mulf %529, %485 : vector<8x32xf32>
      %531 = arith.addf %526, %530 : vector<8x32xf32>
      %532 = vector.broadcast %524 : vector<8x1xf32> to vector<8x32xf32>
      %533 = arith.mulf %531, %532 : vector<8x32xf32>
      %c2_139 = arith.constant 2 : index
      %c0_140 = arith.constant 0 : index
      %c0_141 = arith.constant 0 : index
      %534 = vector.load %arg14[%c2_139, %c0_140, %c0_141] : memref<8x8x32xf32, #tpu.memory_space<vmem>>, vector<1x8x32xf32>
      %535 = vector.shape_cast %534 : vector<1x8x32xf32> to vector<8x32xf32>
      %536 = vector.shape_cast %533 : vector<8x32xf32> to vector<1x8x32xf32>
      tpu.vector_store %arg14[%c2_139, %c0_140, %c0_141], %536 {strides = array<i32>} : memref<8x8x32xf32, #tpu.memory_space<vmem>>, vector<1x8x32xf32>,
      %c24_142 = arith.constant 24 : index
      %c0_143 = arith.constant 0 : index
      %537 = vector.load %arg17[%c24_142, %c0_143] : memref<64x96xf32, #tpu.memory_space<vmem>>, vector<8x96xf32>
      %cst_144 = arith.constant dense<0.000000e+00> : vector<8x96xf32>
      %538 = tpu.matmul %531, %386, %cst_144 {dimension_numbers = #tpu.dot_dimension_numbers<[1], [0], [0], [1], [0, 0, 1, 1], [], []>} : vector<8x32xf32>, vector<32x96xf32>, vector<8x96xf32> -> vector<8x96xf32>
      %539 = vector.extract_strided_slice %537 {offsets = [0, 0], sizes = [8, 32], strides = [1, 1]} : vector<8x96xf32> to vector<8x32xf32>
      %540 = vector.extract_strided_slice %538 {offsets = [0, 0], sizes = [8, 32], strides = [1, 1]} : vector<8x96xf32> to vector<8x32xf32>
      %541 = arith.addf %539, %540 : vector<8x32xf32>
      %542 = arith.negf %541 : vector<8x32xf32>
      %543 = math.exp %542 : vector<8x32xf32>
      %cst_145 = arith.constant 1.000000e+00 : f32
      %544 = vector.broadcast %cst_145 : f32 to vector<8x32xf32>
      %545 = arith.addf %544, %543 : vector<8x32xf32>
      %546 = arith.divf %544, %545 : vector<8x32xf32>
      %547 = vector.extract_strided_slice %537 {offsets = [0, 32], sizes = [8, 32], strides = [1, 1]} : vector<8x96xf32> to vector<8x32xf32>
      %548 = vector.extract_strided_slice %538 {offsets = [0, 32], sizes = [8, 32], strides = [1, 1]} : vector<8x96xf32> to vector<8x32xf32>
      %549 = arith.addf %547, %548 : vector<8x32xf32>
      %550 = arith.negf %549 : vector<8x32xf32>
      %551 = math.exp %550 : vector<8x32xf32>
      %cst_146 = arith.constant 1.000000e+00 : f32
      %552 = vector.broadcast %cst_146 : f32 to vector<8x32xf32>
      %553 = arith.addf %552, %551 : vector<8x32xf32>
      %554 = arith.divf %552, %553 : vector<8x32xf32>
      %555 = vector.extract_strided_slice %537 {offsets = [0, 64], sizes = [8, 32], strides = [1, 1]} : vector<8x96xf32> to vector<8x32xf32>
      %556 = vector.extract_strided_slice %538 {offsets = [0, 64], sizes = [8, 32], strides = [1, 1]} : vector<8x96xf32> to vector<8x32xf32>
      %557 = arith.addf %556, %396 : vector<8x32xf32>
      %558 = arith.mulf %546, %557 : vector<8x32xf32>
      %559 = arith.addf %555, %558 : vector<8x32xf32>
      %560 = math.tanh %559 : vector<8x32xf32>
      %cst_147 = arith.constant 1.000000e+00 : f32
      %561 = vector.broadcast %cst_147 : f32 to vector<8x32xf32>
      %562 = arith.subf %561, %554 : vector<8x32xf32>
      %563 = arith.mulf %562, %560 : vector<8x32xf32>
      %564 = arith.mulf %554, %531 : vector<8x32xf32>
      %565 = arith.addf %563, %564 : vector<8x32xf32>
      %c3_i32_148 = arith.constant 3 : i32
      %566 = arith.addi %0, %c3_i32_148 : i32
      %567 = vector.broadcast %566 : i32 to vector<8x1xi32>
      %568 = arith.cmpi sgt, %4, %567 : vector<8x1xi32>
      %569 = arith.extui %568 : vector<8x1xi1> to vector<8x1xi32>
      %570 = arith.sitofp %569 : vector<8x1xi32> to vector<8x1xf32>
      %571 = vector.broadcast %570 : vector<8x1xf32> to vector<8x32xf32>
      %572 = arith.mulf %571, %565 : vector<8x32xf32>
      %cst_149 = arith.constant 1.000000e+00 : f32
      %573 = vector.broadcast %cst_149 : f32 to vector<8x1xf32>
      %574 = arith.subf %573, %570 : vector<8x1xf32>
      %575 = vector.broadcast %574 : vector<8x1xf32> to vector<8x32xf32>
      %576 = arith.mulf %575, %531 : vector<8x32xf32>
      %577 = arith.addf %572, %576 : vector<8x32xf32>
      %578 = vector.broadcast %570 : vector<8x1xf32> to vector<8x32xf32>
      %579 = arith.mulf %577, %578 : vector<8x32xf32>
      %c3_150 = arith.constant 3 : index
      %c0_151 = arith.constant 0 : index
      %c0_152 = arith.constant 0 : index
      %580 = vector.load %arg14[%c3_150, %c0_151, %c0_152] : memref<8x8x32xf32, #tpu.memory_space<vmem>>, vector<1x8x32xf32>
      %581 = vector.shape_cast %580 : vector<1x8x32xf32> to vector<8x32xf32>
      %582 = vector.shape_cast %579 : vector<8x32xf32> to vector<1x8x32xf32>
      tpu.vector_store %arg14[%c3_150, %c0_151, %c0_152], %582 {strides = array<i32>} : memref<8x8x32xf32, #tpu.memory_space<vmem>>, vector<1x8x32xf32>,
      %c32_153 = arith.constant 32 : index
      %c0_154 = arith.constant 0 : index
      %583 = vector.load %arg17[%c32_153, %c0_154] : memref<64x96xf32, #tpu.memory_space<vmem>>, vector<8x96xf32>
      %cst_155 = arith.constant dense<0.000000e+00> : vector<8x96xf32>
      %584 = tpu.matmul %577, %386, %cst_155 {dimension_numbers = #tpu.dot_dimension_numbers<[1], [0], [0], [1], [0, 0, 1, 1], [], []>} : vector<8x32xf32>, vector<32x96xf32>, vector<8x96xf32> -> vector<8x96xf32>
      %585 = vector.extract_strided_slice %583 {offsets = [0, 0], sizes = [8, 32], strides = [1, 1]} : vector<8x96xf32> to vector<8x32xf32>
      %586 = vector.extract_strided_slice %584 {offsets = [0, 0], sizes = [8, 32], strides = [1, 1]} : vector<8x96xf32> to vector<8x32xf32>
      %587 = arith.addf %585, %586 : vector<8x32xf32>
      %588 = arith.negf %587 : vector<8x32xf32>
      %589 = math.exp %588 : vector<8x32xf32>
      %cst_156 = arith.constant 1.000000e+00 : f32
      %590 = vector.broadcast %cst_156 : f32 to vector<8x32xf32>
      %591 = arith.addf %590, %589 : vector<8x32xf32>
      %592 = arith.divf %590, %591 : vector<8x32xf32>
      %593 = vector.extract_strided_slice %583 {offsets = [0, 32], sizes = [8, 32], strides = [1, 1]} : vector<8x96xf32> to vector<8x32xf32>
      %594 = vector.extract_strided_slice %584 {offsets = [0, 32], sizes = [8, 32], strides = [1, 1]} : vector<8x96xf32> to vector<8x32xf32>
      %595 = arith.addf %593, %594 : vector<8x32xf32>
      %596 = arith.negf %595 : vector<8x32xf32>
      %597 = math.exp %596 : vector<8x32xf32>
      %cst_157 = arith.constant 1.000000e+00 : f32
      %598 = vector.broadcast %cst_157 : f32 to vector<8x32xf32>
      %599 = arith.addf %598, %597 : vector<8x32xf32>
      %600 = arith.divf %598, %599 : vector<8x32xf32>
      %601 = vector.extract_strided_slice %583 {offsets = [0, 64], sizes = [8, 32], strides = [1, 1]} : vector<8x96xf32> to vector<8x32xf32>
      %602 = vector.extract_strided_slice %584 {offsets = [0, 64], sizes = [8, 32], strides = [1, 1]} : vector<8x96xf32> to vector<8x32xf32>
      %603 = arith.addf %602, %396 : vector<8x32xf32>
      %604 = arith.mulf %592, %603 : vector<8x32xf32>
      %605 = arith.addf %601, %604 : vector<8x32xf32>
      %606 = math.tanh %605 : vector<8x32xf32>
      %cst_158 = arith.constant 1.000000e+00 : f32
      %607 = vector.broadcast %cst_158 : f32 to vector<8x32xf32>
      %608 = arith.subf %607, %600 : vector<8x32xf32>
      %609 = arith.mulf %608, %606 : vector<8x32xf32>
      %610 = arith.mulf %600, %577 : vector<8x32xf32>
      %611 = arith.addf %609, %610 : vector<8x32xf32>
      %c4_i32_159 = arith.constant 4 : i32
      %612 = arith.addi %0, %c4_i32_159 : i32
      %613 = vector.broadcast %612 : i32 to vector<8x1xi32>
      %614 = arith.cmpi sgt, %4, %613 : vector<8x1xi32>
      %615 = arith.extui %614 : vector<8x1xi1> to vector<8x1xi32>
      %616 = arith.sitofp %615 : vector<8x1xi32> to vector<8x1xf32>
      %617 = vector.broadcast %616 : vector<8x1xf32> to vector<8x32xf32>
      %618 = arith.mulf %617, %611 : vector<8x32xf32>
      %cst_160 = arith.constant 1.000000e+00 : f32
      %619 = vector.broadcast %cst_160 : f32 to vector<8x1xf32>
      %620 = arith.subf %619, %616 : vector<8x1xf32>
      %621 = vector.broadcast %620 : vector<8x1xf32> to vector<8x32xf32>
      %622 = arith.mulf %621, %577 : vector<8x32xf32>
      %623 = arith.addf %618, %622 : vector<8x32xf32>
      %624 = vector.broadcast %616 : vector<8x1xf32> to vector<8x32xf32>
      %625 = arith.mulf %623, %624 : vector<8x32xf32>
      %c4_161 = arith.constant 4 : index
      %c0_162 = arith.constant 0 : index
      %c0_163 = arith.constant 0 : index
      %626 = vector.load %arg14[%c4_161, %c0_162, %c0_163] : memref<8x8x32xf32, #tpu.memory_space<vmem>>, vector<1x8x32xf32>
      %627 = vector.shape_cast %626 : vector<1x8x32xf32> to vector<8x32xf32>
      %628 = vector.shape_cast %625 : vector<8x32xf32> to vector<1x8x32xf32>
      tpu.vector_store %arg14[%c4_161, %c0_162, %c0_163], %628 {strides = array<i32>} : memref<8x8x32xf32, #tpu.memory_space<vmem>>, vector<1x8x32xf32>,
      %c40_164 = arith.constant 40 : index
      %c0_165 = arith.constant 0 : index
      %629 = vector.load %arg17[%c40_164, %c0_165] : memref<64x96xf32, #tpu.memory_space<vmem>>, vector<8x96xf32>
      %cst_166 = arith.constant dense<0.000000e+00> : vector<8x96xf32>
      %630 = tpu.matmul %623, %386, %cst_166 {dimension_numbers = #tpu.dot_dimension_numbers<[1], [0], [0], [1], [0, 0, 1, 1], [], []>} : vector<8x32xf32>, vector<32x96xf32>, vector<8x96xf32> -> vector<8x96xf32>
      %631 = vector.extract_strided_slice %629 {offsets = [0, 0], sizes = [8, 32], strides = [1, 1]} : vector<8x96xf32> to vector<8x32xf32>
      %632 = vector.extract_strided_slice %630 {offsets = [0, 0], sizes = [8, 32], strides = [1, 1]} : vector<8x96xf32> to vector<8x32xf32>
      %633 = arith.addf %631, %632 : vector<8x32xf32>
      %634 = arith.negf %633 : vector<8x32xf32>
      %635 = math.exp %634 : vector<8x32xf32>
      %cst_167 = arith.constant 1.000000e+00 : f32
      %636 = vector.broadcast %cst_167 : f32 to vector<8x32xf32>
      %637 = arith.addf %636, %635 : vector<8x32xf32>
      %638 = arith.divf %636, %637 : vector<8x32xf32>
      %639 = vector.extract_strided_slice %629 {offsets = [0, 32], sizes = [8, 32], strides = [1, 1]} : vector<8x96xf32> to vector<8x32xf32>
      %640 = vector.extract_strided_slice %630 {offsets = [0, 32], sizes = [8, 32], strides = [1, 1]} : vector<8x96xf32> to vector<8x32xf32>
      %641 = arith.addf %639, %640 : vector<8x32xf32>
      %642 = arith.negf %641 : vector<8x32xf32>
      %643 = math.exp %642 : vector<8x32xf32>
      %cst_168 = arith.constant 1.000000e+00 : f32
      %644 = vector.broadcast %cst_168 : f32 to vector<8x32xf32>
      %645 = arith.addf %644, %643 : vector<8x32xf32>
      %646 = arith.divf %644, %645 : vector<8x32xf32>
      %647 = vector.extract_strided_slice %629 {offsets = [0, 64], sizes = [8, 32], strides = [1, 1]} : vector<8x96xf32> to vector<8x32xf32>
      %648 = vector.extract_strided_slice %630 {offsets = [0, 64], sizes = [8, 32], strides = [1, 1]} : vector<8x96xf32> to vector<8x32xf32>
      %649 = arith.addf %648, %396 : vector<8x32xf32>
      %650 = arith.mulf %638, %649 : vector<8x32xf32>
      %651 = arith.addf %647, %650 : vector<8x32xf32>
      %652 = math.tanh %651 : vector<8x32xf32>
      %cst_169 = arith.constant 1.000000e+00 : f32
      %653 = vector.broadcast %cst_169 : f32 to vector<8x32xf32>
      %654 = arith.subf %653, %646 : vector<8x32xf32>
      %655 = arith.mulf %654, %652 : vector<8x32xf32>
      %656 = arith.mulf %646, %623 : vector<8x32xf32>
      %657 = arith.addf %655, %656 : vector<8x32xf32>
      %c5_i32_170 = arith.constant 5 : i32
      %658 = arith.addi %0, %c5_i32_170 : i32
      %659 = vector.broadcast %658 : i32 to vector<8x1xi32>
      %660 = arith.cmpi sgt, %4, %659 : vector<8x1xi32>
      %661 = arith.extui %660 : vector<8x1xi1> to vector<8x1xi32>
      %662 = arith.sitofp %661 : vector<8x1xi32> to vector<8x1xf32>
      %663 = vector.broadcast %662 : vector<8x1xf32> to vector<8x32xf32>
      %664 = arith.mulf %663, %657 : vector<8x32xf32>
      %cst_171 = arith.constant 1.000000e+00 : f32
      %665 = vector.broadcast %cst_171 : f32 to vector<8x1xf32>
      %666 = arith.subf %665, %662 : vector<8x1xf32>
      %667 = vector.broadcast %666 : vector<8x1xf32> to vector<8x32xf32>
      %668 = arith.mulf %667, %623 : vector<8x32xf32>
      %669 = arith.addf %664, %668 : vector<8x32xf32>
      %670 = vector.broadcast %662 : vector<8x1xf32> to vector<8x32xf32>
      %671 = arith.mulf %669, %670 : vector<8x32xf32>
      %c5_172 = arith.constant 5 : index
      %c0_173 = arith.constant 0 : index
      %c0_174 = arith.constant 0 : index
      %672 = vector.load %arg14[%c5_172, %c0_173, %c0_174] : memref<8x8x32xf32, #tpu.memory_space<vmem>>, vector<1x8x32xf32>
      %673 = vector.shape_cast %672 : vector<1x8x32xf32> to vector<8x32xf32>
      %674 = vector.shape_cast %671 : vector<8x32xf32> to vector<1x8x32xf32>
      tpu.vector_store %arg14[%c5_172, %c0_173, %c0_174], %674 {strides = array<i32>} : memref<8x8x32xf32, #tpu.memory_space<vmem>>, vector<1x8x32xf32>,
      %c48_175 = arith.constant 48 : index
      %c0_176 = arith.constant 0 : index
      %675 = vector.load %arg17[%c48_175, %c0_176] : memref<64x96xf32, #tpu.memory_space<vmem>>, vector<8x96xf32>
      %cst_177 = arith.constant dense<0.000000e+00> : vector<8x96xf32>
      %676 = tpu.matmul %669, %386, %cst_177 {dimension_numbers = #tpu.dot_dimension_numbers<[1], [0], [0], [1], [0, 0, 1, 1], [], []>} : vector<8x32xf32>, vector<32x96xf32>, vector<8x96xf32> -> vector<8x96xf32>
      %677 = vector.extract_strided_slice %675 {offsets = [0, 0], sizes = [8, 32], strides = [1, 1]} : vector<8x96xf32> to vector<8x32xf32>
      %678 = vector.extract_strided_slice %676 {offsets = [0, 0], sizes = [8, 32], strides = [1, 1]} : vector<8x96xf32> to vector<8x32xf32>
      %679 = arith.addf %677, %678 : vector<8x32xf32>
      %680 = arith.negf %679 : vector<8x32xf32>
      %681 = math.exp %680 : vector<8x32xf32>
      %cst_178 = arith.constant 1.000000e+00 : f32
      %682 = vector.broadcast %cst_178 : f32 to vector<8x32xf32>
      %683 = arith.addf %682, %681 : vector<8x32xf32>
      %684 = arith.divf %682, %683 : vector<8x32xf32>
      %685 = vector.extract_strided_slice %675 {offsets = [0, 32], sizes = [8, 32], strides = [1, 1]} : vector<8x96xf32> to vector<8x32xf32>
      %686 = vector.extract_strided_slice %676 {offsets = [0, 32], sizes = [8, 32], strides = [1, 1]} : vector<8x96xf32> to vector<8x32xf32>
      %687 = arith.addf %685, %686 : vector<8x32xf32>
      %688 = arith.negf %687 : vector<8x32xf32>
      %689 = math.exp %688 : vector<8x32xf32>
      %cst_179 = arith.constant 1.000000e+00 : f32
      %690 = vector.broadcast %cst_179 : f32 to vector<8x32xf32>
      %691 = arith.addf %690, %689 : vector<8x32xf32>
      %692 = arith.divf %690, %691 : vector<8x32xf32>
      %693 = vector.extract_strided_slice %675 {offsets = [0, 64], sizes = [8, 32], strides = [1, 1]} : vector<8x96xf32> to vector<8x32xf32>
      %694 = vector.extract_strided_slice %676 {offsets = [0, 64], sizes = [8, 32], strides = [1, 1]} : vector<8x96xf32> to vector<8x32xf32>
      %695 = arith.addf %694, %396 : vector<8x32xf32>
      %696 = arith.mulf %684, %695 : vector<8x32xf32>
      %697 = arith.addf %693, %696 : vector<8x32xf32>
      %698 = math.tanh %697 : vector<8x32xf32>
      %cst_180 = arith.constant 1.000000e+00 : f32
      %699 = vector.broadcast %cst_180 : f32 to vector<8x32xf32>
      %700 = arith.subf %699, %692 : vector<8x32xf32>
      %701 = arith.mulf %700, %698 : vector<8x32xf32>
      %702 = arith.mulf %692, %669 : vector<8x32xf32>
      %703 = arith.addf %701, %702 : vector<8x32xf32>
      %c6_i32_181 = arith.constant 6 : i32
      %704 = arith.addi %0, %c6_i32_181 : i32
      %705 = vector.broadcast %704 : i32 to vector<8x1xi32>
      %706 = arith.cmpi sgt, %4, %705 : vector<8x1xi32>
      %707 = arith.extui %706 : vector<8x1xi1> to vector<8x1xi32>
      %708 = arith.sitofp %707 : vector<8x1xi32> to vector<8x1xf32>
      %709 = vector.broadcast %708 : vector<8x1xf32> to vector<8x32xf32>
      %710 = arith.mulf %709, %703 : vector<8x32xf32>
      %cst_182 = arith.constant 1.000000e+00 : f32
      %711 = vector.broadcast %cst_182 : f32 to vector<8x1xf32>
      %712 = arith.subf %711, %708 : vector<8x1xf32>
      %713 = vector.broadcast %712 : vector<8x1xf32> to vector<8x32xf32>
      %714 = arith.mulf %713, %669 : vector<8x32xf32>
      %715 = arith.addf %710, %714 : vector<8x32xf32>
      %716 = vector.broadcast %708 : vector<8x1xf32> to vector<8x32xf32>
      %717 = arith.mulf %715, %716 : vector<8x32xf32>
      %c6_183 = arith.constant 6 : index
      %c0_184 = arith.constant 0 : index
      %c0_185 = arith.constant 0 : index
      %718 = vector.load %arg14[%c6_183, %c0_184, %c0_185] : memref<8x8x32xf32, #tpu.memory_space<vmem>>, vector<1x8x32xf32>
      %719 = vector.shape_cast %718 : vector<1x8x32xf32> to vector<8x32xf32>
      %720 = vector.shape_cast %717 : vector<8x32xf32> to vector<1x8x32xf32>
      tpu.vector_store %arg14[%c6_183, %c0_184, %c0_185], %720 {strides = array<i32>} : memref<8x8x32xf32, #tpu.memory_space<vmem>>, vector<1x8x32xf32>,
      %c56_186 = arith.constant 56 : index
      %c0_187 = arith.constant 0 : index
      %721 = vector.load %arg17[%c56_186, %c0_187] : memref<64x96xf32, #tpu.memory_space<vmem>>, vector<8x96xf32>
      %cst_188 = arith.constant dense<0.000000e+00> : vector<8x96xf32>
      %722 = tpu.matmul %715, %386, %cst_188 {dimension_numbers = #tpu.dot_dimension_numbers<[1], [0], [0], [1], [0, 0, 1, 1], [], []>} : vector<8x32xf32>, vector<32x96xf32>, vector<8x96xf32> -> vector<8x96xf32>
      %723 = vector.extract_strided_slice %721 {offsets = [0, 0], sizes = [8, 32], strides = [1, 1]} : vector<8x96xf32> to vector<8x32xf32>
      %724 = vector.extract_strided_slice %722 {offsets = [0, 0], sizes = [8, 32], strides = [1, 1]} : vector<8x96xf32> to vector<8x32xf32>
      %725 = arith.addf %723, %724 : vector<8x32xf32>
      %726 = arith.negf %725 : vector<8x32xf32>
      %727 = math.exp %726 : vector<8x32xf32>
      %cst_189 = arith.constant 1.000000e+00 : f32
      %728 = vector.broadcast %cst_189 : f32 to vector<8x32xf32>
      %729 = arith.addf %728, %727 : vector<8x32xf32>
      %730 = arith.divf %728, %729 : vector<8x32xf32>
      %731 = vector.extract_strided_slice %721 {offsets = [0, 32], sizes = [8, 32], strides = [1, 1]} : vector<8x96xf32> to vector<8x32xf32>
      %732 = vector.extract_strided_slice %722 {offsets = [0, 32], sizes = [8, 32], strides = [1, 1]} : vector<8x96xf32> to vector<8x32xf32>
      %733 = arith.addf %731, %732 : vector<8x32xf32>
      %734 = arith.negf %733 : vector<8x32xf32>
      %735 = math.exp %734 : vector<8x32xf32>
      %cst_190 = arith.constant 1.000000e+00 : f32
      %736 = vector.broadcast %cst_190 : f32 to vector<8x32xf32>
      %737 = arith.addf %736, %735 : vector<8x32xf32>
      %738 = arith.divf %736, %737 : vector<8x32xf32>
      %739 = vector.extract_strided_slice %721 {offsets = [0, 64], sizes = [8, 32], strides = [1, 1]} : vector<8x96xf32> to vector<8x32xf32>
      %740 = vector.extract_strided_slice %722 {offsets = [0, 64], sizes = [8, 32], strides = [1, 1]} : vector<8x96xf32> to vector<8x32xf32>
      %741 = arith.addf %740, %396 : vector<8x32xf32>
      %742 = arith.mulf %730, %741 : vector<8x32xf32>
      %743 = arith.addf %739, %742 : vector<8x32xf32>
      %744 = math.tanh %743 : vector<8x32xf32>
      %cst_191 = arith.constant 1.000000e+00 : f32
      %745 = vector.broadcast %cst_191 : f32 to vector<8x32xf32>
      %746 = arith.subf %745, %738 : vector<8x32xf32>
      %747 = arith.mulf %746, %744 : vector<8x32xf32>
      %748 = arith.mulf %738, %715 : vector<8x32xf32>
      %749 = arith.addf %747, %748 : vector<8x32xf32>
      %c7_i32_192 = arith.constant 7 : i32
      %750 = arith.addi %0, %c7_i32_192 : i32
      %751 = vector.broadcast %750 : i32 to vector<8x1xi32>
      %752 = arith.cmpi sgt, %4, %751 : vector<8x1xi32>
      %753 = arith.extui %752 : vector<8x1xi1> to vector<8x1xi32>
      %754 = arith.sitofp %753 : vector<8x1xi32> to vector<8x1xf32>
      %755 = vector.broadcast %754 : vector<8x1xf32> to vector<8x32xf32>
      %756 = arith.mulf %755, %749 : vector<8x32xf32>
      %cst_193 = arith.constant 1.000000e+00 : f32
      %757 = vector.broadcast %cst_193 : f32 to vector<8x1xf32>
      %758 = arith.subf %757, %754 : vector<8x1xf32>
      %759 = vector.broadcast %758 : vector<8x1xf32> to vector<8x32xf32>
      %760 = arith.mulf %759, %715 : vector<8x32xf32>
      %761 = arith.addf %756, %760 : vector<8x32xf32>
      %762 = vector.broadcast %754 : vector<8x1xf32> to vector<8x32xf32>
      %763 = arith.mulf %761, %762 : vector<8x32xf32>
      %c7_194 = arith.constant 7 : index
      %c0_195 = arith.constant 0 : index
      %c0_196 = arith.constant 0 : index
      %764 = vector.load %arg14[%c7_194, %c0_195, %c0_196] : memref<8x8x32xf32, #tpu.memory_space<vmem>>, vector<1x8x32xf32>
      %765 = vector.shape_cast %764 : vector<1x8x32xf32> to vector<8x32xf32>
      %766 = vector.shape_cast %763 : vector<8x32xf32> to vector<1x8x32xf32>
      tpu.vector_store %arg14[%c7_194, %c0_195, %c0_196], %766 {strides = array<i32>} : memref<8x8x32xf32, #tpu.memory_space<vmem>>, vector<1x8x32xf32>,
      %c1_197 = arith.constant 1 : index
      %c0_198 = arith.constant 0 : index
      %c0_199 = arith.constant 0 : index
      %767 = vector.load %arg16[%c1_197, %c0_198, %c0_199] : memref<2x8x32xf32, #tpu.memory_space<vmem>>, vector<1x8x32xf32>
      %768 = vector.shape_cast %767 : vector<1x8x32xf32> to vector<8x32xf32>
      %769 = vector.shape_cast %761 : vector<8x32xf32> to vector<1x8x32xf32>
      tpu.vector_store %arg16[%c1_197, %c0_198, %c0_199], %769 {strides = array<i32>} : memref<2x8x32xf32, #tpu.memory_space<vmem>>, vector<1x8x32xf32>,
    } else {
    }
    %true = arith.constant true
    %10 = arith.xori %7, %true : i1
    %11 = arith.extui %10 : i1 to i32
    %c0_i32_3 = arith.constant 0 : i32
    %12 = arith.cmpi ne, %11, %c0_i32_3 : i32
    scf.if %12 {
      %cst = arith.constant 0.000000e+00 : f32
      %16 = vector.broadcast %cst : f32 to vector<8x8x32xf32>
      %c0_6 = arith.constant 0 : index
      %c0_7 = arith.constant 0 : index
      %c0_8 = arith.constant 0 : index
      %17 = vector.load %arg14[%c0_6, %c0_7, %c0_8] : memref<8x8x32xf32, #tpu.memory_space<vmem>>, vector<8x8x32xf32>
      tpu.vector_store %arg14[%c0_6, %c0_7, %c0_8], %16 {strides = array<i32>} : memref<8x8x32xf32, #tpu.memory_space<vmem>>, vector<8x8x32xf32>,
    } else {
    }
    %c0_i32_4 = arith.constant 0 : i32
    %13 = arith.cmpi eq, %arg1, %c0_i32_4 : i32
    %14 = arith.extui %13 : i1 to i32
    %c0_i32_5 = arith.constant 0 : i32
    %15 = arith.cmpi ne, %14, %c0_i32_5 : i32
    scf.if %15 {
      %c0_6 = arith.constant 0 : index
      %c0_7 = arith.constant 0 : index
      %c0_8 = arith.constant 0 : index
      %16 = vector.load %arg16[%c0_6, %c0_7, %c0_8] : memref<2x8x32xf32, #tpu.memory_space<vmem>>, vector<2x8x32xf32>
      %c0_9 = arith.constant 0 : index
      %c0_10 = arith.constant 0 : index
      %c0_11 = arith.constant 0 : index
      %17 = vector.load %arg15[%c0_9, %c0_10, %c0_11] : memref<2x8x32xf32, #tpu.memory_space<vmem>>, vector<2x8x32xf32>
      tpu.vector_store %arg15[%c0_9, %c0_10, %c0_11], %16 {strides = array<i32>} : memref<2x8x32xf32, #tpu.memory_space<vmem>>, vector<2x8x32xf32>,
    } else {
    }
    return
  }
  func.func @transform_0(%arg0: i32, %arg1: i32, %arg2: memref<1xi32, #tpu.memory_space<smem>>) -> (i32, i32, i32) {
    %c0_i32 = arith.constant 0 : i32
    %c0_i32_0 = arith.constant 0 : i32
    return %arg1, %arg0, %c0_i32 : i32, i32, i32
  }
  func.func @transform_1(%arg0: i32, %arg1: i32, %arg2: memref<1xi32, #tpu.memory_space<smem>>) -> (i32, i32) {
    %c0_i32 = arith.constant 0 : i32
    %c0_i32_0 = arith.constant 0 : i32
    return %arg0, %c0_i32 : i32, i32
  }
  func.func @transform_2(%arg0: i32, %arg1: i32, %arg2: memref<1xi32, #tpu.memory_space<smem>>) -> (i32, i32, i32) {
    %c0_i32 = arith.constant 0 : i32
    %c0_i32_0 = arith.constant 0 : i32
    %c0_i32_1 = arith.constant 0 : i32
    return %c0_i32, %arg0, %c0_i32_0 : i32, i32, i32
  }
  func.func @transform_3(%arg0: i32, %arg1: i32, %arg2: memref<1xi32, #tpu.memory_space<smem>>) -> (i32, i32) {
    %c0_i32 = arith.constant 0 : i32
    %c0_i32_0 = arith.constant 0 : i32
    %c0_i32_1 = arith.constant 0 : i32
    return %c0_i32, %c0_i32_0 : i32, i32
  }
  func.func @transform_4(%arg0: i32, %arg1: i32, %arg2: memref<1xi32, #tpu.memory_space<smem>>) -> (i32, i32) {
    %c0_i32 = arith.constant 0 : i32
    %c0_i32_0 = arith.constant 0 : i32
    %c0_i32_1 = arith.constant 0 : i32
    return %c0_i32, %c0_i32_0 : i32, i32
  }
  func.func @transform_5(%arg0: i32, %arg1: i32, %arg2: memref<1xi32, #tpu.memory_space<smem>>) -> (i32, i32) {
    %c0_i32 = arith.constant 0 : i32
    %c0_i32_0 = arith.constant 0 : i32
    %c0_i32_1 = arith.constant 0 : i32
    return %c0_i32, %c0_i32_0 : i32, i32
  }
  func.func @transform_6(%arg0: i32, %arg1: i32, %arg2: memref<1xi32, #tpu.memory_space<smem>>) -> (i32, i32) {
    %c0_i32 = arith.constant 0 : i32
    %c0_i32_0 = arith.constant 0 : i32
    %c0_i32_1 = arith.constant 0 : i32
    return %c0_i32, %c0_i32_0 : i32, i32
  }
  func.func @transform_7(%arg0: i32, %arg1: i32, %arg2: memref<1xi32, #tpu.memory_space<smem>>) -> (i32, i32) {
    %c0_i32 = arith.constant 0 : i32
    %c0_i32_0 = arith.constant 0 : i32
    %c0_i32_1 = arith.constant 0 : i32
    return %c0_i32, %c0_i32_0 : i32, i32
  }
  func.func @transform_8(%arg0: i32, %arg1: i32, %arg2: memref<1xi32, #tpu.memory_space<smem>>) -> (i32, i32) {
    %c0_i32 = arith.constant 0 : i32
    %c0_i32_0 = arith.constant 0 : i32
    %c0_i32_1 = arith.constant 0 : i32
    return %c0_i32, %c0_i32_0 : i32, i32
  }
  func.func @transform_9(%arg0: i32, %arg1: i32, %arg2: memref<1xi32, #tpu.memory_space<smem>>) -> (i32, i32) {
    %c0_i32 = arith.constant 0 : i32
    %c0_i32_0 = arith.constant 0 : i32
    %c0_i32_1 = arith.constant 0 : i32
    return %c0_i32, %c0_i32_0 : i32, i32
  }
  func.func @transform_10(%arg0: i32, %arg1: i32, %arg2: memref<1xi32, #tpu.memory_space<smem>>) -> (i32, i32) {
    %c0_i32 = arith.constant 0 : i32
    %c0_i32_0 = arith.constant 0 : i32
    %c0_i32_1 = arith.constant 0 : i32
    return %c0_i32, %c0_i32_0 : i32, i32
  }
  func.func @transform_11(%arg0: i32, %arg1: i32, %arg2: memref<1xi32, #tpu.memory_space<smem>>) -> (i32, i32, i32) {
    %c0_i32 = arith.constant 0 : i32
    %c0_i32_0 = arith.constant 0 : i32
    return %arg1, %arg0, %c0_i32 : i32, i32, i32
  }
  func.func @transform_12(%arg0: i32, %arg1: i32, %arg2: memref<1xi32, #tpu.memory_space<smem>>) -> (i32, i32, i32) {
    %c0_i32 = arith.constant 0 : i32
    %c0_i32_0 = arith.constant 0 : i32
    %c0_i32_1 = arith.constant 0 : i32
    return %c0_i32, %arg0, %c0_i32_0 : i32, i32, i32
  }
}

</mosaic_0001>

<bundles_post_ra>
// kernel: tpu_custom_call.1
= control target key start
LH: loop header
LB: loop body
LE: loop exit
PB: predicated region body
PF: predicated region fallthrough
CT: control target
= control target key end

     0   :  { %20 = vsyncpa [#allocation7], 0  ;;  %s3897_s0 = inlined_call_operand.<no memory space> [shape: s32[1], index: 0, kind: input, shape index: {}]   ;;  %s3898_s1 = inlined_call_operand.hbm [shape: f32[8,8,32], index: 1, kind: input, shape index: {}]   ;;  %s3899_s2 = inlined_call_operand.vmem [shape: s32[8,1], index: 2, kind: input, shape index: {}]   ;;  %s3900_s3 = inlined_call_operand.hbm [shape: f32[2,8,32], index: 3, kind: input, shape index: {}]   ;;  %s3901_s4 = inlined_call_operand.hbm [shape: f32[32,96], index: 4, kind: input, shape index: {}]   ;;  %s3902_s5 = inlined_call_operand.hbm [shape: f32[32,96], index: 5, kind: input, shape index: {}]   ;;  %s3903_s6 = inlined_call_operand.vmem [shape: f32[1,96], index: 6, kind: input, shape index: {}]   ;;  %s3904_s7 = inlined_call_operand.vmem [shape: f32[1,32], index: 7, kind: input, shape index: {}]   ;;  %s3905_s8 = inlined_call_operand.vmem [shape: f32[32,96], index: 8, kind: input, shape index: {}]   ;;  %s3906_s9 = inlined_call_operand.hbm [shape: f32[32,96], index: 9, kind: input, shape index: {}]   ;;  %s3907_s10 = inlined_call_operand.vmem [shape: f32[1,96], index: 10, kind: input, shape index: {}]   ;;  %s3908_s11 = inlined_call_operand.vmem [shape: f32[1,32], index: 11, kind: input, shape index: {}]   ;;  %s3909_s12 = inlined_call_operand.hbm [shape: f32[8,8,32], index: 12, kind: output, shape index: {0}]   ;;  %s3910_s13 = inlined_call_operand.hbm [shape: f32[2,8,32], index: 13, kind: output, shape index: {1}]  }
   0x1   :  { %21 = vsyncpa [#allocation10], 0 }
   0x2   :  { %22 = vsyncpa [#allocation13], 0 }
   0x3   :  { %23 = vsyncpa [#allocation8], 0 }
   0x4   :  { %24 = vsyncpa [#allocation17], 0  ;;  %s3215_s25 = smov [#allocation9]   ;;  %s3216_s27 = smov [#allocation12]  }
   0x5   :  { %s44_s26 = sshll.u32 %s3215_s25, 4  ;;  %s68_s28 = sshll.u32 %s3216_s27, 4  ;;  %s45_s26 = int_to_ptr.vmem [resolvable:$true] %s44_s26  ;;  %s3302_s28 = int_to_ptr.vmem [resolvable:$true] %s68_s28 }
   0x6   :  { %s3051_s14 = scalar_lea.hbm %s3900_s3, 256 }
   0x7   :  { %p3052_p0 = scmp.ne.s32.totalorder %s3900_s3, %s3051_s14  ;;  %p3055_p1 = scmp.lt.u32.totalorder %s3051_s14, %s3900_s3 }
   0x9   :  { %p3057_p2 = pnand %p3055_p1, %p3052_p0 }
   0xb   :  { %3060 = shalt.err (!%p3057_p2)
}
   0xc   :  { %s3061_s19 = scalar_lea.vmem %s45_s26, 256  ;;  %p3066_p4 = scmp.lt.s32.totalorder %s45_s26, %s45_s26 }
   0xd   :  { %p3062_p3 = scmp.ne.s32.totalorder %s45_s26, %s3061_s19  ;;  %p3067_p5 = scmp.lt.s32.totalorder %s3061_s19, %s3061_s19 }
   0xf   :  { %p3068_p6 = por %p3067_p5, %p3066_p4 }
  0x11   :  { %p3069_p7 = pnand %p3068_p6, %p3062_p3 }
  0x13   :  { %3072 = shalt.err (!%p3069_p7)
}
  0x14   :  { %s3217_s20 = smov 128   ;;  %s3218_s21 = smov 8  }
  0x15   :  { %50 = dma.hbm_to_vmem [thread:$0]  %s3900_s3, 256, %s45_s26, [#allocation10], %s3217_s20, %s3217_s20, %s3218_s21  }
  0x16   :  { %s3073_s27 = scalar_lea.hbm %s3902_s5, 512 }
  0x17   :  { %p3074_p8 = scmp.ne.s32.totalorder %s3902_s5, %s3073_s27  ;;  %p3077_p9 = scmp.lt.u32.totalorder %s3073_s27, %s3902_s5 }
  0x19   :  { %p3079_p10 = pnand %p3077_p9, %p3074_p8 }
  0x1b   :  { %3082 = shalt.err (!%p3079_p10)
}
  0x1c   :  { %s3083_s16 = scalar_lea.vmem %s3302_s28, 512  ;;  %p3088_p12 = scmp.lt.s32.totalorder %s3302_s28, %s3302_s28 }
  0x1d   :  { %p3084_p11 = scmp.ne.s32.totalorder %s3302_s28, %s3083_s16  ;;  %p3089_p13 = scmp.lt.s32.totalorder %s3083_s16, %s3083_s16 }
  0x1f   :  { %p3090_p0 = por %p3089_p13, %p3088_p12 }
  0x21   :  { %p3091_p1 = pnand %p3090_p0, %p3084_p11 }
  0x23   :  { %3094 = shalt.err (!%p3091_p1)
}
  0x24   :  { %74 = dma.hbm_to_vmem [thread:$0]  %s3902_s5, 512, %s3302_s28, [#allocation13], %s3217_s20, %s3217_s20, %s3218_s21  }
  0x25   :  { %s3219_s17 = smov [#allocation6]   ;;  %s3220_s19 = smov [#allocation11]  }
  0x26   :  { %s30_s18 = sshll.u32 %s3219_s17, 4  ;;  %s56_s22 = sshll.u32 %s3220_s19, 4  ;;  %s31_s18 = int_to_ptr.vmem [resolvable:$true] %s30_s18  ;;  %s3339_s22 = int_to_ptr.vmem [resolvable:$true] %s56_s22 }
  0x27   :  { %s3095_s25 = scalar_lea.hbm %s3898_s1, 1024 }
  0x28   :  { %p3096_p2 = scmp.ne.s32.totalorder %s3898_s1, %s3095_s25  ;;  %p3099_p3 = scmp.lt.u32.totalorder %s3095_s25, %s3898_s1 }
  0x2a   :  { %p3101_p4 = pnand %p3099_p3, %p3096_p2 }
  0x2c   :  { %3104 = shalt.err (!%p3101_p4)
}
  0x2d   :  { %s3105_s5 = scalar_lea.vmem %s31_s18, 1024  ;;  %p3110_p6 = scmp.lt.s32.totalorder %s31_s18, %s31_s18 }
  0x2e   :  { %p3106_p5 = scmp.ne.s32.totalorder %s31_s18, %s3105_s5  ;;  %p3111_p7 = scmp.lt.s32.totalorder %s3105_s5, %s3105_s5 }
  0x30   :  { %p3112_p8 = por %p3111_p7, %p3110_p6 }
  0x32   :  { %p3113_p9 = pnand %p3112_p8, %p3106_p5 }
  0x34   :  { %3116 = shalt.err (!%p3113_p9)
}
  0x35   :  { %36 = dma.hbm_to_vmem [thread:$0]  %s3898_s1, 1024, %s31_s18, [#allocation7], %s3217_s20, %s3217_s20, %s3218_s21  }
  0x36   :  { %s3117_s26 = scalar_lea.hbm %s3901_s4, 512 }
  0x37   :  { %p3118_p10 = scmp.ne.s32.totalorder %s3901_s4, %s3117_s26  ;;  %p3121_p11 = scmp.lt.u32.totalorder %s3117_s26, %s3901_s4 }
  0x39   :  { %p3123_p12 = pnand %p3121_p11, %p3118_p10 }
  0x3b   :  { %3126 = shalt.err (!%p3123_p12)
}
  0x3c   :  { %s3127_s25 = scalar_lea.vmem %s3339_s22, 512  ;;  %p3132_p0 = scmp.lt.s32.totalorder %s3339_s22, %s3339_s22 }
  0x3d   :  { %p3128_p13 = scmp.ne.s32.totalorder %s3339_s22, %s3127_s25  ;;  %p3133_p1 = scmp.lt.s32.totalorder %s3127_s25, %s3127_s25 }
  0x3f   :  { %p3134_p2 = por %p3133_p1, %p3132_p0 }
  0x41   :  { %p3135_p3 = pnand %p3134_p2, %p3128_p13 }
  0x43   :  { %3138 = shalt.err (!%p3135_p3)
}
  0x44   :  { %62 = dma.hbm_to_vmem [thread:$0]  %s3901_s4, 512, %s3339_s22, [#allocation10], %s3217_s20, %s3217_s20, %s3218_s21  }
  0x45   :  { %s3221_s27 = smov [#allocation14]   ;;  %s3139_s5 = scalar_lea.hbm %s3906_s9, 512 }
  0x46   :  { %s86_s29 = sshll.u32 %s3221_s27, 4  ;;  %p3140_p4 = scmp.ne.s32.totalorder %s3906_s9, %s3139_s5  ;;  %s87_s29 = int_to_ptr.vmem [resolvable:$true] %s86_s29 }
  0x47   :  { %p3143_p5 = scmp.lt.u32.totalorder %s3139_s5, %s3906_s9 }
  0x49   :  { %p3145_p6 = pnand %p3143_p5, %p3140_p4 }
  0x4b   :  { %3148 = shalt.err (!%p3145_p6)
}
  0x4c   :  { %s3149_s26 = scalar_lea.vmem %s87_s29, 512  ;;  %p3154_p8 = scmp.lt.s32.totalorder %s87_s29, %s87_s29 }
  0x4d   :  { %p3150_p7 = scmp.ne.s32.totalorder %s87_s29, %s3149_s26  ;;  %p3155_p9 = scmp.lt.s32.totalorder %s3149_s26, %s3149_s26 }
  0x4f   :  { %p3156_p10 = por %p3155_p9, %p3154_p8 }
  0x51   :  { %p3157_p11 = pnand %p3156_p10, %p3150_p7 }
  0x53   :  { %3160 = shalt.err (!%p3157_p11)
}
  0x54   :  { %92 = dma.hbm_to_vmem [thread:$0]  %s3906_s9, 512, %s87_s29, [#allocation13], %s3217_s20, %s3217_s20, %s3218_s21  }
  0x55   :  { %3205 = dma.done.wait [#allocation7], 1024  }
  0x56   :  { %3206 = vsyncadd [#allocation7], 4294966272 }
  0x57   :  { %3207 = dma.done.wait [#allocation10], 768  }
  0x58   :  { %3208 = vsyncadd [#allocation10], 4294966528 }
  0x59   :  { %3209 = dma.done.wait [#allocation13], 1024  }
  0x5a   :  { %3210 = vsyncadd [#allocation13], 4294966272  ;;  %vm119_vm0 = vcmask 261120   ;;  %v3394_v0 = vld [vmem:[%s3899_s2] sm:$0xff]  ;;  %v117_v1 = vld [vmem:[#allocation9] sm:$0xff]  ;;  %p2441_p12 = scmp.le.s32.totalorder %s3897_s0, 0 }
  0x5b   :  { %v118_v2 = vld [vmem:[#allocation9 + $0x8] sm:$0xff]  ;;  %120 = vst.msk [vmem:[#allocation2] sm:$0xff] %vm119_vm0, %v117_v1  ;;  %v128_v3 = vld [vmem:[#allocation11] sm:$0xff] (!%p2441_p12)  ;;  %v129_v4 = vld [vmem:[#allocation11 + $0x8] sm:$0xff] (!%p2441_p12)  ;;  %v3222_v6 = vmov (!%p2441_p12), 0.0|0.0   ;;  %vm3223_vm1 = vmmov (!%p2441_p12), 0  }
  0x5c   :  { %121 = vst.msk [vmem:[#allocation2 + $0x8] sm:$0xff] %vm119_vm0, %v118_v2  ;;  %127 = sbr.rel (%p2441_p12) target bundleno = 10572 (0x294c), region = 73  ;;  %v132_v5 = vld [vmem:[#allocation12] sm:$0xff] (!%p2441_p12)  ;;  %2832 = vmatprep.subr.bf16.mxu1 (!%p2441_p12), %v3222_v6  ;;  %v2824_v7 = vpack.c.bf16 (!%p2441_p12), %v129_v4, %v128_v3  ;;  %v133_v8 = vld [vmem:[#allocation12 + $0x8] sm:$0xff] (!%p2441_p12)  ;;  %v130_v9 = vld [vmem:[#allocation11 + $0x10] sm:$0xff] (!%p2441_p12)  ;;  %v3224_v11 = vmov (!%p2441_p12), 0.0  }
  0x5d   :  { %v131_v10 = vld [vmem:[#allocation11 + $0x18] sm:$0xff] (!%p2441_p12)  ;;  %2636 = vmatprep.mubr.msk.f32.mxu1 (!%p2441_p12), %vm3223_vm1, %v3224_v11  ;;  %v3404_v12 = vpack.c.bf16 (!%p2441_p12), %v133_v8, %v132_v5  ;;  %v134_v14 = vld [vmem:[#allocation12 + $0x10] sm:$0xff] (!%p2441_p12)  ;;  %v2451_v17 = vld [vmem:[%s3904_s7] ss:$0 sm:$0xff] (!%p2441_p12)  ;;  %s3225_s25 = smov (!%p2441_p12), 64   ;;  %v3226_v21 = vmov (!%p2441_p12), 0  }
  0x5e   :  { %v2828_v13 = vpack.c.bf16 (!%p2441_p12), %v131_v10, %v130_v9  ;;  %v135_v15 = vld [vmem:[#allocation12 + $0x18] sm:$0xff] (!%p2441_p12)  ;;  %v138_v16 = vld [vmem:[#allocation6] sm:$0xff] (!%p2441_p12)  ;;  %2825 = vmatprep.subr.bf16.mxu0 (!%p2441_p12), %v2824_v7  ;;  %378 = vrot.lane.b32.xlu0 (!%p2441_p12), %v2451_v17, %s3225_s25  ;;  %v3435_v23 = vld [vmem:[%s3903_s6] ss:$0 sm:$0xff] (!%p2441_p12)  ;;  %vm282_vm2 = vcmask (!%p2441_p12), 785408   ;;  %vm405_vm3 = vcmp.gt.s32.totalorder (!%p2441_p12), %v3394_v0, 0 }
  0x5f   :  { %2616 = vmatprep.mubr.msk.f32.mxu0 (!%p2441_p12), %vm119_vm0, %v138_v16  ;;  %2834 = vmatpush3.bf16.msra.mxu1 (!%p2441_p12), %v3404_v12  ;;  %v3411_v18 = vpack.c.bf16 (!%p2441_p12), %v135_v15, %v134_v14  ;;  %v139_v20 = vld [vmem:[#allocation6 + $0x8] sm:$0xff] (!%p2441_p12)  ;;  %v2454_v31 = vsel (!%p2441_p12), %vm405_vm3, 1.0, %v3224_v11  ;;  %s3227_s6 = smov (!%p2441_p12), 96   ;;  %s3228_s18 = smov (!%p2441_p12), 32   ;;  %vm533_vm4 = vcmp.gt.s32.totalorder (!%p2441_p12), %v3394_v0, 1  ;;  %v140_v10 = vld [vmem:[#allocation6 + $0x10] sm:$0xff] (!%p2441_p12) }
  0x60   :  { %2827 = vmatpush3.bf16.msra.mxu0 (!%p2441_p12), %v2824_v7  ;;  %2835 = vmatprep.subr.bf16.mxu1 (!%p2441_p12), %v3222_v6  ;;  %v414_v40 = vsub.f32 (!%p2441_p12), 1.0, %v2454_v31  ;;  %v2457_v60 = vsel (!%p2441_p12), %vm533_vm4, 1.0, %v3224_v11  ;;  %v142_v14 = vld [vmem:[#allocation6 + $0x20] sm:$0xff] (!%p2441_p12)  ;;  %v143_v15 = vld [vmem:[#allocation6 + $0x28] sm:$0xff] (!%p2441_p12)  ;;  %v144_v17 = vld [vmem:[#allocation6 + $0x30] sm:$0xff] (!%p2441_p12)  ;;  %vm658_vm5 = vcmp.gt.s32.totalorder (!%p2441_p12), %v3394_v0, 2 }
  0x61   :  { %2829 = vmatprep.subr.bf16.mxu0 (!%p2441_p12), %v2828_v13  ;;  %2953 = vset.pattern.permute.xlu1 (!%p2441_p12), %v3226_v21  ;;  %v542_v7 = vsub.f32 (!%p2441_p12), 1.0, %v2457_v60  ;;  %vm783_vm6 = vcmp.gt.s32.totalorder (!%p2441_p12), %v3394_v0, 3  ;;  %vm908_vm7 = vcmp.gt.s32.totalorder (!%p2441_p12), %v3394_v0, 4  ;;  %vm1033_vm8 = vcmp.gt.s32.totalorder (!%p2441_p12), %v3394_v0, 5 }
  0x62   :  { %v296_v19 = vld [vmem:[#allocation2] sm:$0xff] (!%p2441_p12)  ;;  %2954 = vset.pattern.permute.xlu0 (!%p2441_p12), %v3226_v21  ;;  %vm1158_vm9 = vcmp.gt.s32.totalorder (!%p2441_p12), %v3394_v0, 6  ;;  %vm1283_vm10 = vcmp.gt.s32.totalorder (!%p2441_p12), %v3394_v0, 7 }
  0x63   :  { %2837 = vmatpush3.bf16.msra.mxu1 %v3411_v18 }
  0x64   :  { %2831 = vmatpush3.bf16.msra.mxu0 %v2828_v13  ;;  %2838 = vmatprep.subr.bf16.mxu1 %v3222_v6  ;;  %v141_v13 = vld [vmem:[#allocation6 + $0x18] sm:$0xff] }
  0x65   :  { %2844 = vmatprep.subr.bf16.mxu0 %v3222_v6 }
  0x66   :  { %2637 = vmatmul.mubr.msk.f32.vlgmr.msra.gmra.mrb[0].mxu1 %vm119_vm0, %v296_v19 }
  0x67   :  { %2617 = vmatmul.mubr.msk.f32.vlgmr.msra.gmra.mrb[0].mxu0 %vm119_vm0, %v139_v20  ;;  %2840 = vmatpush3.bf16.msra.mxu1 %v3404_v12 }
  0x68   :  { %2647 = vmatprep.mubr.msk.f32.mxu1 %vm3223_vm1, %v3224_v11  ;;  %2841 = vmatprep.subr.bf16.mxu1 %v3222_v6 }
  0x69   :  { %2846 = vmatpush3.bf16.msra.mxu0 %v3404_v12  ;;  %2619 = vmatprep.mubr.msk.f32.mxu0 %vm119_vm0, %v140_v10 }
  0x6a   :  { %2847 = vmatprep.subr.bf16.mxu0 %v3222_v6 }
  0x6b   :  { %2843 = vmatpush3.bf16.msra.mxu1 %v3411_v18  ;;  %2620 = vmatmul.mubr.msk.f32.gmra.mrb[2].mxu0 %vm119_vm0, %v141_v13 }
  0x6c   :  { %2850 = vmatprep.subr.bf16.mxu1 %v3222_v6  ;;  %2622 = vmatprep.mubr.msk.f32.mxu0 %vm119_vm0, %v142_v14 }
  0x6d   :  { %2849 = vmatpush3.bf16.msra.mxu0 %v3411_v18 }
  0x6e   :  { %2856 = vmatprep.subr.bf16.mxu0 %v3222_v6 }
  0x6f   :  { %2623 = vmatmul.mubr.msk.f32.gmra.mrb[4].mxu0 %vm119_vm0, %v143_v15 }
  0x70   :  { %2625 = vmatprep.mubr.msk.f32.mxu0 %vm119_vm0, %v144_v17 }
  0xd0   :  { %v3430_v22 = vpop.permute.xlu0 %378 }
 0x139   :  { %v367_v24 = vpop.f32.mrb[0].mxu1 }
 0x13a   :  { %v2618_v25 = vpop.f32.mrb[0].mxu0  ;;  %v381_v26 = vadd.f32 %v3430_v22, %v367_v24  ;;  %v2638_v28 = vpop.f32.mrb[1].mxu1 }
 0x13b   :  { %v249_v27 = vadd.f32 %v2618_v25, %v3435_v23  ;;  %v243_v29 = vpop.f32.mrb[1].mxu0 }
 0x13c   :  { %v244_v30 = vadd.f32 %v3435_v23, %v243_v29  ;;  %383 = vrot.lane.b32.xlu0 %v381_v26, %s3225_s25 }
 0x13d   :  { %284 = vst.msk [vmem:[#allocation3 + $0x8] sm:$0xff] %vm282_vm2, %v249_v27 }
 0x13e   :  { %283 = vst.msk [vmem:[#allocation3] sm:$0xff] %vm282_vm2, %v244_v30 }
 0x140   :  { %410 = vperm.xlu0 %2954, %v2454_v31  }
 0x144   :  { %v431_v61 = vld [vmem:[#allocation3 + $0x8] sm:$0xff] }
 0x145   :  { %v297_v32 = vld [vmem:[#allocation3] sm:$0xff] }
 0x146   :  { %v371_v33 = vadd.f32 %v367_v24, %v297_v32 }
 0x148   :  { %v2453_v34 = vmul.f32 -1.442695, %v371_v33 }
 0x14a   :  { %2955 = vpow2.f32 %v2453_v34 }
 0x154   :  { %v2956_v35 = vpop.eup %2955 }
 0x155   :  { %v375_v36 = vadd.f32 1.0, %v2956_v35 }
 0x157   :  { %2957 = vrcp.f32 %v375_v36 }
 0x161   :  { %v2958_v37 = vpop.eup %2957 }
 0x162   :  { %v393_v48 = vsub.f32 1.0, %v2958_v37 }
 0x1ae   :  { %v384_v38 = vpop.permute.xlu0 %383 }
 0x1af   :  { %v386_v39 = vmul.f32 %v2958_v37, %v384_v38 }
 0x1b1   :  { %388 = vrot.lane.b32.xlu1 %v386_v39, %s3225_s25 }
 0x1b5   :  { %417 = vperm.xlu1 %2953, %v414_v40  }
 0x1bf   :  { %v3452_v47 = vpop.permute.xlu0 %410 }
 0x223   :  { %v389_v41 = vpop.permute.xlu1 %388 }
 0x224   :  { %v391_v42 = vadd.f32 %v389_v41, %v297_v32  ;;  %v2621_v32 = vpop.f32.mrb[2].mxu0 }
 0x225   :  { %v259_v33 = vadd.f32 %v2621_v32, %v3435_v23  ;;  %v253_v34 = vpop.f32.mrb[3].mxu0 }
 0x226   :  { %2959 = vtanh.f32 %v391_v42  ;;  %v254_v35 = vadd.f32 %v3435_v23, %v253_v34  ;;  %v2624_v36 = vpop.f32.mrb[4].mxu0 }
 0x227   :  { %286 = vst.msk [vmem:[#allocation3 + $0x18] sm:$0xff] %vm282_vm2, %v259_v33  ;;  %v263_v38 = vpop.f32.mrb[5].mxu0 }
 0x228   :  { %285 = vst.msk [vmem:[#allocation3 + $0x10] sm:$0xff] %vm282_vm2, %v254_v35  ;;  %v264_v39 = vadd.f32 %v3435_v23, %v263_v38 }
 0x22a   :  { %287 = vst.msk [vmem:[#allocation3 + $0x20] sm:$0xff] %vm282_vm2, %v264_v39 }
 0x22e   :  { %v681_v17 = vld [vmem:[#allocation3 + $0x18] sm:$0xff] }
 0x230   :  { %v2960_v43 = vpop.eup %2959 }
 0x231   :  { %395 = vrot.lane.b32.xlu1 %v2960_v43, %s3227_s6 }
 0x234   :  { %v3447_v44 = vpop.permute.xlu1 %417 }
 0x235   :  { %399 = vrot.lane.b32.xlu1 %v296_v19, %s3228_s18  ;;  %v420_v45 = vmul.f32 %v3447_v44, %v296_v19  ;;  %v145_v19 = vld [vmem:[#allocation6 + $0x38] sm:$0xff] }
 0x236   :  { %2626 = vmatmul.mubr.msk.f32.gmra.mrb[6].mxu0 %vm119_vm0, %v145_v19 }
 0x237   :  { %422 = vrot.lane.b32.xlu0 %v420_v45, %s3228_s18  ;;  %2658 = vmatprep.mubr.msk.f32.mxu0 %vm3223_vm1, %v3224_v11 }
 0x2a3   :  { %v396_v46 = vpop.permute.xlu1 %395 }
 0x2a4   :  { %v398_v50 = vmul.f32 %v396_v46, %v393_v48 }
 0x2a7   :  { %v400_v49 = vpop.permute.xlu1 %399 }
 0x2a8   :  { %v402_v51 = vmul.f32 %v2958_v37, %v400_v49  ;;  %v269_v37 = vadd.f32 %v2624_v36, %v3435_v23  ;;  %v2460_v49 = vsel %vm658_vm5, 1.0, %v3224_v11 }
 0x2a9   :  { %v423_v53 = vpop.permute.xlu0 %422 }
 0x2aa   :  { %v403_v52 = vadd.f32 %v402_v51, %v398_v50  ;;  %288 = vst.msk [vmem:[#allocation3 + $0x28] sm:$0xff] %vm282_vm2, %v269_v37  ;;  %v556_v50 = vld [vmem:[#allocation3 + $0x10] sm:$0xff] }
 0x2ac   :  { %v413_v54 = vmul.f32 %v3452_v47, %v403_v52 }
 0x2ae   :  { %v425_v55 = vadd.f32 %v423_v53, %v413_v54 }
 0x2b0   :  { %427 = vrot.lane.b32.xlu1 %v425_v55, %s3227_s6 }
 0x309   :  { %v2627_v40 = vpop.f32.mrb[6].mxu0 }
 0x30a   :  { %v279_v41 = vadd.f32 %v2627_v40, %v3435_v23  ;;  %v273_v42 = vpop.f32.mrb[7].mxu0 }
 0x30b   :  { %v274_v43 = vadd.f32 %v3435_v23, %v273_v42 }
 0x30c   :  { %290 = vst.msk [vmem:[#allocation3 + $0x38] sm:$0xff] %vm282_vm2, %v279_v41 }
 0x30d   :  { %289 = vst.msk [vmem:[#allocation3 + $0x30] sm:$0xff] %vm282_vm2, %v274_v43 }
 0x322   :  { %v428_v56 = vpop.permute.xlu1 %427 }
 0x323   :  { %430 = vst.msk [vmem:[#allocation15] sm:$0xff] %vm119_vm0, %v428_v56  ;;  %2648 = vmatmul.mubr.msk.f32.vlgmr.msra.gmra.mrb[2].mxu1 %vm119_vm0, %v428_v56 }
 0x324   :  { %2852 = vmatpush3.bf16.msra.mxu1 %v3404_v12  ;;  %2669 = vmatprep.mubr.msk.f32.mxu1 %vm3223_vm1, %v3224_v11 }
 0x325   :  { %2853 = vmatprep.subr.bf16.mxu1 %v3222_v6 }
 0x328   :  { %2855 = vmatpush3.bf16.msra.mxu1 %v3411_v18 }
 0x329   :  { %2862 = vmatprep.subr.bf16.mxu1 %v3222_v6 }
 0x3f6   :  { %v500_v57 = vpop.f32.mrb[2].mxu1 }
 0x3f7   :  { %v511_v58 = vadd.f32 %v500_v57, %v3430_v22  ;;  %v2649_v59 = vpop.f32.mrb[3].mxu1  ;;  %v504_v62 = vadd.f32 %v500_v57, %v431_v61 }
 0x3f9   :  { %513 = vrot.lane.b32.xlu0 %v511_v58, %s3225_s25  ;;  %v2456_v63 = vmul.f32 -1.442695, %v504_v62  ;;  %v667_v58 = vsub.f32 1.0, %v2460_v49 }
 0x3fb   :  { %2961 = vpow2.f32 %v2456_v63 }
 0x3fd   :  { %538 = vperm.xlu0 %2954, %v2457_v60  }
 0x405   :  { %v2962_v1 = vpop.eup %2961 }
 0x406   :  { %v508_v2 = vadd.f32 1.0, %v2962_v1 }
 0x408   :  { %2963 = vrcp.f32 %v508_v2 }
 0x412   :  { %v2964_v3 = vpop.eup %2963 }
 0x413   :  { %v523_v21 = vsub.f32 1.0, %v2964_v3  ;;  %v529_v25 = vmul.f32 %v2964_v3, %v425_v55 }
 0x46b   :  { %v514_v4 = vpop.permute.xlu0 %513 }
 0x46c   :  { %v516_v5 = vmul.f32 %v2964_v3, %v514_v4 }
 0x46e   :  { %518 = vrot.lane.b32.xlu1 %v516_v5, %s3225_s25 }
 0x472   :  { %545 = vperm.xlu1 %2953, %v542_v7  }
 0x47c   :  { %v3478_v20 = vpop.permute.xlu0 %538 }
 0x4e0   :  { %v519_v8 = vpop.permute.xlu1 %518 }
 0x4e1   :  { %v521_v9 = vadd.f32 %v519_v8, %v431_v61 }
 0x4e3   :  { %2965 = vtanh.f32 %v521_v9 }
 0x4ed   :  { %v2966_v16 = vpop.eup %2965 }
 0x4ee   :  { %525 = vrot.lane.b32.xlu0 %v2966_v16, %s3227_s6  ;;  %v2463_v16 = vsel %vm783_vm6, 1.0, %v3224_v11 }
 0x4f1   :  { %v3480_v27 = vpop.permute.xlu1 %545 }
 0x4f2   :  { %v548_v29 = vmul.f32 %v3480_v27, %v425_v55 }
 0x560   :  { %v526_v24 = vpop.permute.xlu0 %525 }
 0x561   :  { %v528_v26 = vmul.f32 %v526_v24, %v523_v21 }
 0x563   :  { %v530_v28 = vadd.f32 %v529_v25, %v528_v26 }
 0x565   :  { %v541_v30 = vmul.f32 %v3478_v20, %v530_v28 }
 0x567   :  { %v549_v31 = vadd.f32 %v548_v29, %v541_v30  ;;  %v792_v30 = vsub.f32 1.0, %v2463_v16 }
 0x569   :  { %551 = vrot.lane.b32.xlu1 %v549_v31, %s3227_s6 }
 0x5db   :  { %v552_v45 = vpop.permute.xlu1 %551 }
 0x5dc   :  { %555 = vst.msk [vmem:[#allocation15 + $0x8] sm:$0xff] %vm119_vm0, %v552_v45  ;;  %2659 = vmatmul.mubr.msk.f32.vlgmr.msra.gmra.mrb[8].mxu0 %vm119_vm0, %v552_v45 }
 0x5dd   :  { %2858 = vmatpush3.bf16.msra.mxu0 %v3404_v12  ;;  %2680 = vmatprep.mubr.msk.f32.mxu0 %vm3223_vm1, %v3224_v11 }
 0x5de   :  { %2859 = vmatprep.subr.bf16.mxu0 %v3222_v6 }
 0x5e1   :  { %2861 = vmatpush3.bf16.msra.mxu0 %v3411_v18 }
 0x5e2   :  { %2868 = vmatprep.subr.bf16.mxu0 %v3222_v6 }
 0x6af   :  { %v625_v23 = vpop.f32.mrb[8].mxu0 }
 0x6b0   :  { %v636_v46 = vadd.f32 %v625_v23, %v3430_v22  ;;  %v2660_v48 = vpop.f32.mrb[9].mxu0  ;;  %v629_v51 = vadd.f32 %v625_v23, %v556_v50 }
 0x6b2   :  { %638 = vrot.lane.b32.xlu0 %v636_v46, %s3225_s25  ;;  %v2459_v52 = vmul.f32 -1.442695, %v629_v51 }
 0x6b4   :  { %2967 = vpow2.f32 %v2459_v52 }
 0x6b6   :  { %663 = vperm.xlu0 %2954, %v2460_v49   ;;  %v2466_v49 = vsel %vm908_vm7, 1.0, %v3224_v11 }
 0x6be   :  { %v2968_v53 = vpop.eup %2967 }
 0x6bf   :  { %v633_v54 = vadd.f32 1.0, %v2968_v53 }
 0x6c1   :  { %2969 = vrcp.f32 %v633_v54 }
 0x6cb   :  { %v2970_v55 = vpop.eup %2969 }
 0x6cc   :  { %v648_v63 = vsub.f32 1.0, %v2970_v55  ;;  %v654_v2 = vmul.f32 %v2970_v55, %v549_v31 }
 0x724   :  { %v639_v56 = vpop.permute.xlu0 %638 }
 0x725   :  { %v641_v57 = vmul.f32 %v2970_v55, %v639_v56 }
 0x727   :  { %643 = vrot.lane.b32.xlu1 %v641_v57, %s3225_s25 }
 0x72b   :  { %670 = vperm.xlu1 %2953, %v667_v58   ;;  %v917_v58 = vsub.f32 1.0, %v2466_v49 }
 0x735   :  { %v3511_v62 = vpop.permute.xlu0 %663 }
 0x799   :  { %v644_v59 = vpop.permute.xlu1 %643 }
 0x79a   :  { %v646_v60 = vadd.f32 %v644_v59, %v556_v50  ;;  %v806_v50 = vld [vmem:[#allocation3 + $0x20] sm:$0xff] }
 0x79c   :  { %2971 = vtanh.f32 %v646_v60 }
 0x7a6   :  { %v2972_v61 = vpop.eup %2971 }
 0x7a7   :  { %650 = vrot.lane.b32.xlu0 %v2972_v61, %s3227_s6 }
 0x7aa   :  { %v3513_v4 = vpop.permute.xlu1 %670 }
 0x7ab   :  { %v673_v7 = vmul.f32 %v3513_v4, %v549_v31 }
 0x819   :  { %v651_v1 = vpop.permute.xlu0 %650 }
 0x81a   :  { %v653_v3 = vmul.f32 %v651_v1, %v648_v63 }
 0x81c   :  { %v655_v5 = vadd.f32 %v654_v2, %v653_v3 }
 0x81e   :  { %v666_v8 = vmul.f32 %v3511_v62, %v655_v5 }
 0x820   :  { %v674_v9 = vadd.f32 %v673_v7, %v666_v8 }
 0x822   :  { %676 = vrot.lane.b32.xlu1 %v674_v9, %s3227_s6 }
 0x894   :  { %v677_v10 = vpop.permute.xlu1 %676 }
 0x895   :  { %680 = vst.msk [vmem:[#allocation15 + $0x10] sm:$0xff] %vm119_vm0, %v677_v10  ;;  %2670 = vmatmul.mubr.msk.f32.vlgmr.msra.gmra.mrb[4].mxu1 %vm119_vm0, %v677_v10 }
 0x896   :  { %2864 = vmatpush3.bf16.msra.mxu1 %v3404_v12  ;;  %2691 = vmatprep.mubr.msk.f32.mxu1 %vm3223_vm1, %v3224_v11 }
 0x897   :  { %2865 = vmatprep.subr.bf16.mxu1 %v3222_v6 }
 0x89a   :  { %2867 = vmatpush3.bf16.msra.mxu1 %v3411_v18 }
 0x89b   :  { %2874 = vmatprep.subr.bf16.mxu1 %v3222_v6 }
 0x968   :  { %v750_v13 = vpop.f32.mrb[4].mxu1 }
 0x969   :  { %v761_v14 = vadd.f32 %v750_v13, %v3430_v22  ;;  %v2671_v15 = vpop.f32.mrb[5].mxu1  ;;  %v754_v19 = vadd.f32 %v750_v13, %v681_v17 }
 0x96b   :  { %763 = vrot.lane.b32.xlu0 %v761_v14, %s3225_s25  ;;  %v2462_v21 = vmul.f32 -1.442695, %v754_v19  ;;  %v2469_v19 = vsel %vm1033_vm8, 1.0, %v3224_v11 }
 0x96d   :  { %2973 = vpow2.f32 %v2462_v21 }
 0x96f   :  { %788 = vperm.xlu0 %2954, %v2463_v16  }
 0x977   :  { %v2974_v24 = vpop.eup %2973 }
 0x978   :  { %v758_v25 = vadd.f32 1.0, %v2974_v24 }
 0x97a   :  { %2975 = vrcp.f32 %v758_v25 }
 0x984   :  { %v2976_v26 = vpop.eup %2975 }
 0x985   :  { %v773_v35 = vsub.f32 1.0, %v2976_v26  ;;  %v779_v37 = vmul.f32 %v2976_v26, %v674_v9 }
 0x9dd   :  { %v764_v28 = vpop.permute.xlu0 %763 }
 0x9de   :  { %v766_v29 = vmul.f32 %v2976_v26, %v764_v28 }
 0x9e0   :  { %768 = vrot.lane.b32.xlu1 %v766_v29, %s3225_s25 }
 0x9e4   :  { %795 = vperm.xlu1 %2953, %v792_v30   ;;  %v1042_v30 = vsub.f32 1.0, %v2469_v19 }
 0x9ee   :  { %v3532_v34 = vpop.permute.xlu0 %788 }
 0xa52   :  { %v769_v31 = vpop.permute.xlu1 %768 }
 0xa53   :  { %v771_v32 = vadd.f32 %v769_v31, %v681_v17 }
 0xa55   :  { %2977 = vtanh.f32 %v771_v32 }
 0xa5f   :  { %v2978_v33 = vpop.eup %2977 }
 0xa60   :  { %775 = vrot.lane.b32.xlu0 %v2978_v33, %s3227_s6  ;;  %v1307_v33 = vld [vmem:[%s3905_s8] sm:$0xff] }
 0xa63   :  { %v3534_v39 = vpop.permute.xlu1 %795 }
 0xa64   :  { %v798_v41 = vmul.f32 %v3534_v39, %v674_v9 }
 0xad2   :  { %v776_v36 = vpop.permute.xlu0 %775 }
 0xad3   :  { %v778_v38 = vmul.f32 %v776_v36, %v773_v35  ;;  %v1308_v35 = vld [vmem:[%s3905_s8 + $0x8] sm:$0xff] }
 0xad4   :  { %v2880_v36 = vpack.c.bf16 %v1308_v35, %v1307_v33 }
 0xad5   :  { %v780_v40 = vadd.f32 %v779_v37, %v778_v38 }
 0xad7   :  { %v791_v42 = vmul.f32 %v3532_v34, %v780_v40 }
 0xad9   :  { %v799_v43 = vadd.f32 %v798_v41, %v791_v42 }
 0xadb   :  { %801 = vrot.lane.b32.xlu1 %v799_v43, %s3227_s6 }
 0xb4d   :  { %v802_v45 = vpop.permute.xlu1 %801 }
 0xb4e   :  { %805 = vst.msk [vmem:[#allocation15 + $0x18] sm:$0xff] %vm119_vm0, %v802_v45  ;;  %2681 = vmatmul.mubr.msk.f32.vlgmr.msra.gmra.mrb[10].mxu0 %vm119_vm0, %v802_v45 }
 0xb4f   :  { %2870 = vmatpush3.bf16.msra.mxu0 %v3404_v12  ;;  %2702 = vmatprep.mubr.msk.f32.mxu0 %vm3223_vm1, %v3224_v11 }
 0xb50   :  { %2871 = vmatprep.subr.bf16.mxu0 %v3222_v6 }
 0xb53   :  { %2873 = vmatpush3.bf16.msra.mxu0 %v3411_v18 }
 0xb54   :  { %2881 = vmatprep.subr.bf16.mxu0 %v2880_v36 }
 0xc21   :  { %v875_v23 = vpop.f32.mrb[10].mxu0 }
 0xc22   :  { %v886_v46 = vadd.f32 %v875_v23, %v3430_v22  ;;  %v2682_v48 = vpop.f32.mrb[11].mxu0  ;;  %v879_v51 = vadd.f32 %v875_v23, %v806_v50 }
 0xc24   :  { %888 = vrot.lane.b32.xlu0 %v886_v46, %s3225_s25  ;;  %v2465_v52 = vmul.f32 -1.442695, %v879_v51  ;;  %v1310_v51 = vld [vmem:[%s3905_s8 + $0x18] sm:$0xff] }
 0xc26   :  { %2979 = vpow2.f32 %v2465_v52 }
 0xc28   :  { %913 = vperm.xlu0 %2954, %v2466_v49  }
 0xc30   :  { %v2980_v53 = vpop.eup %2979 }
 0xc31   :  { %v883_v54 = vadd.f32 1.0, %v2980_v53 }
 0xc33   :  { %2981 = vrcp.f32 %v883_v54  ;;  %v1317_v54 = vld [vmem:[#allocation15] sm:$0xff] }
 0xc3d   :  { %v2982_v55 = vpop.eup %2981 }
 0xc3e   :  { %v898_v1 = vsub.f32 1.0, %v2982_v55  ;;  %v904_v3 = vmul.f32 %v2982_v55, %v799_v43 }
 0xc96   :  { %v889_v56 = vpop.permute.xlu0 %888 }
 0xc97   :  { %v891_v57 = vmul.f32 %v2982_v55, %v889_v56  ;;  %v1318_v55 = vld [vmem:[#allocation15 + $0x8] sm:$0xff]  ;;  %v1319_v56 = vld [vmem:[#allocation15 + $0x10] sm:$0xff] }
 0xc99   :  { %893 = vrot.lane.b32.xlu1 %v891_v57, %s3225_s25  ;;  %v1320_v57 = vld [vmem:[#allocation15 + $0x18] sm:$0xff] }
 0xc9d   :  { %920 = vperm.xlu1 %2953, %v917_v58  }
 0xca7   :  { %v3552_v63 = vpop.permute.xlu0 %913 }
 0xd0b   :  { %v894_v59 = vpop.permute.xlu1 %893 }
 0xd0c   :  { %v896_v60 = vadd.f32 %v894_v59, %v806_v50  ;;  %v1309_v50 = vld [vmem:[%s3905_s8 + $0x10] sm:$0xff] }
 0xd0d   :  { %v2884_v52 = vpack.c.bf16 %v1310_v51, %v1309_v50 }
 0xd0e   :  { %2983 = vtanh.f32 %v896_v60 }
 0xd18   :  { %v2984_v61 = vpop.eup %2983 }
 0xd19   :  { %900 = vrot.lane.b32.xlu0 %v2984_v61, %s3227_s6 }
 0xd1c   :  { %v3554_v7 = vpop.permute.xlu1 %920 }
 0xd1d   :  { %v923_v9 = vmul.f32 %v3554_v7, %v799_v43 }
 0xd8b   :  { %v901_v2 = vpop.permute.xlu0 %900 }
 0xd8c   :  { %v903_v5 = vmul.f32 %v901_v2, %v898_v1  ;;  %v2472_v2 = vsel %vm1158_vm9, 1.0, %v3224_v11 }
 0xd8e   :  { %v905_v8 = vadd.f32 %v904_v3, %v903_v5  ;;  %v3611_v3 = vld [vmem:[%s3907_s10] ss:$0 sm:$0xff] }
 0xd90   :  { %v916_v10 = vmul.f32 %v3552_v63, %v905_v8 }
 0xd92   :  { %v924_v13 = vadd.f32 %v923_v9, %v916_v10 }
 0xd94   :  { %926 = vrot.lane.b32.xlu1 %v924_v13, %s3227_s6 }
 0xe06   :  { %v927_v14 = vpop.permute.xlu1 %926 }
 0xe07   :  { %930 = vst.msk [vmem:[#allocation15 + $0x20] sm:$0xff] %vm119_vm0, %v927_v14  ;;  %2692 = vmatmul.mubr.msk.f32.vlgmr.msra.gmra.mrb[6].mxu1 %vm119_vm0, %v927_v14 }
 0xe08   :  { %2876 = vmatpush3.bf16.msra.mxu1 %v3404_v12  ;;  %2713 = vmatprep.mubr.msk.f32.mxu1 %vm3223_vm1, %v3224_v11  ;;  %v931_v12 = vld [vmem:[#allocation3 + $0x28] sm:$0xff] }
 0xe09   :  { %2877 = vmatprep.subr.bf16.mxu1 %v3222_v6 }
 0xe0c   :  { %2879 = vmatpush3.bf16.msra.mxu1 %v3411_v18 }
 0xe0d   :  { %2888 = vmatprep.subr.bf16.mxu1 %v3222_v6 }
 0xe0e   :  { %v1321_v58 = vld [vmem:[#allocation15 + $0x20] sm:$0xff] }
 0xeda   :  { %v1000_v15 = vpop.f32.mrb[6].mxu1 }
 0xedb   :  { %v1011_v16 = vadd.f32 %v1000_v15, %v3430_v22  ;;  %v2693_v17 = vpop.f32.mrb[7].mxu1  ;;  %v1004_v21 = vadd.f32 %v1000_v15, %v931_v12 }
 0xedd   :  { %1013 = vrot.lane.b32.xlu0 %v1011_v16, %s3225_s25  ;;  %v2468_v24 = vmul.f32 -1.442695, %v1004_v21 }
 0xedf   :  { %2985 = vpow2.f32 %v2468_v24  ;;  %v1056_v24 = vld [vmem:[#allocation3 + $0x30] sm:$0xff] }
 0xee1   :  { %1038 = vperm.xlu0 %2954, %v2469_v19  }
 0xee9   :  { %v2986_v25 = vpop.eup %2985 }
 0xeea   :  { %v1008_v26 = vadd.f32 1.0, %v2986_v25 }
 0xeec   :  { %2987 = vrcp.f32 %v1008_v26 }
 0xef6   :  { %v2988_v18 = vpop.eup %2987 }
 0xef7   :  { %v1023_v40 = vsub.f32 1.0, %v2988_v18  ;;  %v1029_v42 = vmul.f32 %v2988_v18, %v924_v13 }
 0xf4f   :  { %v1014_v28 = vpop.permute.xlu0 %1013 }
 0xf50   :  { %v1016_v29 = vmul.f32 %v2988_v18, %v1014_v28 }
 0xf52   :  { %1018 = vrot.lane.b32.xlu1 %v1016_v29, %s3225_s25 }
 0xf56   :  { %1045 = vperm.xlu1 %2953, %v1042_v30  }
 0xf60   :  { %v3579_v38 = vpop.permute.xlu0 %1038 }
 0xfc4   :  { %v1019_v31 = vpop.permute.xlu1 %1018 }
 0xfc5   :  { %v1021_v32 = vadd.f32 %v1019_v31, %v931_v12 }
 0xfc7   :  { %2989 = vtanh.f32 %v1021_v32  ;;  %v1167_v32 = vsub.f32 1.0, %v2472_v2 }
 0xfd1   :  { %v2990_v37 = vpop.eup %2989 }
 0xfd2   :  { %1025 = vrot.lane.b32.xlu0 %v2990_v37, %s3227_s6  ;;  %v1311_v37 = vld [vmem:[#allocation14] sm:$0xff] }
 0xfd5   :  { %v3581_v45 = vpop.permute.xlu1 %1045 }
 0xfd6   :  { %v1048_v46 = vmul.f32 %v3581_v45, %v924_v13 }
0x1044   :  { %v1026_v41 = vpop.permute.xlu0 %1025 }
0x1045   :  { %v1028_v43 = vmul.f32 %v1026_v41, %v1023_v40  ;;  %v1312_v40 = vld [vmem:[#allocation14 + $0x8] sm:$0xff] }
0x1046   :  { %v3627_v41 = vpack.c.bf16 %v1312_v40, %v1311_v37 }
0x1047   :  { %v1030_v23 = vadd.f32 %v1029_v42, %v1028_v43  ;;  %v1313_v43 = vld [vmem:[#allocation14 + $0x10] sm:$0xff] }
0x1049   :  { %v1041_v48 = vmul.f32 %v3579_v38, %v1030_v23  ;;  %v1314_v23 = vld [vmem:[#allocation14 + $0x18] sm:$0xff] }
0x104b   :  { %v3585_v49 = vadd.f32 %v1048_v46, %v1041_v48  ;;  %v3633_v48 = vpack.c.bf16 %v1314_v23, %v1313_v43 }
0x104d   :  { %1051 = vrot.lane.b32.xlu1 %v3585_v49, %s3227_s6 }
0x10bf   :  { %v1052_v53 = vpop.permute.xlu1 %1051 }
0x10c0   :  { %1055 = vst.msk [vmem:[#allocation15 + $0x28] sm:$0xff] %vm119_vm0, %v1052_v53  ;;  %2703 = vmatmul.mubr.msk.f32.vlgmr.msra.gmra.mrb[12].mxu0 %vm119_vm0, %v1052_v53 }
0x10c1   :  { %2883 = vmatpush3.bf16.msra.mxu0 %v2880_v36  ;;  %2724 = vmatprep.mubr.msk.f32.mxu0 %vm119_vm0, %v1317_v54 }
0x10c2   :  { %2885 = vmatprep.subr.bf16.mxu0 %v2884_v52 }
0x10c5   :  { %2887 = vmatpush3.bf16.msra.mxu0 %v2884_v52 }
0x10c6   :  { %2900 = vmatprep.subr.bf16.mxu0 %v3222_v6 }
0x10c7   :  { %v1322_v59 = vld [vmem:[#allocation15 + $0x28] sm:$0xff] }
0x10c8   :  { %2725 = vmatmul.mubr.msk.f32.vlgmr.msra.gmra.mrb[14].mxu0 %vm119_vm0, %v1318_v55  ;;  %v2485_v55 = vld [vmem:[%s3908_s11] ss:$0 sm:$0xff] }
0x10c9   :  { %2727 = vmatprep.mubr.msk.f32.mxu0 %vm119_vm0, %v1319_v56  ;;  %2902 = vmatpush3.bf16.msra.mxu0 %v3627_v41 }
0x10ca   :  { %2903 = vmatprep.subr.bf16.mxu0 %v3222_v6 }
0x10cc   :  { %2728 = vmatmul.mubr.msk.f32.gmra.mrb[16].mxu0 %vm119_vm0, %v1320_v57 }
0x10cd   :  { %2730 = vmatprep.mubr.msk.f32.mxu0 %vm119_vm0, %v1321_v58  ;;  %2905 = vmatpush3.bf16.msra.mxu0 %v3633_v48 }
0x10ce   :  { %2912 = vmatprep.subr.bf16.mxu0 %v3222_v6 }
0x10d0   :  { %2731 = vmatmul.mubr.msk.f32.gmra.mrb[18].mxu0 %vm119_vm0, %v1322_v59 }
0x1193   :  { %v1125_v60 = vpop.f32.mrb[12].mxu0 }
0x1194   :  { %v1136_v61 = vadd.f32 %v1125_v60, %v3430_v22  ;;  %v2704_v1 = vpop.f32.mrb[13].mxu0  ;;  %v1129_v25 = vadd.f32 %v1125_v60, %v1056_v24 }
0x1196   :  { %1138 = vrot.lane.b32.xlu0 %v1136_v61, %s3225_s25  ;;  %v2471_v26 = vmul.f32 -1.442695, %v1129_v25 }
0x1198   :  { %2991 = vpow2.f32 %v2471_v26 }
0x119a   :  { %1163 = vperm.xlu0 %2954, %v2472_v2  }
0x119b   :  { %v2726_v5 = vpop.f32.mrb[14].mxu0 }
0x119c   :  { %v1427_v8 = vadd.f32 %v2726_v5, %v3611_v3  ;;  %v1421_v9 = vpop.f32.mrb[15].mxu0 }
0x119d   :  { %v1422_v10 = vadd.f32 %v3611_v3, %v1421_v9 }
0x119e   :  { %1461 = vst.msk [vmem:[#allocation3 + $0x8] sm:$0xff] %vm282_vm2, %v1427_v8 }
0x119f   :  { %1460 = vst.msk [vmem:[#allocation3] sm:$0xff] %vm282_vm2, %v1422_v10  ;;  %v2729_v13 = vpop.f32.mrb[16].mxu0 }
0x11a0   :  { %v1437_v14 = vadd.f32 %v2729_v13, %v3611_v3  ;;  %v1431_v15 = vpop.f32.mrb[17].mxu0 }
0x11a1   :  { %v1432_v16 = vadd.f32 %v3611_v3, %v1431_v15 }
0x11a2   :  { %1463 = vst.msk [vmem:[#allocation3 + $0x18] sm:$0xff] %vm282_vm2, %v1437_v14  ;;  %v2992_v18 = vpop.eup %2991 }
0x11a3   :  { %1462 = vst.msk [vmem:[#allocation3 + $0x10] sm:$0xff] %vm282_vm2, %v1432_v16  ;;  %v2732_v17 = vpop.f32.mrb[18].mxu0  ;;  %v1133_v28 = vadd.f32 1.0, %v2992_v18 }
0x11a4   :  { %v1447_v19 = vadd.f32 %v2732_v17, %v3611_v3  ;;  %v1441_v12 = vpop.f32.mrb[19].mxu0 }
0x11a5   :  { %v1442_v21 = vadd.f32 %v3611_v3, %v1441_v12  ;;  %2993 = vrcp.f32 %v1133_v28  ;;  %v1181_v28 = vld [vmem:[#allocation3 + $0x38] sm:$0xff] }
0x11a6   :  { %1465 = vst.msk [vmem:[#allocation3 + $0x28] sm:$0xff] %vm282_vm2, %v1447_v19  ;;  %v1475_v10 = vld [vmem:[#allocation3] sm:$0xff] }
0x11a7   :  { %1464 = vst.msk [vmem:[#allocation3 + $0x20] sm:$0xff] %vm282_vm2, %v1442_v21 }
0x11af   :  { %v2994_v29 = vpop.eup %2993 }
0x11b0   :  { %v1148_v46 = vsub.f32 1.0, %v2994_v29  ;;  %v1154_v51 = vmul.f32 %v2994_v29, %v3585_v49 }
0x1208   :  { %v1139_v30 = vpop.permute.xlu0 %1138 }
0x1209   :  { %v1141_v31 = vmul.f32 %v2994_v29, %v1139_v30 }
0x120b   :  { %1143 = vrot.lane.b32.xlu1 %v1141_v31, %s3225_s25 }
0x120f   :  { %1170 = vperm.xlu1 %2953, %v1167_v32  }
0x1219   :  { %v3629_v42 = vpop.permute.xlu0 %1163 }
0x127d   :  { %v1144_v33 = vpop.permute.xlu1 %1143 }
0x127e   :  { %v1146_v35 = vadd.f32 %v1144_v33, %v1056_v24 }
0x1280   :  { %2995 = vtanh.f32 %v1146_v35 }
0x128a   :  { %v2996_v36 = vpop.eup %2995 }
0x128b   :  { %1150 = vrot.lane.b32.xlu0 %v2996_v36, %s3227_s6 }
0x128e   :  { %v3637_v53 = vpop.permute.xlu1 %1170 }
0x128f   :  { %v1173_v56 = vmul.f32 %v3637_v53, %v3585_v49  ;;  %1556 = vrot.lane.b32.xlu0 %v2485_v55, %s3225_s25  ;;  %v1474_v49 = vld [vmem:[#allocation2 + $0x8] sm:$0xff] }
0x1290   :  { %v1583_v26 = vmul.f32 %v1474_v49, %v3447_v44 }
0x12fd   :  { %v1151_v50 = vpop.permute.xlu0 %1150 }
0x12fe   :  { %v1153_v52 = vmul.f32 %v1151_v50, %v1148_v46 }
0x1300   :  { %v1155_v54 = vadd.f32 %v1154_v51, %v1153_v52  ;;  %v2475_v52 = vsel %vm1283_vm10, 1.0, %v3224_v11 }
0x1301   :  { %v3667_v2 = vpop.permute.xlu0 %1556 }
0x1302   :  { %v1166_v57 = vmul.f32 %v3629_v42, %v1155_v54 }
0x1304   :  { %v3647_v58 = vadd.f32 %v1173_v56, %v1166_v57 }
0x1306   :  { %1176 = vrot.lane.b32.xlu1 %v3647_v58, %s3227_s6 }
0x1378   :  { %v1177_v59 = vpop.permute.xlu1 %1176 }
0x1379   :  { %1180 = vst.msk [vmem:[#allocation15 + $0x30] sm:$0xff] %vm119_vm0, %v1177_v59  ;;  %2714 = vmatmul.mubr.msk.f32.vlgmr.msra.gmra.mrb[8].mxu1 %vm119_vm0, %v1177_v59 }
0x137a   :  { %2890 = vmatpush3.bf16.msra.mxu1 %v3627_v41  ;;  %2744 = vmatprep.mubr.msk.f32.mxu1 %vm3223_vm1, %v3224_v11 }
0x137b   :  { %2891 = vmatprep.subr.bf16.mxu1 %v3222_v6 }
0x137e   :  { %2893 = vmatpush3.bf16.msra.mxu1 %v3633_v48 }
0x137f   :  { %2894 = vmatprep.subr.bf16.mxu1 %v3222_v6 }
0x1380   :  { %v1323_v60 = vld [vmem:[#allocation15 + $0x30] sm:$0xff] }
0x1381   :  { %2745 = vmatmul.mubr.msk.f32.vlgmr.msra.gmra.mrb[10].mxu1 %vm119_vm0, %v1474_v49  ;;  %2733 = vmatprep.mubr.msk.f32.mxu0 %vm119_vm0, %v1323_v60  ;;  %v1595_v60 = vld [vmem:[#allocation3 + $0x8] sm:$0xff] }
0x1382   :  { %2896 = vmatpush3.bf16.msra.mxu1 %v3627_v41  ;;  %2755 = vmatprep.mubr.msk.f32.mxu1 %vm3223_vm1, %v3224_v11 }
0x1383   :  { %2897 = vmatprep.subr.bf16.mxu1 %v3222_v6 }
0x1386   :  { %2899 = vmatpush3.bf16.msra.mxu1 %v3633_v48 }
0x1387   :  { %2906 = vmatprep.subr.bf16.mxu1 %v3222_v6 }
0x144c   :  { %v1250_v61 = vpop.f32.mrb[8].mxu1 }
0x144d   :  { %v2715_v1 = vpop.f32.mrb[9].mxu1  ;;  %v1261_v18 = vadd.f32 %v1250_v61, %v3430_v22  ;;  %v1254_v29 = vadd.f32 %v1250_v61, %v1181_v28 }
0x144f   :  { %v2474_v30 = vmul.f32 -1.442695, %v1254_v29 }
0x1454   :  { %v1545_v5 = vpop.f32.mrb[10].mxu1 }
0x1455   :  { %v1559_v8 = vadd.f32 %v3667_v2, %v1545_v5  ;;  %v2746_v9 = vpop.f32.mrb[11].mxu1  ;;  %v1549_v13 = vadd.f32 %v1545_v5, %v1475_v10 }
0x1457   :  { %1561 = vrot.lane.b32.xlu1 %v1559_v8, %s3225_s25  ;;  %v2487_v14 = vmul.f32 -1.442695, %v1549_v13 }
0x1459   :  { %2997 = vpow2.f32 %v2487_v14  ;;  %v1292_v14 = vsub.f32 1.0, %v2475_v52 }
0x1463   :  { %v2998_v15 = vpop.eup %2997 }
0x1464   :  { %v1553_v16 = vadd.f32 1.0, %v2998_v15 }
0x1466   :  { %2999 = vrcp.f32 %v1553_v16 }
0x1470   :  { %v3000_v17 = vpop.eup %2999 }
0x1471   :  { %v1571_v35 = vsub.f32 1.0, %v3000_v17 }
0x14c9   :  { %v1562_v19 = vpop.permute.xlu1 %1561 }
0x14ca   :  { %v1564_v12 = vmul.f32 %v3000_v17, %v1562_v19 }
0x14cc   :  { %1566 = vrot.lane.b32.xlu0 %v1564_v12, %s3225_s25 }
0x14d0   :  { %1577 = vrot.lane.b32.xlu0 %v1474_v49, %s3228_s18 }
0x153e   :  { %v1567_v21 = vpop.permute.xlu0 %1566 }
0x153f   :  { %v1569_v24 = vadd.f32 %v1567_v21, %v1475_v10 }
0x1541   :  { %3001 = vtanh.f32 %v1569_v24 }
0x1542   :  { %3003 = vpow2.f32 %v2474_v30  ;;  %v1578_v33 = vpop.permute.xlu0 %1577 }
0x1543   :  { %v1580_v37 = vmul.f32 %v3000_v17, %v1578_v33 }
0x154b   :  { %v3002_v25 = vpop.eup %3001 }
0x154c   :  { %1573 = vrot.lane.b32.xlu1 %v3002_v25, %s3227_s6  ;;  %v3004_v31 = vpop.eup %3003 }
0x154d   :  { %v1258_v32 = vadd.f32 1.0, %v3004_v31 }
0x154f   :  { %3005 = vrcp.f32 %v1258_v32 }
0x1550   :  { %1585 = vrot.lane.b32.xlu1 %v1583_v26, %s3228_s18 }
0x1554   :  { %1263 = vrot.lane.b32.xlu1 %v1261_v18, %s3225_s25 }
0x1559   :  { %v3006_v22 = vpop.eup %3005 }
0x155a   :  { %v1273_v12 = vsub.f32 1.0, %v3006_v22  ;;  %v1279_v24 = vmul.f32 %v3006_v22, %v3647_v58 }
0x15be   :  { %v1574_v36 = vpop.permute.xlu1 %1573 }
0x15bf   :  { %v1576_v40 = vmul.f32 %v1574_v36, %v1571_v35 }
0x15c1   :  { %v1581_v43 = vadd.f32 %v1580_v37, %v1576_v40 }
0x15c2   :  { %v1586_v44 = vpop.permute.xlu1 %1585 }
0x15c3   :  { %v1582_v23 = vmul.f32 %v1581_v43, %v3452_v47 }
0x15c5   :  { %v3679_v46 = vadd.f32 %v1586_v44, %v1582_v23 }
0x15c6   :  { %v1264_v50 = vpop.permute.xlu1 %1263 }
0x15c7   :  { %v1266_v51 = vmul.f32 %v3006_v22, %v1264_v50  ;;  %1597 = vrot.lane.b32.xlu0 %v3679_v46, %s3227_s6  ;;  %v1699_v40 = vmul.f32 %v3679_v46, %v3480_v27 }
0x15c9   :  { %1268 = vrot.lane.b32.xlu1 %v1266_v51, %s3225_s25 }
0x15cd   :  { %1288 = vperm.xlu1 %2953, %v2475_v52  }
0x1639   :  { %v1598_v54 = vpop.permute.xlu0 %1597 }
0x163a   :  { %2756 = vmatmul.mubr.msk.f32.vlgmr.msra.gmra.mrb[12].mxu1 %vm119_vm0, %v1598_v54 }
0x163b   :  { %v1269_v55 = vpop.permute.xlu1 %1268  ;;  %2908 = vmatpush3.bf16.msra.mxu1 %v3627_v41  ;;  %2777 = vmatprep.mubr.msk.f32.mxu1 %vm3223_vm1, %v3224_v11 }
0x163c   :  { %v1271_v56 = vadd.f32 %v1269_v55, %v1181_v28  ;;  %2909 = vmatprep.subr.bf16.mxu1 %v3222_v6 }
0x163e   :  { %3007 = vtanh.f32 %v1271_v56  ;;  %v1707_v56 = vld [vmem:[#allocation3 + $0x10] sm:$0xff] }
0x163f   :  { %2911 = vmatpush3.bf16.msra.mxu1 %v3633_v48 }
0x1640   :  { %2918 = vmatprep.subr.bf16.mxu1 %v3222_v6 }
0x1648   :  { %v3008_v0 = vpop.eup %3007 }
0x1649   :  { %1275 = vrot.lane.b32.xlu1 %v3008_v0, %s3227_s6 }
0x164c   :  { %v3697_v17 = vpop.permute.xlu1 %1288 }
0x16bb   :  { %v1276_v19 = vpop.permute.xlu1 %1275 }
0x16bc   :  { %v1278_v21 = vmul.f32 %v1276_v19, %v1273_v12 }
0x16be   :  { %v1280_v26 = vadd.f32 %v1279_v24, %v1278_v21 }
0x16c0   :  { %v1291_v28 = vmul.f32 %v3697_v17, %v1280_v26  ;;  %v1819_v26 = vld [vmem:[#allocation3 + $0x18] sm:$0xff] }
0x170d   :  { %v1667_v57 = vpop.f32.mrb[12].mxu1 }
0x170e   :  { %v1678_v59 = vadd.f32 %v1667_v57, %v3667_v2  ;;  %v2757_v49 = vpop.f32.mrb[13].mxu1  ;;  %v1671_v61 = vadd.f32 %v1667_v57, %v1595_v60 }
0x1710   :  { %1680 = vrot.lane.b32.xlu0 %v1678_v59, %s3225_s25  ;;  %v2489_v1 = vmul.f32 -1.442695, %v1671_v61 }
0x1712   :  { %3009 = vpow2.f32 %v2489_v1 }
0x171c   :  { %v3010_v5 = vpop.eup %3009 }
0x171d   :  { %v1675_v8 = vadd.f32 1.0, %v3010_v5 }
0x171f   :  { %3011 = vrcp.f32 %v1675_v8 }
0x1729   :  { %v3012_v9 = vpop.eup %3011 }
0x172a   :  { %v1690_v31 = vsub.f32 1.0, %v3012_v9  ;;  %v1696_v33 = vmul.f32 %v3012_v9, %v3679_v46 }
0x1782   :  { %v1681_v10 = vpop.permute.xlu0 %1680 }
0x1783   :  { %v1683_v13 = vmul.f32 %v3012_v9, %v1681_v10 }
0x1785   :  { %1685 = vrot.lane.b32.xlu0 %v1683_v13, %s3225_s25 }
0x1789   :  { %1295 = vperm.xlu0 %2954, %v1292_v14  }
0x17f7   :  { %v1686_v15 = vpop.permute.xlu0 %1685 }
0x17f8   :  { %v1688_v16 = vadd.f32 %v1686_v15, %v1595_v60 }
0x17fa   :  { %3013 = vtanh.f32 %v1688_v16 }
0x1804   :  { %v3014_v25 = vpop.eup %3013 }
0x1805   :  { %1692 = vrot.lane.b32.xlu0 %v3014_v25, %s3227_s6 }
0x1808   :  { %v3701_v18 = vpop.permute.xlu0 %1295 }
0x1809   :  { %v1298_v29 = vmul.f32 %v3701_v18, %v3647_v58 }
0x180b   :  { %v1299_v30 = vadd.f32 %v1298_v29, %v1291_v28 }
0x180d   :  { %1301 = vrot.lane.b32.xlu1 %v1299_v30, %s3227_s6 }
0x1877   :  { %v1693_v32 = vpop.permute.xlu0 %1692 }
0x1878   :  { %v1695_v35 = vmul.f32 %v1693_v32, %v1690_v31 }
0x187a   :  { %v1697_v36 = vadd.f32 %v1696_v33, %v1695_v35 }
0x187c   :  { %v1698_v37 = vmul.f32 %v1697_v36, %v3478_v20 }
0x187e   :  { %v3711_v43 = vadd.f32 %v1699_v40, %v1698_v37 }
0x187f   :  { %v1302_v44 = vpop.permute.xlu1 %1301 }
0x1880   :  { %1305 = vst.msk [vmem:[#allocation15 + $0x38] sm:$0xff] %vm119_vm0, %v1302_v44  ;;  %1306 = vst.msk [vmem:[#allocation2] sm:$0xff] %vm119_vm0, %v1302_v44  ;;  %1709 = vrot.lane.b32.xlu0 %v3711_v43, %s3227_s6  ;;  %v1811_v19 = vmul.f32 %v3711_v43, %v3513_v4 }
0x1887   :  { %v1324_v58 = vld [vmem:[#allocation15 + $0x38] sm:$0xff] }
0x1888   :  { %2734 = vmatmul.mubr.msk.f32.gmra.mrb[20].mxu0 %vm119_vm0, %v1324_v58 }
0x1889   :  { %2766 = vmatprep.mubr.msk.f32.mxu0 %vm3223_vm1, %v3224_v11 }
0x18f2   :  { %v1710_v23 = vpop.permute.xlu0 %1709 }
0x18f3   :  { %2767 = vmatmul.mubr.msk.f32.vlgmr.msra.gmra.mrb[22].mxu0 %vm119_vm0, %v1710_v23 }
0x18f4   :  { %2914 = vmatpush3.bf16.msra.mxu0 %v3627_v41  ;;  %2788 = vmatprep.mubr.msk.f32.mxu0 %vm3223_vm1, %v3224_v11 }
0x18f5   :  { %2915 = vmatprep.subr.bf16.mxu0 %v3222_v6 }
0x18f8   :  { %2917 = vmatpush3.bf16.msra.mxu0 %v3633_v48 }
0x18f9   :  { %2924 = vmatprep.subr.bf16.mxu0 %v3222_v6 }
0x195b   :  { %v2735_v27 = vpop.f32.mrb[20].mxu0 }
0x195c   :  { %v1457_v22 = vadd.f32 %v2735_v27, %v3611_v3  ;;  %v1451_v50 = vpop.f32.mrb[21].mxu0 }
0x195d   :  { %v1452_v51 = vadd.f32 %v3611_v3, %v1451_v50 }
0x195e   :  { %1467 = vst.msk [vmem:[#allocation3 + $0x38] sm:$0xff] %vm282_vm2, %v1457_v22 }
0x195f   :  { %1466 = vst.msk [vmem:[#allocation3 + $0x30] sm:$0xff] %vm282_vm2, %v1452_v51 }
0x19c6   :  { %v1779_v52 = vpop.f32.mrb[22].mxu0 }
0x19c7   :  { %v1790_v54 = vadd.f32 %v1779_v52, %v3667_v2  ;;  %v2768_v55 = vpop.f32.mrb[23].mxu0  ;;  %v1783_v0 = vadd.f32 %v1779_v52, %v1707_v56 }
0x19c9   :  { %1792 = vrot.lane.b32.xlu1 %v1790_v54, %s3225_s25  ;;  %v2491_v57 = vmul.f32 -1.442695, %v1783_v0  ;;  %v1931_v0 = vld [vmem:[#allocation3 + $0x20] sm:$0xff] }
0x19cb   :  { %3015 = vpow2.f32 %v2491_v57 }
0x19d5   :  { %v3016_v59 = vpop.eup %3015 }
0x19d6   :  { %v1787_v49 = vadd.f32 1.0, %v3016_v59 }
0x19d8   :  { %3017 = vrcp.f32 %v1787_v49 }
0x19e2   :  { %v3018_v60 = vpop.eup %3017 }
0x19e3   :  { %v1802_v9 = vsub.f32 1.0, %v3018_v60  ;;  %v1808_v13 = vmul.f32 %v3018_v60, %v3711_v43 }
0x1a3b   :  { %v1793_v61 = vpop.permute.xlu1 %1792 }
0x1a3c   :  { %v1795_v3 = vmul.f32 %v3018_v60, %v1793_v61 }
0x1a3e   :  { %1797 = vrot.lane.b32.xlu0 %v1795_v3, %s3225_s25 }
0x1ab0   :  { %v1798_v1 = vpop.permute.xlu0 %1797 }
0x1ab1   :  { %v1800_v5 = vadd.f32 %v1798_v1, %v1707_v56 }
0x1ab3   :  { %3019 = vtanh.f32 %v1800_v5 }
0x1abd   :  { %v3020_v8 = vpop.eup %3019 }
0x1abe   :  { %1804 = vrot.lane.b32.xlu1 %v3020_v8, %s3227_s6 }
0x1b30   :  { %v1805_v10 = vpop.permute.xlu1 %1804 }
0x1b31   :  { %v1807_v14 = vmul.f32 %v1805_v10, %v1802_v9 }
0x1b33   :  { %v1809_v15 = vadd.f32 %v1808_v13, %v1807_v14 }
0x1b35   :  { %v1810_v16 = vmul.f32 %v1809_v15, %v3511_v62 }
0x1b37   :  { %v3739_v12 = vadd.f32 %v1811_v19, %v1810_v16 }
0x1b39   :  { %1821 = vrot.lane.b32.xlu0 %v3739_v12, %s3227_s6  ;;  %v1923_v51 = vmul.f32 %v3739_v12, %v3534_v39 }
0x1bab   :  { %v1822_v21 = vpop.permute.xlu0 %1821 }
0x1bac   :  { %2778 = vmatmul.mubr.msk.f32.vlgmr.msra.gmra.mrb[14].mxu1 %vm119_vm0, %v1822_v21 }
0x1bad   :  { %2920 = vmatpush3.bf16.msra.mxu1 %v3627_v41  ;;  %2799 = vmatprep.mubr.msk.f32.mxu1 %vm3223_vm1, %v3224_v11 }
0x1bae   :  { %2921 = vmatprep.subr.bf16.mxu1 %v3222_v6 }
0x1bb1   :  { %2923 = vmatpush3.bf16.msra.mxu1 %v3633_v48 }
0x1bb2   :  { %2930 = vmatprep.subr.bf16.mxu1 %v3222_v6 }
0x1c7f   :  { %v1891_v4 = vpop.f32.mrb[14].mxu1 }
0x1c80   :  { %v1902_v24 = vadd.f32 %v1891_v4, %v3667_v2  ;;  %v2779_v25 = vpop.f32.mrb[15].mxu1  ;;  %v1895_v28 = vadd.f32 %v1891_v4, %v1819_v26 }
0x1c82   :  { %1904 = vrot.lane.b32.xlu1 %v1902_v24, %s3225_s25  ;;  %v2493_v29 = vmul.f32 -1.442695, %v1895_v28  ;;  %v2043_v28 = vld [vmem:[#allocation3 + $0x28] sm:$0xff] }
0x1c84   :  { %3021 = vpow2.f32 %v2493_v29 }
0x1c8e   :  { %v3022_v30 = vpop.eup %3021 }
0x1c8f   :  { %v1899_v31 = vadd.f32 1.0, %v3022_v30 }
0x1c91   :  { %3023 = vrcp.f32 %v1899_v31 }
0x1c9b   :  { %v3024_v32 = vpop.eup %3023 }
0x1c9c   :  { %v1914_v44 = vsub.f32 1.0, %v3024_v32  ;;  %v1920_v23 = vmul.f32 %v3024_v32, %v3739_v12 }
0x1cf4   :  { %v1905_v33 = vpop.permute.xlu1 %1904 }
0x1cf5   :  { %v1907_v35 = vmul.f32 %v3024_v32, %v1905_v33 }
0x1cf7   :  { %1909 = vrot.lane.b32.xlu0 %v1907_v35, %s3225_s25 }
0x1d69   :  { %v1910_v36 = vpop.permute.xlu0 %1909 }
0x1d6a   :  { %v1912_v37 = vadd.f32 %v1910_v36, %v1819_v26 }
0x1d6c   :  { %3025 = vtanh.f32 %v1912_v37 }
0x1d76   :  { %v3026_v40 = vpop.eup %3025 }
0x1d77   :  { %1916 = vrot.lane.b32.xlu1 %v3026_v40, %s3227_s6 }
0x1de9   :  { %v1917_v58 = vpop.permute.xlu1 %1916 }
0x1dea   :  { %v1919_v27 = vmul.f32 %v1917_v58, %v1914_v44 }
0x1dec   :  { %v1921_v22 = vadd.f32 %v1920_v23, %v1919_v27 }
0x1dee   :  { %v1922_v50 = vmul.f32 %v1921_v22, %v3532_v34 }
0x1df0   :  { %v3758_v52 = vadd.f32 %v1923_v51, %v1922_v50 }
0x1df2   :  { %1933 = vrot.lane.b32.xlu0 %v3758_v52, %s3227_s6  ;;  %v2035_v21 = vmul.f32 %v3758_v52, %v3554_v7 }
0x1e64   :  { %v1934_v54 = vpop.permute.xlu0 %1933 }
0x1e65   :  { %2789 = vmatmul.mubr.msk.f32.vlgmr.msra.gmra.mrb[24].mxu0 %vm119_vm0, %v1934_v54 }
0x1e66   :  { %2926 = vmatpush3.bf16.msra.mxu0 %v3627_v41  ;;  %2810 = vmatprep.mubr.msk.f32.mxu0 %vm3223_vm1, %v3224_v11 }
0x1e67   :  { %2927 = vmatprep.subr.bf16.mxu0 %v3222_v6 }
0x1e6a   :  { %2929 = vmatpush3.bf16.msra.mxu0 %v3633_v48 }
0x1f38   :  { %v2003_v55 = vpop.f32.mrb[24].mxu0 }
0x1f39   :  { %v2014_v39 = vadd.f32 %v2003_v55, %v3667_v2  ;;  %v2790_v56 = vpop.f32.mrb[25].mxu0  ;;  %v2007_v57 = vadd.f32 %v2003_v55, %v1931_v0 }
0x1f3b   :  { %2016 = vrot.lane.b32.xlu1 %v2014_v39, %s3225_s25  ;;  %v2495_v59 = vmul.f32 -1.442695, %v2007_v57  ;;  %v2155_v39 = vld [vmem:[#allocation3 + $0x30] sm:$0xff] }
0x1f3d   :  { %3027 = vpow2.f32 %v2495_v59 }
0x1f47   :  { %v3028_v49 = vpop.eup %3027 }
0x1f48   :  { %v2011_v60 = vadd.f32 1.0, %v3028_v49 }
0x1f4a   :  { %3029 = vrcp.f32 %v2011_v60 }
0x1f54   :  { %v3030_v61 = vpop.eup %3029 }
0x1f55   :  { %v2026_v10 = vsub.f32 1.0, %v3030_v61  ;;  %v2032_v14 = vmul.f32 %v3030_v61, %v3758_v52 }
0x1fad   :  { %v2017_v3 = vpop.permute.xlu1 %2016 }
0x1fae   :  { %v2019_v1 = vmul.f32 %v3030_v61, %v2017_v3 }
0x1fb0   :  { %2021 = vrot.lane.b32.xlu0 %v2019_v1, %s3225_s25 }
0x2022   :  { %v2022_v5 = vpop.permute.xlu0 %2021 }
0x2023   :  { %v2024_v8 = vadd.f32 %v2022_v5, %v1931_v0 }
0x2025   :  { %3031 = vtanh.f32 %v2024_v8 }
0x202f   :  { %v3032_v9 = vpop.eup %3031 }
0x2030   :  { %2028 = vrot.lane.b32.xlu1 %v3032_v9, %s3227_s6 }
0x20a2   :  { %v2029_v13 = vpop.permute.xlu1 %2028 }
0x20a3   :  { %v2031_v15 = vmul.f32 %v2029_v13, %v2026_v10 }
0x20a5   :  { %v2033_v16 = vadd.f32 %v2032_v14, %v2031_v15 }
0x20a7   :  { %v2034_v19 = vmul.f32 %v2033_v16, %v3552_v63 }
0x20a9   :  { %v3776_v4 = vadd.f32 %v2035_v21, %v2034_v19 }
0x20ab   :  { %2045 = vrot.lane.b32.xlu0 %v3776_v4, %s3227_s6  ;;  %v2147_v27 = vmul.f32 %v3776_v4, %v3581_v45 }
0x211d   :  { %v2046_v24 = vpop.permute.xlu0 %2045 }
0x211e   :  { %2800 = vmatmul.mubr.msk.f32.vlgmr.msra.gmra.mrb[16].mxu1 %vm119_vm0, %v2046_v24 }
0x211f   :  { %2932 = vmatpush3.bf16.msra.mxu1 %v3627_v41  ;;  %2821 = vmatprep.mubr.msk.f32.mxu1 %vm3223_vm1, %v3224_v11 }
0x2120   :  { %2933 = vmatprep.subr.bf16.mxu1 %v3222_v6 }
0x2123   :  { %2935 = vmatpush3.bf16.msra.mxu1 %v3633_v48 }
0x21f1   :  { %v2115_v25 = vpop.f32.mrb[16].mxu1 }
0x21f2   :  { %v2126_v7 = vadd.f32 %v2115_v25, %v3667_v2  ;;  %v2801_v26 = vpop.f32.mrb[17].mxu1  ;;  %v2119_v29 = vadd.f32 %v2115_v25, %v2043_v28 }
0x21f4   :  { %2128 = vrot.lane.b32.xlu1 %v2126_v7, %s3225_s25  ;;  %v2497_v30 = vmul.f32 -1.442695, %v2119_v29  ;;  %v2267_v7 = vld [vmem:[#allocation3 + $0x38] sm:$0xff] }
0x21f6   :  { %3033 = vpow2.f32 %v2497_v30 }
0x2200   :  { %v3034_v31 = vpop.eup %3033 }
0x2201   :  { %v2123_v32 = vadd.f32 1.0, %v3034_v31 }
0x2203   :  { %3035 = vrcp.f32 %v2123_v32 }
0x220d   :  { %v3036_v41 = vpop.eup %3035 }
0x220e   :  { %v2138_v36 = vsub.f32 1.0, %v3036_v41  ;;  %v2144_v40 = vmul.f32 %v3036_v41, %v3776_v4 }
0x2266   :  { %v2129_v33 = vpop.permute.xlu1 %2128 }
0x2267   :  { %v2131_v11 = vmul.f32 %v3036_v41, %v2129_v33  ;;  %v1589_v41 = vmul.f32 %v3679_v46, %v3452_v47  ;;  %v2037_v33 = vmul.f32 %v3776_v4, %v3552_v63  ;;  %v1925_v4 = vmul.f32 %v3758_v52, %v3532_v34 }
0x2269   :  { %2133 = vrot.lane.b32.xlu0 %v2131_v11, %s3225_s25 }
0x22db   :  { %v2134_v6 = vpop.permute.xlu0 %2133 }
0x22dc   :  { %v2136_v48 = vadd.f32 %v2134_v6, %v2043_v28 }
0x22de   :  { %3037 = vtanh.f32 %v2136_v48 }
0x22e8   :  { %v3038_v35 = vpop.eup %3037 }
0x22e9   :  { %2140 = vrot.lane.b32.xlu1 %v3038_v35, %s3227_s6 }
0x235b   :  { %v2141_v37 = vpop.permute.xlu1 %2140 }
0x235c   :  { %v2143_v44 = vmul.f32 %v2141_v37, %v2138_v36 }
0x235e   :  { %v2145_v58 = vadd.f32 %v2144_v40, %v2143_v44 }
0x2360   :  { %v2146_v23 = vmul.f32 %v2145_v58, %v3579_v38 }
0x2362   :  { %v3794_v22 = vadd.f32 %v2147_v27, %v2146_v23 }
0x2364   :  { %2157 = vrot.lane.b32.xlu0 %v3794_v22, %s3227_s6  ;;  %v2259_v15 = vmul.f32 %v3794_v22, %v3637_v53  ;;  %v2149_v35 = vmul.f32 %v3794_v22, %v3579_v38 }
0x23d6   :  { %v2158_v50 = vpop.permute.xlu0 %2157 }
0x23d7   :  { %2811 = vmatmul.mubr.msk.f32.vlgmr.msra.gmra.mrb[26].mxu0 %vm119_vm0, %v2158_v50 }
0x24aa   :  { %v2227_v51 = vpop.f32.mrb[26].mxu0 }
0x24ab   :  { %v2238_v54 = vadd.f32 %v2227_v51, %v3667_v2  ;;  %v2812_v55 = vpop.f32.mrb[27].mxu0  ;;  %v2231_v56 = vadd.f32 %v2227_v51, %v2155_v39 }
0x24ad   :  { %2240 = vrot.lane.b32.xlu1 %v2238_v54, %s3225_s25  ;;  %v2499_v0 = vmul.f32 -1.442695, %v2231_v56 }
0x24af   :  { %3039 = vpow2.f32 %v2499_v0 }
0x24b9   :  { %v3040_v57 = vpop.eup %3039 }
0x24ba   :  { %v2235_v45 = vadd.f32 1.0, %v3040_v57 }
0x24bc   :  { %3041 = vrcp.f32 %v2235_v45 }
0x24c6   :  { %v3042_v59 = vpop.eup %3041 }
0x24c7   :  { %v2250_v5 = vsub.f32 1.0, %v3042_v59  ;;  %v2256_v9 = vmul.f32 %v3042_v59, %v3794_v22 }
0x251f   :  { %v2241_v49 = vpop.permute.xlu1 %2240 }
0x2520   :  { %v2243_v60 = vmul.f32 %v3042_v59, %v2241_v49 }
0x2522   :  { %2245 = vrot.lane.b32.xlu0 %v2243_v60, %s3225_s25 }
0x2594   :  { %v2246_v61 = vpop.permute.xlu0 %2245 }
0x2595   :  { %v2248_v3 = vadd.f32 %v2246_v61, %v2155_v39 }
0x2597   :  { %3043 = vtanh.f32 %v2248_v3 }
0x25a1   :  { %v3044_v1 = vpop.eup %3043 }
0x25a2   :  { %2252 = vrot.lane.b32.xlu1 %v3044_v1, %s3227_s6 }
0x2614   :  { %v2253_v8 = vpop.permute.xlu1 %2252 }
0x2615   :  { %v2255_v10 = vmul.f32 %v2253_v8, %v2250_v5 }
0x2617   :  { %v2257_v13 = vadd.f32 %v2256_v9, %v2255_v10 }
0x2619   :  { %v2258_v14 = vmul.f32 %v2257_v13, %v3629_v42 }
0x261b   :  { %v2260_v16 = vadd.f32 %v2259_v15, %v2258_v14 }
0x261d   :  { %2269 = vrot.lane.b32.xlu0 %v2260_v16, %s3227_s6  ;;  %v2261_v11 = vmul.f32 %v2260_v16, %v3629_v42  ;;  %v1701_v42 = vmul.f32 %v3711_v43, %v3478_v20  ;;  %v2371_v23 = vmul.f32 %v2260_v16, %v3701_v18 }
0x268f   :  { %v2270_v19 = vpop.permute.xlu0 %2269 }
0x2690   :  { %2822 = vmatmul.mubr.msk.f32.vlgmr.msra.gmra.mrb[18].mxu1 %vm119_vm0, %v2270_v19 }
0x2763   :  { %v2339_v21 = vpop.f32.mrb[18].mxu1 }
0x2764   :  { %v2350_v24 = vadd.f32 %v2339_v21, %v3667_v2  ;;  %v2823_v25 = vpop.f32.mrb[19].mxu1  ;;  %v2343_v26 = vadd.f32 %v2339_v21, %v2267_v7  ;;  %v1813_v2 = vmul.f32 %v3739_v12, %v3511_v62 }
0x2766   :  { %2352 = vrot.lane.b32.xlu1 %v2350_v24, %s3225_s25  ;;  %v2501_v28 = vmul.f32 -1.442695, %v2343_v26 }
0x2768   :  { %3045 = vpow2.f32 %v2501_v28 }
0x2772   :  { %v3046_v29 = vpop.eup %3045 }
0x2773   :  { %v2347_v30 = vadd.f32 1.0, %v3046_v29 }
0x2775   :  { %3047 = vrcp.f32 %v2347_v30 }
0x277f   :  { %v3048_v53 = vpop.eup %3047 }
0x2780   :  { %v2362_v36 = vsub.f32 1.0, %v3048_v53  ;;  %v2368_v40 = vmul.f32 %v3048_v53, %v2260_v16 }
0x27d8   :  { %v2353_v31 = vpop.permute.xlu1 %2352 }
0x27d9   :  { %v2355_v32 = vmul.f32 %v3048_v53, %v2353_v31 }
0x27db   :  { %2357 = vrot.lane.b32.xlu0 %v2355_v32, %s3225_s25 }
0x27df   :  { %1591 = vrot.lane.b32.xlu0 %v1589_v41, %s3227_s6 }
0x27e3   :  { %1815 = vrot.lane.b32.xlu0 %v1813_v2, %s3227_s6 }
0x27e7   :  { %2039 = vrot.lane.b32.xlu0 %v2037_v33, %s3227_s6 }
0x27eb   :  { %2263 = vrot.lane.b32.xlu0 %v2261_v11, %s3227_s6 }
0x284d   :  { %v2358_v6 = vpop.permute.xlu0 %2357 }
0x284e   :  { %v2360_v48 = vadd.f32 %v2358_v6, %v2267_v7 }
0x2850   :  { %3049 = vtanh.f32 %v2360_v48 }
0x2851   :  { %v1592_v47 = vpop.permute.xlu0 %1591 }
0x2852   :  { %1594 = vst.msk [vmem:[#allocation15] sm:$0xff] %vm119_vm0, %v1592_v47 }
0x2855   :  { %v1816_v46 = vpop.permute.xlu0 %1815 }
0x2856   :  { %1818 = vst.msk [vmem:[#allocation15 + $0x10] sm:$0xff] %vm119_vm0, %v1816_v46 }
0x2859   :  { %v2040_v62 = vpop.permute.xlu0 %2039 }
0x285a   :  { %v3050_v12 = vpop.eup %3049  ;;  %2042 = vst.msk [vmem:[#allocation15 + $0x20] sm:$0xff] %vm119_vm0, %v2040_v62 }
0x285b   :  { %2364 = vrot.lane.b32.xlu1 %v3050_v12, %s3227_s6 }
0x285d   :  { %v2264_v63 = vpop.permute.xlu0 %2263 }
0x285e   :  { %2266 = vst.msk [vmem:[#allocation15 + $0x30] sm:$0xff] %vm119_vm0, %v2264_v63 }
0x285f   :  { %1703 = vrot.lane.b32.xlu1 %v1701_v42, %s3227_s6 }
0x2863   :  { %1927 = vrot.lane.b32.xlu1 %v1925_v4, %s3227_s6 }
0x2867   :  { %2151 = vrot.lane.b32.xlu1 %v2149_v35, %s3227_s6 }
0x28cd   :  { %v2365_v37 = vpop.permute.xlu1 %2364 }
0x28ce   :  { %v2367_v44 = vmul.f32 %v2365_v37, %v2362_v36 }
0x28d0   :  { %v2369_v58 = vadd.f32 %v2368_v40, %v2367_v44 }
0x28d1   :  { %v1704_v20 = vpop.permute.xlu1 %1703 }
0x28d2   :  { %v2370_v43 = vmul.f32 %v2369_v58, %v3697_v17  ;;  %1706 = vst.msk [vmem:[#allocation15 + $0x8] sm:$0xff] %vm119_vm0, %v1704_v20 }
0x28d4   :  { %v2372_v34 = vadd.f32 %v2371_v23, %v2370_v43 }
0x28d5   :  { %v1928_v52 = vpop.permute.xlu1 %1927 }
0x28d6   :  { %1930 = vst.msk [vmem:[#allocation15 + $0x18] sm:$0xff] %vm119_vm0, %v1928_v52  ;;  %2380 = vrot.lane.b32.xlu0 %v2372_v34, %s3227_s6  ;;  %v2373_v38 = vmul.f32 %v2372_v34, %v3697_v17 }
0x28d8   :  { %2375 = vrot.lane.b32.xlu1 %v2373_v38, %s3227_s6 }
0x28d9   :  { %v2152_v27 = vpop.permute.xlu1 %2151 }
0x28da   :  { %2154 = vst.msk [vmem:[#allocation15 + $0x28] sm:$0xff] %vm119_vm0, %v2152_v27 }
0x2948   :  { %v2381_v22 = vpop.permute.xlu0 %2380 }
0x2949   :  { %2383 = vst.msk [vmem:[#allocation2 + $0x8] sm:$0xff] %vm119_vm0, %v2381_v22 }
0x294a   :  { %v2376_v50 = vpop.permute.xlu1 %2375 }
0x294b   :  { %2378 = vst.msk [vmem:[#allocation15 + $0x38] sm:$0xff] %vm119_vm0, %v2376_v50 }
0x294c PF:  { %p2503_p13 = scmp.gt.s32.totalorder %s3897_s0, 0 }
0x294d   :  { %v3229_v18 = vmov (!%p2503_p13), 0.0  }
0x294e   :  { %2387 = sbr.rel (%p2503_p13) target bundleno = 10581 (0x2955), region = 77  ;;  %2389 = vst.msk [vmem:[#allocation15] sm:$0xff] (!%p2503_p13), %vm119_vm0, %v3229_v18  ;;  %2390 = vst.msk [vmem:[#allocation15 + $0x8] sm:$0xff] (!%p2503_p13), %vm119_vm0, %v3229_v18 }
0x294f   :  { %2391 = vst.msk [vmem:[#allocation15 + $0x10] sm:$0xff] (!%p2503_p13), %vm119_vm0, %v3229_v18  ;;  %2392 = vst.msk [vmem:[#allocation15 + $0x18] sm:$0xff] (!%p2503_p13), %vm119_vm0, %v3229_v18 }
0x2950   :  { %2393 = vst.msk [vmem:[#allocation15 + $0x20] sm:$0xff] (!%p2503_p13), %vm119_vm0, %v3229_v18  ;;  %2394 = vst.msk [vmem:[#allocation15 + $0x28] sm:$0xff] (!%p2503_p13), %vm119_vm0, %v3229_v18 }
0x2951   :  { %2395 = vst.msk [vmem:[#allocation15 + $0x30] sm:$0xff] (!%p2503_p13), %vm119_vm0, %v3229_v18  ;;  %2396 = vst.msk [vmem:[#allocation15 + $0x38] sm:$0xff] (!%p2503_p13), %vm119_vm0, %v3229_v18 }
0x2955 PF:  { %v2400_v17 = vld [vmem:[#allocation2] sm:$0xff]  ;;  %v2401_v51 = vld [vmem:[#allocation2 + $0x8] sm:$0xff]  ;;  %s3230_s0 = smov [#allocation15]   ;;  %s3231_s17 = smov [#allocation16]  }
0x2956   :  { %2403 = vst.msk [vmem:[#allocation16] sm:$0xff] %vm119_vm0, %v2400_v17  ;;  %2404 = vst.msk [vmem:[#allocation16 + $0x8] sm:$0xff] %vm119_vm0, %v2401_v51  ;;  %s2410_s22 = sshll.u32 %s3230_s0, 4  ;;  %s2422_s19 = sshll.u32 %s3231_s17, 4  ;;  %s2411_s22 = int_to_ptr.vmem [resolvable:$true] %s2410_s22  ;;  %s3860_s19 = int_to_ptr.vmem [resolvable:$true] %s2422_s19 }
0x2957   :  { %s3161_s23 = scalar_lea.vmem %s2411_s22, 1024  ;;  %p3166_p1 = scmp.lt.s32.totalorder %s2411_s22, %s2411_s22 }
0x2958   :  { %p3162_p0 = scmp.ne.s32.totalorder %s2411_s22, %s3161_s23  ;;  %p3167_p2 = scmp.lt.s32.totalorder %s3161_s23, %s3161_s23 }
0x295a   :  { %p3168_p3 = por %p3167_p2, %p3166_p1 }
0x295c   :  { %p3169_p4 = pnand %p3168_p3, %p3162_p0 }
0x295e   :  { %3172 = shalt.err (!%p3169_p4)
}
0x295f   :  { %s3173_s24 = scalar_lea.hbm %s3909_s12, 1024 }
0x2960   :  { %p3174_p5 = scmp.ne.s32.totalorder %s3909_s12, %s3173_s24  ;;  %p3177_p6 = scmp.lt.u32.totalorder %s3173_s24, %s3909_s12 }
0x2962   :  { %p3179_p7 = pnand %p3177_p6, %p3174_p5 }
0x2964   :  { %3182 = shalt.err (!%p3179_p7)
}
0x2965   :  { %2416 = dma.vmem_to_hbm [thread:$0]  %s2411_s22, 1024, %s3909_s12, [#allocation8], %s3217_s20, %s3217_s20, %s3218_s21  }
0x2966   :  { %s3183_s29 = scalar_lea.vmem %s3860_s19, 256  ;;  %p3188_p9 = scmp.lt.s32.totalorder %s3860_s19, %s3860_s19 }
0x2967   :  { %p3184_p8 = scmp.ne.s32.totalorder %s3860_s19, %s3183_s29  ;;  %p3189_p10 = scmp.lt.s32.totalorder %s3183_s29, %s3183_s29 }
0x2969   :  { %p3190_p11 = por %p3189_p10, %p3188_p9 }
0x296b   :  { %p3191_p12 = pnand %p3190_p11, %p3184_p8 }
0x296d   :  { %3194 = shalt.err (!%p3191_p12)
}
0x296e   :  { %s3195_s5 = scalar_lea.hbm %s3910_s13, 256 }
0x296f   :  { %p3196_p13 = scmp.ne.s32.totalorder %s3910_s13, %s3195_s5  ;;  %p3199_p0 = scmp.lt.u32.totalorder %s3195_s5, %s3910_s13 }
0x2971   :  { %p3201_p1 = pnand %p3199_p0, %p3196_p13 }
0x2973   :  { %3204 = shalt.err (!%p3201_p1)
}
0x2974   :  { %2428 = dma.vmem_to_hbm [thread:$0]  %s3860_s19, 256, %s3910_s13, [#allocation17], %s3217_s20, %s3217_s20, %s3218_s21  }
0x2975   :  { %3211 = dma.done.wait [#allocation8], 1024  }
0x2976   :  { %3212 = vsyncadd [#allocation8], 4294966272 }
0x2977   :  { %3213 = dma.done.wait [#allocation17], 256  }
0x2978   :  { %3214 = vsyncadd [#allocation17], 4294967040 }
0x2979   :  { %2435 = vsyncpa [#allocation7], 1 }
0x297a   :  { %2436 = vsyncpa [#allocation10], 1 }
0x297b   :  { %2437 = vsyncpa [#allocation13], 1 }
0x297c   :  { %2438 = vsyncpa [#allocation8], 1 }
0x297d   :  { %2439 = vsyncpa [#allocation17], 1 }

</bundles_post_ra>
